<compile_context>
chip_gen: v7x
topology: tpu7x:2x2x1
jax: 0.10.0
libtpu: 0.0.40
codegen_flags: <defaults>
</compile_context>

<pallas_src>
import jax
import jax.numpy as jnp
from jax.experimental import pallas as pl
from jax.experimental.pallas import tpu as pltpu

IN_DIM = 784
HID_DIM = 1000
OUT_DIM = 10

HID_PAD = 1024   # 8 * 128  (hidden width padded for MXU / lane alignment)
OUT_PAD = 128    # 1 * 128  (lane-dense output block; avoids masked stores)

NEG = -1e30      # bias for padded logit columns -> exp() == 0 exactly


def _round_up(n, m):
    return ((n + m - 1) // m) * m


def _cdiv(a, b):
    return (a + b - 1) // b


def sbc_mlp_kernel(x_ref, w1_ref, b1_ref, w2_ref, b2_ref, w3_ref, b3_ref, o_ref):
    # bf16 cast of the activation tile happens here (no separate XLA pass on x)
    x = x_ref[...].astype(jnp.bfloat16)
    # FC_1 + ReLU   (bf16 MXU inputs, f32 accumulation)
    z1 = jnp.dot(x, w1_ref[...], preferred_element_type=jnp.float32)
    z1 = jnp.maximum(z1 + b1_ref[...], 0.0).astype(jnp.bfloat16)
    # FC_2 + ReLU
    z2 = jnp.dot(z1, w2_ref[...], preferred_element_type=jnp.float32)
    z2 = jnp.maximum(z2 + b2_ref[...], 0.0).astype(jnp.bfloat16)
    # out layer: padded class columns carry a -1e30 bias so they vanish in softmax
    logits = jnp.dot(z2, w3_ref[...], preferred_element_type=jnp.float32) + b3_ref[...]
    # numerically stable softmax, exact normalization (cost << matmuls)
    m = jnp.max(logits, axis=-1, keepdims=True)
    e = jnp.exp(logits - m)
    o_ref[...] = e / jnp.sum(e, axis=-1, keepdims=True)


def _plan_batch(B, tm_target=None):
    """Pick (tm, B_pad). Block second-to-last dims are either multiples of 8 or
    equal to the full array dim, so every choice here is a legal BlockSpec."""
    if tm_target is None:
        tm_target = 1024 if B >= 2048 else 512
    b8 = _round_up(B, 8)
    steps = _cdiv(b8, tm_target)
    if b8 >= 512:
        # Keep both v7x TensorCores busy once the batch is big enough to split.
        steps = max(steps, 2)
    if steps == 1:
        # Single tile covering the exact batch: block == full array, no pad op.
        return B, B
    tm = _round_up(_cdiv(b8, steps), 8)
    return tm, tm * steps


def _vmem_limit_bytes(tm):
    # TM <= 512 working set is ~20 MiB (double-buffered f32 x/out tiles,
    # double-buffered bf16 weights, in-kernel f32/bf16 temps); TM ~1024 needs
    # more room but still fits v7x's 64 MiB/TC with margin.
    return (32 << 20) if tm <= 512 else (48 << 20)


def prepare_params(params):
    """Transpose to (in, out), pad hidden/class dims to MXU-aligned widths,
    cast weights to bf16. Biases stay f32 (b3's -1e30 pad must apply exactly)."""
    w1, b1, w2, b2, w3, b3 = params  # PyTorch layout: W is (out, in), b is (out,)

    def pad_w(w, in_pad, out_pad):
        wt = w.T.astype(jnp.bfloat16)  # (in, out)
        return jnp.pad(wt, ((0, in_pad - wt.shape[0]), (0, out_pad - wt.shape[1])))

    def pad_b(b, out_pad, fill=0.0):
        b2d = b.astype(jnp.float32).reshape(1, -1)
        return jnp.pad(b2d, ((0, 0), (0, out_pad - b2d.shape[1])),
                       constant_values=fill)

    return (
        pad_w(w1, IN_DIM, HID_PAD), pad_b(b1, HID_PAD),      # W1 keeps 784 rows
        pad_w(w2, HID_PAD, HID_PAD), pad_b(b2, HID_PAD),
        pad_w(w3, HID_PAD, OUT_PAD), pad_b(b3, OUT_PAD, fill=NEG),
    )


def sbc_splitted_mnist_forward(x, prepared_params, *, tm=None):
    """x: (B, 1, 28, 28) or (B, 784), any float dtype. Returns (B, 10) softmax."""
    w1, b1, w2, b2, w3, b3 = prepared_params
    x2d = x.reshape(-1, IN_DIM).astype(jnp.float32)
    B = x2d.shape[0]

    tm, B_pad = _plan_batch(B, tm)
    if B_pad != B:
        # Batch-dim-only pad, and only when B isn't tileable as-is.
        x2d = jnp.pad(x2d, ((0, B_pad - B), (0, 0)))

    grid = (B_pad // tm,)
    const = lambda i: (0, 0)         # weights/biases VMEM-resident across steps

    w_bytes = 2 * (IN_DIM * HID_PAD + HID_PAD * HID_PAD + HID_PAD * OUT_PAD)  # bf16
    cost = pl.CostEstimate(
        flops=int(2 * B_pad * (IN_DIM * HID_PAD + HID_PAD * HID_PAD + HID_PAD * OUT_PAD)),
        transcendentals=int(B_pad * OUT_PAD),
        bytes_accessed=int(B_pad * IN_DIM * 4 + w_bytes + B_pad * OUT_PAD * 4),
    )

    out = pl.pallas_call(
        sbc_mlp_kernel,
        out_shape=jax.ShapeDtypeStruct((B_pad, OUT_PAD), jnp.float32),
        grid=grid,
        in_specs=[
            pl.BlockSpec((tm, IN_DIM), lambda i: (i, 0)),    # x tile (pipelined)
            pl.BlockSpec((IN_DIM, HID_PAD), const),          # W1 (bf16)
            pl.BlockSpec((1, HID_PAD), const),               # b1 (f32)
            pl.BlockSpec((HID_PAD, HID_PAD), const),         # W2 (bf16)
            pl.BlockSpec((1, HID_PAD), const),               # b2 (f32)
            pl.BlockSpec((HID_PAD, OUT_PAD), const),         # W3 (bf16)
            pl.BlockSpec((1, OUT_PAD), const),               # b3 (f32, pad=-1e30)
        ],
        out_specs=pl.BlockSpec((tm, OUT_PAD), lambda i: (i, 0)),
        compiler_params=pltpu.CompilerParams(
            dimension_semantics=("parallel",),               # megacore on v7x
            vmem_limit_bytes=_vmem_limit_bytes(tm),
        ),
        cost_estimate=cost,
    )(x2d, w1, b1, w2, b2, w3, b3)

    return out[:B, :OUT_DIM]


def init_params(key):
    """Deterministic synthetic weights in PyTorch nn.Linear layout (out, in)."""
    k1, k2, k3, k4, k5, k6 = jax.random.split(key, 6)
    w1 = jax.random.normal(k1, (HID_DIM, IN_DIM), jnp.float32) * 0.02
    b1 = jax.random.normal(k2, (HID_DIM,), jnp.float32) * 0.01
    w2 = jax.random.normal(k3, (HID_DIM, HID_DIM), jnp.float32) * 0.02
    b2 = jax.random.normal(k4, (HID_DIM,), jnp.float32) * 0.01
    w3 = jax.random.normal(k5, (OUT_DIM, HID_DIM), jnp.float32) * 0.02
    b3 = jax.random.normal(k6, (OUT_DIM,), jnp.float32) * 0.01
    return (w1, b1, w2, b2, w3, b3)


def reference_forward(x, params):
    """Pure-JAX f32 reference matching the PyTorch module exactly."""
    w1, b1, w2, b2, w3, b3 = params
    x2d = x.reshape(-1, IN_DIM).astype(jnp.float32)
    z = jnp.maximum(x2d @ w1.T + b1, 0.0)
    z = jnp.maximum(z @ w2.T + b2, 0.0)
    return jax.nn.softmax(z @ w3.T + b3, axis=-1)


if __name__ == "__main__":
    key = jax.random.PRNGKey(0)
    kx, kp, kx2 = jax.random.split(key, 3)
    params = init_params(kp)
    prepared = prepare_params(params)

    # Small MNIST-shaped batch (B=2, NCHW): exercises the single-tile, no-pad path.
    x_small = jax.random.normal(kx, (2, 1, 28, 28), jnp.float32)
    out_small = jax.block_until_ready(sbc_splitted_mnist_forward(x_small, prepared))
    ref_small = reference_forward(x_small, params)
    assert out_small.shape == (2, OUT_DIM)
    # bf16 matmuls -> relaxed tolerance vs. the f32 reference
    assert jnp.allclose(out_small, ref_small, atol=2e-2, rtol=2e-2)
    assert jnp.allclose(jnp.sum(out_small, axis=-1), 1.0, atol=1e-3)

    # Larger flat batch: exercises the multi-step (>=2 grid steps) tiled path.
    x_big = jax.random.normal(kx2, (1040, IN_DIM), jnp.float32)
    out_big = jax.block_until_ready(sbc_splitted_mnist_forward(x_big, prepared))
    ref_big = reference_forward(x_big, params)
    assert out_big.shape == (1040, OUT_DIM)
    assert jnp.allclose(out_big, ref_big, atol=2e-2, rtol=2e-2)
    assert jnp.allclose(jnp.sum(out_big, axis=-1), 1.0, atol=1e-3)

    print("KERNEL_OK")
</pallas_src>

<mosaic_0001>
module attributes {stable_mosaic.version = 11 : i64} {
  func.func @sbc_mlp_kernel(%arg0: i32, %arg1: memref<2x784xf32, #tpu.memory_space<vmem>>, %arg2: memref<784x1024xbf16, #tpu.memory_space<vmem>>, %arg3: memref<1x1024xf32, #tpu.memory_space<vmem>>, %arg4: memref<1024x1024xbf16, #tpu.memory_space<vmem>>, %arg5: memref<1x1024xf32, #tpu.memory_space<vmem>>, %arg6: memref<1024x128xbf16, #tpu.memory_space<vmem>>, %arg7: memref<1x128xf32, #tpu.memory_space<vmem>>, %arg8: memref<2x128xf32, #tpu.memory_space<vmem>>) attributes {dimension_semantics = [#tpu.dimension_semantics<parallel>], iteration_bounds = array<i64: 1>, scalar_prefetch = 0 : i64, scratch_operands = 0 : i64, tpu.core_type = #tpu.core_type<tc>, window_params = [{transform_indices = @transform_0, window_bounds = array<i64: 2, 784>}, {pipeline_mode = #tpu.pipeline_mode<synchronous>, transform_indices = @transform_1, window_bounds = array<i64: 784, 1024>}, {pipeline_mode = #tpu.pipeline_mode<synchronous>, transform_indices = @transform_2, window_bounds = array<i64: 1, 1024>}, {pipeline_mode = #tpu.pipeline_mode<synchronous>, transform_indices = @transform_3, window_bounds = array<i64: 1024, 1024>}, {pipeline_mode = #tpu.pipeline_mode<synchronous>, transform_indices = @transform_4, window_bounds = array<i64: 1, 1024>}, {pipeline_mode = #tpu.pipeline_mode<synchronous>, transform_indices = @transform_5, window_bounds = array<i64: 1024, 128>}, {pipeline_mode = #tpu.pipeline_mode<synchronous>, transform_indices = @transform_6, window_bounds = array<i64: 1, 128>}, {transform_indices = @transform_7, window_bounds = array<i64: 2, 128>}]} {
    %c0 = arith.constant 0 : index
    %c0_0 = arith.constant 0 : index
    %0 = vector.load %arg1[%c0, %c0_0] : memref<2x784xf32, #tpu.memory_space<vmem>>, vector<2x784xf32>
    %1 = arith.truncf %0 : vector<2x784xf32> to vector<2x784xbf16>
    %c0_1 = arith.constant 0 : index
    %c0_2 = arith.constant 0 : index
    %2 = vector.load %arg2[%c0_1, %c0_2] : memref<784x1024xbf16, #tpu.memory_space<vmem>>, vector<784x1024xbf16>
    %cst = arith.constant dense<0.000000e+00> : vector<2x1024xf32>
    %3 = tpu.matmul %1, %2, %cst {dimension_numbers = #tpu.dot_dimension_numbers<[1], [0], [0], [1], [0, 0, 1, 1], [], []>} : vector<2x784xbf16>, vector<784x1024xbf16>, vector<2x1024xf32> -> vector<2x1024xf32>
    %c0_3 = arith.constant 0 : index
    %c0_4 = arith.constant 0 : index
    %4 = vector.load %arg3[%c0_3, %c0_4] : memref<1x1024xf32, #tpu.memory_space<vmem>>, vector<1x1024xf32>
    %5 = vector.broadcast %4 : vector<1x1024xf32> to vector<2x1024xf32>
    %6 = arith.addf %3, %5 : vector<2x1024xf32>
    %cst_5 = arith.constant 0.000000e+00 : f32
    %7 = vector.broadcast %cst_5 : f32 to vector<2x1024xf32>
    %8 = arith.maximumf %6, %7 : vector<2x1024xf32>
    %9 = arith.truncf %8 : vector<2x1024xf32> to vector<2x1024xbf16>
    %c0_6 = arith.constant 0 : index
    %c0_7 = arith.constant 0 : index
    %10 = vector.load %arg4[%c0_6, %c0_7] : memref<1024x1024xbf16, #tpu.memory_space<vmem>>, vector<1024x1024xbf16>
    %cst_8 = arith.constant dense<0.000000e+00> : vector<2x1024xf32>
    %11 = tpu.matmul %9, %10, %cst_8 {dimension_numbers = #tpu.dot_dimension_numbers<[1], [0], [0], [1], [0, 0, 1, 1], [], []>} : vector<2x1024xbf16>, vector<1024x1024xbf16>, vector<2x1024xf32> -> vector<2x1024xf32>
    %c0_9 = arith.constant 0 : index
    %c0_10 = arith.constant 0 : index
    %12 = vector.load %arg5[%c0_9, %c0_10] : memref<1x1024xf32, #tpu.memory_space<vmem>>, vector<1x1024xf32>
    %13 = vector.broadcast %12 : vector<1x1024xf32> to vector<2x1024xf32>
    %14 = arith.addf %11, %13 : vector<2x1024xf32>
    %cst_11 = arith.constant 0.000000e+00 : f32
    %15 = vector.broadcast %cst_11 : f32 to vector<2x1024xf32>
    %16 = arith.maximumf %14, %15 : vector<2x1024xf32>
    %17 = arith.truncf %16 : vector<2x1024xf32> to vector<2x1024xbf16>
    %c0_12 = arith.constant 0 : index
    %c0_13 = arith.constant 0 : index
    %18 = vector.load %arg6[%c0_12, %c0_13] : memref<1024x128xbf16, #tpu.memory_space<vmem>>, vector<1024x128xbf16>
    %cst_14 = arith.constant dense<0.000000e+00> : vector<2x128xf32>
    %19 = tpu.matmul %17, %18, %cst_14 {dimension_numbers = #tpu.dot_dimension_numbers<[1], [0], [0], [1], [0, 0, 1, 1], [], []>} : vector<2x1024xbf16>, vector<1024x128xbf16>, vector<2x128xf32> -> vector<2x128xf32>
    %c0_15 = arith.constant 0 : index
    %c0_16 = arith.constant 0 : index
    %20 = vector.load %arg7[%c0_15, %c0_16] : memref<1x128xf32, #tpu.memory_space<vmem>>, vector<1x128xf32>
    %21 = vector.broadcast %20 : vector<1x128xf32> to vector<2x128xf32>
    %22 = arith.addf %19, %21 : vector<2x128xf32>
    %cst_17 = arith.constant dense<0xFF800000> : vector<2xf32>
    %23 = vector.multi_reduction <maximumf>, %22, %cst_17 [1] : vector<2x128xf32> to vector<2xf32>
    %24 = vector.shape_cast %23 : vector<2xf32> to vector<2x1xf32>
    %25 = vector.broadcast %24 : vector<2x1xf32> to vector<2x128xf32>
    %26 = arith.subf %22, %25 : vector<2x128xf32>
    %27 = math.exp %26 : vector<2x128xf32>
    %cst_18 = arith.constant dense<0.000000e+00> : vector<2xf32>
    %28 = vector.multi_reduction <add>, %27, %cst_18 [1] : vector<2x128xf32> to vector<2xf32>
    %29 = vector.shape_cast %28 : vector<2xf32> to vector<2x1xf32>
    %30 = vector.broadcast %29 : vector<2x1xf32> to vector<2x128xf32>
    %31 = arith.divf %27, %30 : vector<2x128xf32>
    %c0_19 = arith.constant 0 : index
    %c0_20 = arith.constant 0 : index
    %32 = vector.load %arg8[%c0_19, %c0_20] : memref<2x128xf32, #tpu.memory_space<vmem>>, vector<2x128xf32>
    tpu.vector_store %arg8[%c0_19, %c0_20], %31 {strides = array<i32>} : memref<2x128xf32, #tpu.memory_space<vmem>>, vector<2x128xf32>,
    return
  }
  func.func @transform_0(%arg0: i32) -> (i32, i32) {
    %c0_i32 = arith.constant 0 : i32
    %c0_i32_0 = arith.constant 0 : i32
    return %arg0, %c0_i32 : i32, i32
  }
  func.func @transform_1(%arg0: i32) -> (i32, i32) {
    %c0_i32 = arith.constant 0 : i32
    %c0_i32_0 = arith.constant 0 : i32
    %c0_i32_1 = arith.constant 0 : i32
    return %c0_i32, %c0_i32_0 : i32, i32
  }
  func.func @transform_2(%arg0: i32) -> (i32, i32) {
    %c0_i32 = arith.constant 0 : i32
    %c0_i32_0 = arith.constant 0 : i32
    %c0_i32_1 = arith.constant 0 : i32
    return %c0_i32, %c0_i32_0 : i32, i32
  }
  func.func @transform_3(%arg0: i32) -> (i32, i32) {
    %c0_i32 = arith.constant 0 : i32
    %c0_i32_0 = arith.constant 0 : i32
    %c0_i32_1 = arith.constant 0 : i32
    return %c0_i32, %c0_i32_0 : i32, i32
  }
  func.func @transform_4(%arg0: i32) -> (i32, i32) {
    %c0_i32 = arith.constant 0 : i32
    %c0_i32_0 = arith.constant 0 : i32
    %c0_i32_1 = arith.constant 0 : i32
    return %c0_i32, %c0_i32_0 : i32, i32
  }
  func.func @transform_5(%arg0: i32) -> (i32, i32) {
    %c0_i32 = arith.constant 0 : i32
    %c0_i32_0 = arith.constant 0 : i32
    %c0_i32_1 = arith.constant 0 : i32
    return %c0_i32, %c0_i32_0 : i32, i32
  }
  func.func @transform_6(%arg0: i32) -> (i32, i32) {
    %c0_i32 = arith.constant 0 : i32
    %c0_i32_0 = arith.constant 0 : i32
    %c0_i32_1 = arith.constant 0 : i32
    return %c0_i32, %c0_i32_0 : i32, i32
  }
  func.func @transform_7(%arg0: i32) -> (i32, i32) {
    %c0_i32 = arith.constant 0 : i32
    %c0_i32_0 = arith.constant 0 : i32
    return %arg0, %c0_i32 : i32, i32
  }
}

</mosaic_0001>

<bundles_post_ra>
// kernel: tpu_custom_call.1
= control target key start
LH: loop header
LB: loop body
LE: loop exit
PB: predicated region body
PF: predicated region fallthrough
CT: control target
= control target key end

     0   :  { %12 = vsyncpa [#allocation3], 0  ;;  %s9551_s0 = inlined_call_operand.hbm [shape: f32[2,784], index: 0, kind: input, shape index: {}]   ;;  %s9552_s1 = inlined_call_operand.hbm [shape: bf16[784,1024], index: 1, kind: input, shape index: {}]   ;;  %s9553_s2 = inlined_call_operand.hbm [shape: f32[1,1024], index: 2, kind: input, shape index: {}]   ;;  %s9554_s3 = inlined_call_operand.hbm [shape: bf16[1024,1024], index: 3, kind: input, shape index: {}]   ;;  %s9555_s4 = inlined_call_operand.hbm [shape: f32[1,1024], index: 4, kind: input, shape index: {}]   ;;  %s9556_s5 = inlined_call_operand.hbm [shape: bf16[1024,128], index: 5, kind: input, shape index: {}]   ;;  %s9557_s6 = inlined_call_operand.hbm [shape: f32[1,128], index: 6, kind: input, shape index: {}]   ;;  %s9558_s7 = inlined_call_operand.hbm [shape: f32[2,128], index: 7, kind: output, shape index: {}]  }
   0x1   :  { %13 = vsyncpa [#allocation6], 0 }
   0x2   :  { %14 = vsyncpa [#allocation9], 0 }
   0x3   :  { %15 = vsyncpa [#allocation12], 0 }
   0x4   :  { %16 = vsyncpa [#allocation4], 0  ;;  %s9176_s24 = smov [#allocation5]   ;;  %s8990_s28 = scalar_lea.hbm %s9552_s1, 50176 }
   0x5   :  { %s32_s25 = sshll.u32 %s9176_s24, 4  ;;  %p8991_p0 = scmp.ne.s32.totalorder %s9552_s1, %s8990_s28  ;;  %s33_s25 = int_to_ptr.vmem [resolvable:$true] %s32_s25 }
   0x6   :  { %p8994_p1 = scmp.lt.u32.totalorder %s8990_s28, %s9552_s1 }
   0x8   :  { %p8996_p2 = pnand %p8994_p1, %p8991_p0 }
   0xa   :  { %8999 = shalt.err (!%p8996_p2)
}
   0xb   :  { %s9000_s10 = scalar_lea.vmem %s33_s25, 50176  ;;  %p9005_p4 = scmp.lt.s32.totalorder %s33_s25, %s33_s25 }
   0xc   :  { %p9001_p3 = scmp.ne.s32.totalorder %s33_s25, %s9000_s10  ;;  %p9006_p5 = scmp.lt.s32.totalorder %s9000_s10, %s9000_s10 }
   0xe   :  { %p9007_p6 = por %p9006_p5, %p9005_p4 }
  0x10   :  { %p9008_p7 = pnand %p9007_p6, %p9001_p3 }
  0x12   :  { %9011 = shalt.err (!%p9008_p7)
}
  0x13   :  { %s9177_s11 = smov 512   ;;  %s9178_s12 = smov 32  }
  0x14   :  { %38 = dma.hbm_to_vmem [thread:$0]  %s9552_s1, 50176, %s33_s25, [#allocation6], %s9177_s11, %s9177_s11, %s9178_s12  }
  0x15   :  { %s9179_s15 = smov [#allocation8]   ;;  %s9180_s17 = smov [#allocation11]  }
  0x16   :  { %s54_s16 = sshll.u32 %s9179_s15, 4  ;;  %s76_s18 = sshll.u32 %s9180_s17, 4  ;;  %s55_s16 = int_to_ptr.vmem [resolvable:$true] %s54_s16  ;;  %s77_s18 = int_to_ptr.vmem [resolvable:$true] %s76_s18 }
  0x17   :  { %s9012_s21 = scalar_lea.hbm %s9554_s3, 65536 }
  0x18   :  { %p9013_p8 = scmp.ne.s32.totalorder %s9554_s3, %s9012_s21  ;;  %p9016_p9 = scmp.lt.u32.totalorder %s9012_s21, %s9554_s3 }
  0x1a   :  { %p9018_p10 = pnand %p9016_p9, %p9013_p8 }
  0x1c   :  { %9021 = shalt.err (!%p9018_p10)
}
  0x1d   :  { %s9022_s1 = scalar_lea.vmem %s55_s16, 65536  ;;  %p9027_p12 = scmp.lt.s32.totalorder %s55_s16, %s55_s16 }
  0x1e   :  { %p9023_p11 = scmp.ne.s32.totalorder %s55_s16, %s9022_s1  ;;  %p9028_p13 = scmp.lt.s32.totalorder %s9022_s1, %s9022_s1 }
  0x20   :  { %p9029_p0 = por %p9028_p13, %p9027_p12 }
  0x22   :  { %p9030_p1 = pnand %p9029_p0, %p9023_p11 }
  0x24   :  { %9033 = shalt.err (!%p9030_p1)
}
  0x25   :  { %60 = dma.hbm_to_vmem [thread:$0]  %s9554_s3, 65536, %s55_s16, [#allocation9], %s9177_s11, %s9177_s11, %s9178_s12  }
  0x26   :  { %s9034_s30 = scalar_lea.hbm %s9556_s5, 8192 }
  0x27   :  { %p9035_p2 = scmp.ne.s32.totalorder %s9556_s5, %s9034_s30  ;;  %p9038_p3 = scmp.lt.u32.totalorder %s9034_s30, %s9556_s5 }
  0x29   :  { %p9040_p4 = pnand %p9038_p3, %p9035_p2 }
  0x2b   :  { %9043 = shalt.err (!%p9040_p4)
}
  0x2c   :  { %s9044_s14 = scalar_lea.vmem %s77_s18, 8192  ;;  %p9049_p6 = scmp.lt.s32.totalorder %s77_s18, %s77_s18 }
  0x2d   :  { %p9045_p5 = scmp.ne.s32.totalorder %s77_s18, %s9044_s14  ;;  %p9050_p7 = scmp.lt.s32.totalorder %s9044_s14, %s9044_s14 }
  0x2f   :  { %p9051_p8 = por %p9050_p7, %p9049_p6 }
  0x31   :  { %p9052_p9 = pnand %p9051_p8, %p9045_p5 }
  0x33   :  { %9055 = shalt.err (!%p9052_p9)
}
  0x34   :  { %s9181_s3 = smov 64   ;;  %s9182_s11 = smov 4  }
  0x35   :  { %82 = dma.hbm_to_vmem [thread:$0]  %s9556_s5, 8192, %s77_s18, [#allocation12], %s9181_s3, %s9181_s3, %s9182_s11  }
  0x36   :  { %s9183_s16 = smov [#allocation2]   ;;  %s9184_s19 = smov [#allocation7]  }
  0x37   :  { %s23_s17 = sshll.u32 %s9183_s16, 4  ;;  %s45_s20 = sshll.u32 %s9184_s19, 4  ;;  %s24_s17 = int_to_ptr.vmem [resolvable:$true] %s23_s17  ;;  %s46_s20 = int_to_ptr.vmem [resolvable:$true] %s45_s20 }
  0x38   :  { %s9056_s23 = scalar_lea.hbm %s9551_s0, 224 }
  0x39   :  { %p9057_p10 = scmp.ne.s32.totalorder %s9551_s0, %s9056_s23  ;;  %p9060_p11 = scmp.lt.u32.totalorder %s9056_s23, %s9551_s0 }
  0x3b   :  { %p9062_p12 = pnand %p9060_p11, %p9057_p10 }
  0x3d   :  { %9065 = shalt.err (!%p9062_p12)
}
  0x3e   :  { %s9066_s5 = scalar_lea.vmem %s24_s17, 224  ;;  %p9071_p0 = scmp.lt.s32.totalorder %s24_s17, %s24_s17 }
  0x3f   :  { %p9067_p13 = scmp.ne.s32.totalorder %s24_s17, %s9066_s5  ;;  %p9072_p1 = scmp.lt.s32.totalorder %s9066_s5, %s9066_s5 }
  0x41   :  { %p9073_p2 = por %p9072_p1, %p9071_p0 }
  0x43   :  { %p9074_p3 = pnand %p9073_p2, %p9067_p13 }
  0x45   :  { %9077 = shalt.err (!%p9074_p3)
}
  0x46   :  { %26 = dma.hbm_to_vmem [thread:$0]  %s9551_s0, 224, %s24_s17, [#allocation3]  }
  0x47   :  { %s9078_s30 = scalar_lea.hbm %s9553_s2, 128 }
  0x48   :  { %p9079_p4 = scmp.ne.s32.totalorder %s9553_s2, %s9078_s30  ;;  %p9082_p5 = scmp.lt.u32.totalorder %s9078_s30, %s9553_s2 }
  0x4a   :  { %p9084_p6 = pnand %p9082_p5, %p9079_p4 }
  0x4c   :  { %9087 = shalt.err (!%p9084_p6)
}
  0x4d   :  { %s9088_s14 = scalar_lea.vmem %s46_s20, 128  ;;  %p9093_p8 = scmp.lt.s32.totalorder %s46_s20, %s46_s20 }
  0x4e   :  { %p9089_p7 = scmp.ne.s32.totalorder %s46_s20, %s9088_s14  ;;  %p9094_p9 = scmp.lt.s32.totalorder %s9088_s14, %s9088_s14 }
  0x50   :  { %p9095_p10 = por %p9094_p9, %p9093_p8 }
  0x52   :  { %p9096_p11 = pnand %p9095_p10, %p9089_p7 }
  0x54   :  { %9099 = shalt.err (!%p9096_p11)
}
  0x55   :  { %48 = dma.hbm_to_vmem [thread:$0]  %s9553_s2, 128, %s46_s20, [#allocation6]  }
  0x56   :  { %s9185_s11 = smov [#allocation10]   ;;  %s9186_s15 = smov [#allocation13]  }
  0x57   :  { %s67_s12 = sshll.u32 %s9185_s11, 4  ;;  %s89_s16 = sshll.u32 %s9186_s15, 4  ;;  %s68_s12 = int_to_ptr.vmem [resolvable:$true] %s67_s12  ;;  %s90_s16 = int_to_ptr.vmem [resolvable:$true] %s89_s16 }
  0x58   :  { %s9100_s21 = scalar_lea.hbm %s9555_s4, 128 }
  0x59   :  { %p9101_p12 = scmp.ne.s32.totalorder %s9555_s4, %s9100_s21  ;;  %p9104_p13 = scmp.lt.u32.totalorder %s9100_s21, %s9555_s4 }
  0x5b   :  { %p9106_p0 = pnand %p9104_p13, %p9101_p12 }
  0x5d   :  { %9109 = shalt.err (!%p9106_p0)
}
  0x5e   :  { %s9110_s2 = scalar_lea.vmem %s68_s12, 128  ;;  %p9115_p2 = scmp.lt.s32.totalorder %s68_s12, %s68_s12 }
  0x5f   :  { %p9111_p1 = scmp.ne.s32.totalorder %s68_s12, %s9110_s2  ;;  %p9116_p3 = scmp.lt.s32.totalorder %s9110_s2, %s9110_s2 }
  0x61   :  { %p9117_p4 = por %p9116_p3, %p9115_p2 }
  0x63   :  { %p9118_p5 = pnand %p9117_p4, %p9111_p1 }
  0x65   :  { %9121 = shalt.err (!%p9118_p5)
}
  0x66   :  { %70 = dma.hbm_to_vmem [thread:$0]  %s9555_s4, 128, %s68_s12, [#allocation9]  }
  0x67   :  { %s9122_s18 = scalar_lea.hbm %s9557_s6, 16 }
  0x68   :  { %p9123_p6 = scmp.ne.s32.totalorder %s9557_s6, %s9122_s18  ;;  %p9126_p7 = scmp.lt.u32.totalorder %s9122_s18, %s9557_s6 }
  0x6a   :  { %p9128_p8 = pnand %p9126_p7, %p9123_p6 }
  0x6c   :  { %9131 = shalt.err (!%p9128_p8)
}
  0x6d   :  { %s9132_s8 = scalar_lea.vmem %s90_s16, 16  ;;  %s9136_s9 = scalar_lea.vmem %s90_s16, 32 }
  0x6e   :  { %p9133_p9 = scmp.ne.s32.totalorder %s90_s16, %s9132_s8  ;;  %p9137_p10 = scmp.lt.s32.totalorder %s90_s16, %s90_s16 }
  0x6f   :  { %p9138_p11 = scmp.lt.s32.totalorder %s9136_s9, %s9132_s8 }
  0x71   :  { %p9139_p12 = por %p9138_p11, %p9137_p10 }
  0x73   :  { %p9140_p13 = pnand %p9139_p12, %p9133_p9 }
  0x75   :  { %9143 = shalt.err (!%p9140_p13)
}
  0x76   :  { %92 = dma.hbm_to_vmem [thread:$0]  %s9557_s6, 16, %s90_s16, [#allocation12]  }
  0x77   :  { %9166 = dma.done.wait [#allocation3], 224  }
  0x78   :  { %9167 = vsyncadd [#allocation3], 4294967072 }
  0x79   :  { %9168 = dma.done.wait [#allocation6], 50304  }
  0x7a   :  { %9169 = vsyncadd [#allocation6], 4294916992 }
  0x7b   :  { %9170 = dma.done.wait [#allocation9], 65664  }
  0x7c   :  { %9171 = vsyncadd [#allocation9], 4294901632 }
  0x7d   :  { %9172 = dma.done.wait [#allocation12], 8208  }
  0x7e   :  { %9173 = vsyncadd [#allocation12], 4294959088  ;;  %v166_v0 = vld [vmem:[#allocation5] sm:$0xff]  ;;  %v167_v2 = vld [vmem:[#allocation5 + $0x8] sm:$0xff]  ;;  %v9187_v32 = vmov 1983009808   ;;  %v123_v34 = vlaneseq }
  0x7f   :  { %v170_v1 = vld [vmem:[#allocation5 + $0x20] sm:$0xff]  ;;  %v171_v4 = vld [vmem:[#allocation5 + $0x28] sm:$0xff]  ;;  %v121_v33 = vunpack.c.l.s4 %v9187_v32  ;;  %v9319_v59 = vld [vmem:[#allocation2] sm:$0xff]  ;;  %vm2560_vm0 = vcmask 130048   ;;  %vm7701_vm1 = vcmask 1041408   ;;  %s9189_s6 = smov [#allocation14]  }
  0x80   :  { %v7733_v3 = vcombine.high %v166_v0, %v170_v1  ;;  %v7732_v5 = vcombine.low %v166_v0, %v170_v1  ;;  %v174_v6 = vld [vmem:[#allocation5 + $0x40] sm:$0xff]  ;;  %v7735_v8 = vcombine.high %v167_v2, %v171_v4  ;;  %v7734_v9 = vcombine.low %v167_v2, %v171_v4  ;;  %v175_v11 = vld [vmem:[#allocation5 + $0x48] sm:$0xff]  ;;  %s7720_s13 = sshll.u32 %s9189_s6, 4  ;;  %s7721_s13 = int_to_ptr.vmem [resolvable:$true] %s7720_s13 }
  0x81   :  { %v178_v7 = vld [vmem:[#allocation5 + $0x60] sm:$0xff]  ;;  %v179_v12 = vld [vmem:[#allocation5 + $0x68] sm:$0xff]  ;;  %v122_v43 = vunpack.c.0.s8 %v121_v33  ;;  %v9314_v44 = vshrl.u32 %v123_v34, 7  ;;  %s9144_s14 = scalar_lea.vmem %s7721_s13, 32  ;;  %p9149_p1 = scmp.lt.s32.totalorder %s7721_s13, %s7721_s13 }
  0x82   :  { %v7741_v10 = vcombine.high %v174_v6, %v178_v7  ;;  %v182_v13 = vld [vmem:[#allocation5 + $0x80] sm:$0xff]  ;;  %2564 = vmatprep.subr.bf16.mxu0 %v7733_v3  ;;  %v7743_v14 = vcombine.high %v175_v11, %v179_v12  ;;  %v183_v16 = vld [vmem:[#allocation5 + $0x88] sm:$0xff]  ;;  %2728 = vmatprep.subr.bf16.mxu1 %v7735_v8  ;;  %v7740_v18 = vcombine.low %v174_v6, %v178_v7  ;;  %p9145_p0 = scmp.ne.s32.totalorder %s7721_s13, %s9144_s14  ;;  %p9150_p2 = scmp.lt.s32.totalorder %s9144_s14, %s9144_s14 }
  0x83   :  { %v186_v15 = vld [vmem:[#allocation5 + $0xa0] sm:$0xff]  ;;  %v187_v17 = vld [vmem:[#allocation5 + $0xa8] sm:$0xff]  ;;  %2565 = vmatpush1.bf16.msra.mxu0 %v7732_v5  ;;  %2729 = vmatpush1.bf16.msra.mxu1 %v7734_v9  ;;  %v7742_v19 = vcombine.low %v175_v11, %v179_v12  ;;  %v9317_v53 = vsub.s32 %v122_v43, %v9314_v44 }
  0x84   :  { %2566 = vmatprep.subr.bf16.mxu0 %v7741_v10  ;;  %v7749_v20 = vcombine.high %v182_v13, %v186_v15  ;;  %2730 = vmatprep.subr.bf16.mxu1 %v7743_v14  ;;  %v7751_v21 = vcombine.high %v183_v16, %v187_v17  ;;  %v190_v22 = vld [vmem:[#allocation5 + $0xc0] sm:$0xff]  ;;  %v191_v24 = vld [vmem:[#allocation5 + $0xc8] sm:$0xff]  ;;  %v7748_v26 = vcombine.low %v182_v13, %v186_v15  ;;  %p9151_p3 = por %p9150_p2, %p9149_p1 }
  0x85   :  { %v194_v23 = vld [vmem:[#allocation5 + $0xe0] sm:$0xff]  ;;  %v195_v25 = vld [vmem:[#allocation5 + $0xe8] sm:$0xff]  ;;  %v7750_v27 = vcombine.low %v183_v16, %v187_v17  ;;  %v9323_v63 = vrot.slane %v9319_v59, %v9317_v53 }
  0x86   :  { %v7757_v28 = vcombine.high %v190_v22, %v194_v23  ;;  %v7759_v29 = vcombine.high %v191_v24, %v195_v25  ;;  %v198_v30 = vld [vmem:[#allocation5 + $0x100] sm:$0xff]  ;;  %v199_v35 = vld [vmem:[#allocation5 + $0x108] sm:$0xff]  ;;  %v7756_v37 = vcombine.low %v190_v22, %v194_v23  ;;  %v7758_v38 = vcombine.low %v191_v24, %v195_v25  ;;  %p9152_p4 = pnand %p9151_p3, %p9145_p0 }
  0x87   :  { %2567 = vmatpush1.bf16.msra.mxu0 %v7740_v18  ;;  %2731 = vmatpush1.bf16.msra.mxu1 %v7742_v19  ;;  %v202_v31 = vld [vmem:[#allocation5 + $0x120] sm:$0xff]  ;;  %v203_v36 = vld [vmem:[#allocation5 + $0x128] sm:$0xff]  ;;  %v134_v3 = vcombine.high %v9323_v63, %v9323_v63 }
  0x88   :  { %2568 = vmatprep.subr.bf16.mxu0 %v7749_v20  ;;  %2732 = vmatprep.subr.bf16.mxu1 %v7751_v21  ;;  %v7765_v39 = vcombine.high %v198_v30, %v202_v31  ;;  %v7767_v40 = vcombine.high %v199_v35, %v203_v36  ;;  %v206_v41 = vld [vmem:[#allocation5 + $0x140] sm:$0xff]  ;;  %v207_v45 = vld [vmem:[#allocation5 + $0x148] sm:$0xff]  ;;  %v7764_v47 = vcombine.low %v198_v30, %v202_v31 }
  0x89   :  { %v210_v42 = vld [vmem:[#allocation5 + $0x160] sm:$0xff]  ;;  %v211_v46 = vld [vmem:[#allocation5 + $0x168] sm:$0xff]  ;;  %v7766_v48 = vcombine.low %v199_v35, %v203_v36  ;;  %v9327_v9 = vpack.c.bf16 %v134_v3, %v134_v3 }
  0x8a   :  { %v7773_v49 = vcombine.high %v206_v41, %v210_v42  ;;  %v7775_v50 = vcombine.high %v207_v45, %v211_v46  ;;  %v214_v51 = vld [vmem:[#allocation5 + $0x180] sm:$0xff]  ;;  %v215_v54 = vld [vmem:[#allocation5 + $0x188] sm:$0xff]  ;;  %v7772_v56 = vcombine.low %v206_v41, %v210_v42  ;;  %v7774_v57 = vcombine.low %v207_v45, %v211_v46 }
  0x8b   :  { %2569 = vmatpush1.bf16.msra.mxu0 %v7748_v26  ;;  %2733 = vmatpush1.bf16.msra.mxu1 %v7750_v27  ;;  %v218_v52 = vld [vmem:[#allocation5 + $0x1a0] sm:$0xff]  ;;  %v219_v55 = vld [vmem:[#allocation5 + $0x1a8] sm:$0xff] }
  0x8c   :  { %2570 = vmatprep.subr.bf16.mxu0 %v7757_v28  ;;  %2734 = vmatprep.subr.bf16.mxu1 %v7759_v29  ;;  %v7781_v58 = vcombine.high %v214_v51, %v218_v52  ;;  %v7783_v60 = vcombine.high %v215_v54, %v219_v55  ;;  %v222_v61 = vld [vmem:[#allocation5 + $0x1c0] sm:$0xff]  ;;  %v223_v0 = vld [vmem:[#allocation5 + $0x1c8] sm:$0xff]  ;;  %v7780_v2 = vcombine.low %v214_v51, %v218_v52 }
  0x8d   :  { %v226_v62 = vld [vmem:[#allocation5 + $0x1e0] sm:$0xff]  ;;  %v227_v1 = vld [vmem:[#allocation5 + $0x1e8] sm:$0xff]  ;;  %v7782_v4 = vcombine.low %v215_v54, %v219_v55  ;;  %2596 = vmatprep.mubr.bf16.mxu0 %v9327_v9  ;;  %2760 = vmatprep.mubr.bf16.mxu1 %v9327_v9 }
  0x8e   :  { %v7789_v5 = vcombine.high %v222_v61, %v226_v62  ;;  %v7791_v6 = vcombine.high %v223_v0, %v227_v1  ;;  %v230_v7 = vld [vmem:[#allocation5 + $0x200] sm:$0xff]  ;;  %v231_v10 = vld [vmem:[#allocation5 + $0x208] sm:$0xff]  ;;  %v7788_v12 = vcombine.low %v222_v61, %v226_v62  ;;  %v7790_v13 = vcombine.low %v223_v0, %v227_v1 }
  0x8f   :  { %2571 = vmatpush1.bf16.msra.mxu0 %v7756_v37  ;;  %2735 = vmatpush1.bf16.msra.mxu1 %v7758_v38  ;;  %v234_v8 = vld [vmem:[#allocation5 + $0x220] sm:$0xff]  ;;  %v235_v11 = vld [vmem:[#allocation5 + $0x228] sm:$0xff] }
  0x90   :  { %2572 = vmatprep.subr.bf16.mxu0 %v7765_v39  ;;  %2736 = vmatprep.subr.bf16.mxu1 %v7767_v40  ;;  %v7797_v14 = vcombine.high %v230_v7, %v234_v8  ;;  %v7799_v15 = vcombine.high %v231_v10, %v235_v11  ;;  %v238_v16 = vld [vmem:[#allocation5 + $0x240] sm:$0xff]  ;;  %v239_v18 = vld [vmem:[#allocation5 + $0x248] sm:$0xff]  ;;  %v7796_v20 = vcombine.low %v230_v7, %v234_v8 }
  0x91   :  { %v242_v17 = vld [vmem:[#allocation5 + $0x260] sm:$0xff]  ;;  %v243_v19 = vld [vmem:[#allocation5 + $0x268] sm:$0xff]  ;;  %v7798_v21 = vcombine.low %v231_v10, %v235_v11 }
  0x92   :  { %v7805_v22 = vcombine.high %v238_v16, %v242_v17  ;;  %v7807_v23 = vcombine.high %v239_v18, %v243_v19  ;;  %v246_v24 = vld [vmem:[#allocation5 + $0x280] sm:$0xff]  ;;  %v247_v26 = vld [vmem:[#allocation5 + $0x288] sm:$0xff]  ;;  %v7804_v28 = vcombine.low %v238_v16, %v242_v17  ;;  %v7806_v29 = vcombine.low %v239_v18, %v243_v19 }
  0x93   :  { %2573 = vmatpush1.bf16.msra.mxu0 %v7764_v47  ;;  %2737 = vmatpush1.bf16.msra.mxu1 %v7766_v48  ;;  %v250_v25 = vld [vmem:[#allocation5 + $0x2a0] sm:$0xff]  ;;  %v251_v27 = vld [vmem:[#allocation5 + $0x2a8] sm:$0xff] }
  0x94   :  { %2574 = vmatprep.subr.bf16.mxu0 %v7773_v49  ;;  %2738 = vmatprep.subr.bf16.mxu1 %v7775_v50  ;;  %v7813_v30 = vcombine.high %v246_v24, %v250_v25  ;;  %v7815_v31 = vcombine.high %v247_v26, %v251_v27  ;;  %v254_v32 = vld [vmem:[#allocation5 + $0x2c0] sm:$0xff]  ;;  %v255_v34 = vld [vmem:[#allocation5 + $0x2c8] sm:$0xff]  ;;  %v7812_v36 = vcombine.low %v246_v24, %v250_v25 }
  0x95   :  { %v258_v33 = vld [vmem:[#allocation5 + $0x2e0] sm:$0xff]  ;;  %v259_v35 = vld [vmem:[#allocation5 + $0x2e8] sm:$0xff]  ;;  %v7814_v37 = vcombine.low %v247_v26, %v251_v27  ;;  %v9340_v25 = vpack.c.bf16 %v9323_v63, %v9323_v63 }
  0x96   :  { %v7821_v38 = vcombine.high %v254_v32, %v258_v33  ;;  %v7823_v39 = vcombine.high %v255_v34, %v259_v35  ;;  %v262_v40 = vld [vmem:[#allocation5 + $0x300] sm:$0xff]  ;;  %v263_v42 = vld [vmem:[#allocation5 + $0x308] sm:$0xff]  ;;  %v7820_v45 = vcombine.low %v254_v32, %v258_v33  ;;  %v7822_v46 = vcombine.low %v255_v34, %v259_v35 }
  0x97   :  { %2575 = vmatpush1.bf16.msra.mxu0 %v7772_v56  ;;  %2739 = vmatpush1.bf16.msra.mxu1 %v7774_v57  ;;  %v266_v41 = vld [vmem:[#allocation5 + $0x320] sm:$0xff]  ;;  %v267_v43 = vld [vmem:[#allocation5 + $0x328] sm:$0xff] }
  0x98   :  { %2576 = vmatprep.subr.bf16.mxu0 %v7781_v58  ;;  %2740 = vmatprep.subr.bf16.mxu1 %v7783_v60  ;;  %v7829_v47 = vcombine.high %v262_v40, %v266_v41  ;;  %v7831_v48 = vcombine.high %v263_v42, %v267_v43  ;;  %v270_v49 = vld [vmem:[#allocation5 + $0x340] sm:$0xff]  ;;  %v271_v51 = vld [vmem:[#allocation5 + $0x348] sm:$0xff]  ;;  %v7828_v54 = vcombine.low %v262_v40, %v266_v41 }
  0x99   :  { %v274_v50 = vld [vmem:[#allocation5 + $0x360] sm:$0xff]  ;;  %v275_v52 = vld [vmem:[#allocation5 + $0x368] sm:$0xff]  ;;  %v7830_v55 = vcombine.low %v263_v42, %v267_v43 }
  0x9a   :  { %v7837_v56 = vcombine.high %v270_v49, %v274_v50  ;;  %v7839_v57 = vcombine.high %v271_v51, %v275_v52  ;;  %v278_v58 = vld [vmem:[#allocation5 + $0x380] sm:$0xff]  ;;  %v279_v61 = vld [vmem:[#allocation5 + $0x388] sm:$0xff]  ;;  %v7836_v0 = vcombine.low %v270_v49, %v274_v50  ;;  %v7838_v1 = vcombine.low %v271_v51, %v275_v52 }
  0x9b   :  { %2577 = vmatpush1.bf16.msra.mxu0 %v7780_v2  ;;  %2741 = vmatpush1.bf16.msra.mxu1 %v7782_v4  ;;  %v282_v60 = vld [vmem:[#allocation5 + $0x3a0] sm:$0xff]  ;;  %v283_v62 = vld [vmem:[#allocation5 + $0x3a8] sm:$0xff] }
  0x9c   :  { %2578 = vmatprep.subr.bf16.mxu0 %v7789_v5  ;;  %2742 = vmatprep.subr.bf16.mxu1 %v7791_v6  ;;  %v7845_v2 = vcombine.high %v278_v58, %v282_v60  ;;  %v7847_v3 = vcombine.high %v279_v61, %v283_v62  ;;  %v286_v4 = vld [vmem:[#allocation5 + $0x3c0] sm:$0xff]  ;;  %v119_v6 = vcombine.high %v9319_v59, %v9319_v59  ;;  %v287_v7 = vld [vmem:[#allocation5 + $0x3c8] sm:$0xff] }
  0x9d   :  { %v290_v5 = vld [vmem:[#allocation5 + $0x3e0] sm:$0xff]  ;;  %v291_v8 = vld [vmem:[#allocation5 + $0x3e8] sm:$0xff]  ;;  %v7844_v10 = vcombine.low %v278_v58, %v282_v60  ;;  %v7846_v11 = vcombine.low %v279_v61, %v283_v62 }
  0x9e   :  { %v9334_v16 = vrot.slane %v119_v6, %v9317_v53  ;;  %v295_v17 = vld [vmem:[#allocation5 + $0x408] sm:$0xff]  ;;  %v7852_v19 = vcombine.low %v286_v4, %v290_v5  ;;  %v7854_v59 = vcombine.low %v287_v7, %v291_v8  ;;  %v318_v42 = vld [vmem:[#allocation5 + $0x4c0] sm:$0xff] }
  0x9f   :  { %2579 = vmatpush1.bf16.msra.mxu0 %v7788_v12  ;;  %2743 = vmatpush1.bf16.msra.mxu1 %v7790_v13  ;;  %v7853_v12 = vcombine.high %v286_v4, %v290_v5  ;;  %v7855_v13 = vcombine.high %v287_v7, %v291_v8  ;;  %v299_v18 = vld [vmem:[#allocation5 + $0x428] sm:$0xff]  ;;  %v322_v43 = vld [vmem:[#allocation5 + $0x4e0] sm:$0xff] }
  0xa0   :  { %2580 = vmatprep.subr.bf16.mxu0 %v7797_v14  ;;  %2744 = vmatprep.subr.bf16.mxu1 %v7799_v15  ;;  %v294_v14 = vld [vmem:[#allocation5 + $0x400] sm:$0xff]  ;;  %v135_v24 = vcombine.high %v9334_v16, %v9334_v16  ;;  %v303_v26 = vld [vmem:[#allocation5 + $0x448] sm:$0xff]  ;;  %v7862_v32 = vcombine.low %v295_v17, %v299_v18  ;;  %v7885_v52 = vcombine.high %v318_v42, %v322_v43 }
  0xa1   :  { %v298_v15 = vld [vmem:[#allocation5 + $0x420] sm:$0xff]  ;;  %v307_v27 = vld [vmem:[#allocation5 + $0x468] sm:$0xff] }
  0xa2   :  { %v7871_v34 = vcombine.high %v303_v26, %v307_v27  ;;  %v9344_v35 = vpack.c.bf16 %v135_v24, %v135_v24  ;;  %v311_v63 = vld [vmem:[#allocation5 + $0x488] sm:$0xff]  ;;  %v326_v49 = vld [vmem:[#allocation5 + $0x500] sm:$0xff] }
  0xa3   :  { %2581 = vmatpush1.bf16.msra.mxu0 %v7796_v20  ;;  %2745 = vmatpush1.bf16.msra.mxu1 %v7798_v21  ;;  %v7861_v20 = vcombine.high %v294_v14, %v298_v15  ;;  %v7863_v21 = vcombine.high %v295_v17, %v299_v18  ;;  %v330_v50 = vld [vmem:[#allocation5 + $0x520] sm:$0xff]  ;;  %v343_v8 = vld [vmem:[#allocation5 + $0x588] sm:$0xff] }
  0xa4   :  { %2582 = vmatprep.subr.bf16.mxu0 %v7805_v22  ;;  %2746 = vmatprep.subr.bf16.mxu1 %v7807_v23  ;;  %v302_v22 = vld [vmem:[#allocation5 + $0x440] sm:$0xff]  ;;  %v7893_v62 = vcombine.high %v326_v49, %v330_v50  ;;  %v351_v18 = vld [vmem:[#allocation5 + $0x5c8] sm:$0xff] }
  0xa5   :  { %v306_v23 = vld [vmem:[#allocation5 + $0x460] sm:$0xff] }
  0xa6   :  { %v7869_v33 = vcombine.high %v302_v22, %v306_v23  ;;  %v334_v58 = vld [vmem:[#allocation5 + $0x540] sm:$0xff] }
  0xa7   :  { %2583 = vmatpush1.bf16.msra.mxu0 %v7804_v28  ;;  %2747 = vmatpush1.bf16.msra.mxu1 %v7806_v29  ;;  %v7860_v28 = vcombine.low %v294_v14, %v298_v15  ;;  %v310_v29 = vld [vmem:[#allocation5 + $0x480] sm:$0xff] }
  0xa8   :  { %2584 = vmatprep.subr.bf16.mxu0 %v7813_v30  ;;  %2748 = vmatprep.subr.bf16.mxu1 %v7815_v31  ;;  %v314_v30 = vld [vmem:[#allocation5 + $0x4a0] sm:$0xff]  ;;  %v9342_v31 = vld [vmem:[#allocation2 + $0x8] sm:$0x3f] }
  0xa9   :  { %v7877_v40 = vcombine.high %v310_v29, %v314_v30  ;;  %v338_v60 = vld [vmem:[#allocation5 + $0x560] sm:$0xff] }
  0xaa   :  { %v7901_v5 = vcombine.high %v334_v58, %v338_v60  ;;  %v342_v6 = vld [vmem:[#allocation5 + $0x580] sm:$0xff] }
  0xab   :  { %2585 = vmatpush1.bf16.msra.mxu0 %v7812_v36  ;;  %2749 = vmatpush1.bf16.msra.mxu1 %v7814_v37  ;;  %v315_v36 = vld [vmem:[#allocation5 + $0x4a8] sm:$0xff]  ;;  %v136_v37 = vcombine.high %v9342_v31, %v9342_v31  ;;  %v346_v7 = vld [vmem:[#allocation5 + $0x5a0] sm:$0xff] }
  0xac   :  { %2586 = vmatprep.subr.bf16.mxu0 %v7821_v38  ;;  %2750 = vmatprep.subr.bf16.mxu1 %v7823_v39  ;;  %v7868_v38 = vcombine.low %v302_v22, %v306_v23  ;;  %v7870_v39 = vcombine.low %v303_v26, %v307_v27  ;;  %v7879_v41 = vcombine.high %v311_v63, %v315_v36  ;;  %v350_v15 = vld [vmem:[#allocation5 + $0x5c0] sm:$0xff]  ;;  %v359_v26 = vld [vmem:[#allocation5 + $0x608] sm:$0xff] }
  0xad   :  { %v7878_v51 = vcombine.low %v311_v63, %v315_v36  ;;  %v7909_v14 = vcombine.high %v342_v6, %v346_v7  ;;  %v354_v17 = vld [vmem:[#allocation5 + $0x5e0] sm:$0xff]  ;;  %v367_v63 = vld [vmem:[#allocation5 + $0x648] sm:$0xff] }
  0xae   :  { %v7917_v22 = vcombine.high %v350_v15, %v354_v17  ;;  %v358_v23 = vld [vmem:[#allocation5 + $0x600] sm:$0xff] }
  0xaf   :  { %2587 = vmatpush1.bf16.msra.mxu0 %v7820_v45  ;;  %2751 = vmatpush1.bf16.msra.mxu1 %v7822_v46  ;;  %v319_v45 = vld [vmem:[#allocation5 + $0x4c8] sm:$0xff]  ;;  %v362_v24 = vld [vmem:[#allocation5 + $0x620] sm:$0xff] }
  0xb0   :  { %2588 = vmatprep.subr.bf16.mxu0 %v7829_v47  ;;  %2752 = vmatprep.subr.bf16.mxu1 %v7831_v48  ;;  %v323_v46 = vld [vmem:[#allocation5 + $0x4e8] sm:$0xff]  ;;  %v9353_v47 = vrot.slane %v136_v37, %v9317_v53  ;;  %v7876_v48 = vcombine.low %v310_v29, %v314_v30  ;;  %v7916_v29 = vcombine.low %v350_v15, %v354_v17  ;;  %v406_v15 = vld [vmem:[#allocation5 + $0x780] sm:$0xff] }
  0xb1   :  { %v7886_v61 = vcombine.low %v319_v45, %v323_v46  ;;  %v371_v37 = vld [vmem:[#allocation5 + $0x668] sm:$0xff]  ;;  %v410_v17 = vld [vmem:[#allocation5 + $0x7a0] sm:$0xff] }
  0xb3   :  { %2589 = vmatpush1.bf16.msra.mxu0 %v7828_v54  ;;  %2753 = vmatpush1.bf16.msra.mxu1 %v7830_v55  ;;  %v327_v54 = vld [vmem:[#allocation5 + $0x508] sm:$0xff] }
  0xb4   :  { %2590 = vmatprep.subr.bf16.mxu0 %v7837_v56  ;;  %2754 = vmatprep.subr.bf16.mxu1 %v7839_v57  ;;  %v331_v55 = vld [vmem:[#allocation5 + $0x528] sm:$0xff]  ;;  %v7887_v56 = vcombine.high %v319_v45, %v323_v46  ;;  %v7884_v57 = vcombine.low %v318_v42, %v322_v43  ;;  %v378_v42 = vld [vmem:[#allocation5 + $0x6a0] sm:$0xff]  ;;  %v7935_v45 = vcombine.high %v367_v63, %v371_v37 }
  0xb5   :  { %v7894_v4 = vcombine.low %v327_v54, %v331_v55  ;;  %v375_v43 = vld [vmem:[#allocation5 + $0x688] sm:$0xff] }
  0xb6   :  { %v379_v46 = vld [vmem:[#allocation5 + $0x6a8] sm:$0xff] }
  0xb7   :  { %2591 = vmatpush1.bf16.msra.mxu0 %v7836_v0  ;;  %2755 = vmatpush1.bf16.msra.mxu1 %v7838_v1  ;;  %v335_v0 = vld [vmem:[#allocation5 + $0x548] sm:$0xff] }
  0xb8   :  { %2592 = vmatprep.subr.bf16.mxu0 %v7845_v2  ;;  %2756 = vmatprep.subr.bf16.mxu1 %v7847_v3  ;;  %v339_v1 = vld [vmem:[#allocation5 + $0x568] sm:$0xff]  ;;  %v7895_v2 = vcombine.high %v327_v54, %v331_v55  ;;  %v7892_v3 = vcombine.low %v326_v49, %v330_v50  ;;  %v7934_v49 = vcombine.low %v367_v63, %v371_v37 }
  0xb9   :  { %v383_v54 = vld [vmem:[#allocation5 + $0x6c8] sm:$0xff]  ;;  %v7943_v55 = vcombine.high %v375_v43, %v379_v46 }
  0xba   :  { %v423_v63 = vld [vmem:[#allocation5 + $0x808] sm:$0xff] }
  0xbb   :  { %2593 = vmatpush1.bf16.msra.mxu0 %v7844_v10  ;;  %2757 = vmatpush1.bf16.msra.mxu1 %v7846_v11  ;;  %v7903_v10 = vcombine.high %v335_v0, %v339_v1  ;;  %v347_v11 = vld [vmem:[#allocation5 + $0x5a8] sm:$0xff] }
  0xbc   :  { %2594 = vmatprep.subr.bf16.mxu0 %v7853_v12  ;;  %2758 = vmatprep.subr.bf16.mxu1 %v7855_v13  ;;  %v7900_v12 = vcombine.low %v334_v58, %v338_v60  ;;  %v7902_v13 = vcombine.low %v335_v0, %v339_v1  ;;  %v7942_v58 = vcombine.low %v375_v43, %v379_v46  ;;  %v391_v0 = vld [vmem:[#allocation5 + $0x708] sm:$0xff]  ;;  %v430_v43 = vld [vmem:[#allocation5 + $0x840] sm:$0xff] }
  0xbd   :  { %v427_v37 = vld [vmem:[#allocation5 + $0x828] sm:$0xff] }
  0xbf   :  { %2595 = vmatpush1.bf16.msra.mxu0 %v7852_v19  ;;  %2759 = vmatpush1.bf16.msra.mxu1 %v7854_v59  ;;  %v7911_v19 = vcombine.high %v343_v8, %v347_v11  ;;  %v355_v59 = vld [vmem:[#allocation5 + $0x5e8] sm:$0xff] }
  0xc0   :  { %2605 = vmatprep.subr.bf16.mxu0 %v7861_v20  ;;  %2769 = vmatprep.subr.bf16.mxu1 %v7863_v21  ;;  %v7908_v20 = vcombine.low %v342_v6, %v346_v7  ;;  %v7910_v21 = vcombine.low %v343_v8, %v347_v11  ;;  %v7919_v27 = vcombine.high %v351_v18, %v355_v59  ;;  %v398_v6 = vld [vmem:[#allocation5 + $0x740] sm:$0xff]  ;;  %v399_v8 = vld [vmem:[#allocation5 + $0x748] sm:$0xff] }
  0xc1   :  { %v7918_v30 = vcombine.low %v351_v18, %v355_v59  ;;  %v402_v7 = vld [vmem:[#allocation5 + $0x760] sm:$0xff]  ;;  %v403_v11 = vld [vmem:[#allocation5 + $0x768] sm:$0xff] }
  0xc2   :  { %2597 = vmatmul.mubr.bf16.vlgmr.msra.gmra.mrb[0].mxu0 %v9340_v25  ;;  %2761 = vmatmul.mubr.bf16.vlgmr.msra.gmra.mrb[0].mxu1 %v9340_v25  ;;  %v407_v18 = vld [vmem:[#allocation5 + $0x788] sm:$0xff] }
  0xc3   :  { %2606 = vmatpush1.bf16.msra.mxu0 %v7860_v28  ;;  %2770 = vmatpush1.bf16.msra.mxu1 %v7862_v32  ;;  %v363_v28 = vld [vmem:[#allocation5 + $0x628] sm:$0xff]  ;;  %v7925_v32 = vcombine.high %v358_v23, %v362_v24 }
  0xc4   :  { %2607 = vmatprep.subr.bf16.mxu0 %v7869_v33  ;;  %2771 = vmatprep.subr.bf16.mxu1 %v7871_v34  ;;  %v366_v33 = vld [vmem:[#allocation5 + $0x640] sm:$0xff]  ;;  %v7927_v36 = vcombine.high %v359_v26, %v363_v28  ;;  %v411_v59 = vld [vmem:[#allocation5 + $0x7a8] sm:$0xff] }
  0xc5   :  { %2637 = vmatprep.mubr.bf16.mxu0 %v9344_v35  ;;  %2801 = vmatprep.mubr.bf16.mxu1 %v9344_v35  ;;  %v370_v34 = vld [vmem:[#allocation5 + $0x660] sm:$0xff] }
  0xc7   :  { %2608 = vmatpush1.bf16.msra.mxu0 %v7868_v38  ;;  %2772 = vmatpush1.bf16.msra.mxu1 %v7870_v39  ;;  %v7924_v38 = vcombine.low %v358_v23, %v362_v24  ;;  %v7926_v39 = vcombine.low %v359_v26, %v363_v28  ;;  %v414_v23 = vld [vmem:[#allocation5 + $0x7c0] sm:$0xff]  ;;  %v415_v26 = vld [vmem:[#allocation5 + $0x7c8] sm:$0xff] }
  0xc8   :  { %2609 = vmatprep.subr.bf16.mxu0 %v7877_v40  ;;  %2773 = vmatprep.subr.bf16.mxu1 %v7879_v41  ;;  %v7933_v40 = vcombine.high %v366_v33, %v370_v34  ;;  %v374_v41 = vld [vmem:[#allocation5 + $0x680] sm:$0xff]  ;;  %v419_v28 = vld [vmem:[#allocation5 + $0x7e8] sm:$0xff] }
  0xc9   :  { %v7941_v50 = vcombine.high %v374_v41, %v378_v42  ;;  %v418_v24 = vld [vmem:[#allocation5 + $0x7e0] sm:$0xff] }
  0xcb   :  { %2610 = vmatpush1.bf16.msra.mxu0 %v7876_v48  ;;  %2774 = vmatpush1.bf16.msra.mxu1 %v7878_v51  ;;  %v7932_v48 = vcombine.low %v366_v33, %v370_v34  ;;  %v382_v51 = vld [vmem:[#allocation5 + $0x6c0] sm:$0xff] }
  0xcc   :  { %2611 = vmatprep.subr.bf16.mxu0 %v7885_v52  ;;  %2775 = vmatprep.subr.bf16.mxu1 %v7887_v56  ;;  %v386_v52 = vld [vmem:[#allocation5 + $0x6e0] sm:$0xff]  ;;  %v387_v56 = vld [vmem:[#allocation5 + $0x6e8] sm:$0xff] }
  0xcd   :  { %v7949_v60 = vcombine.high %v382_v51, %v386_v52  ;;  %v7951_v1 = vcombine.high %v383_v54, %v387_v56  ;;  %v422_v33 = vld [vmem:[#allocation5 + $0x800] sm:$0xff] }
  0xce   :  { %v426_v34 = vld [vmem:[#allocation5 + $0x820] sm:$0xff] }
  0xcf   :  { %2612 = vmatpush1.bf16.msra.mxu0 %v7884_v57  ;;  %2776 = vmatpush1.bf16.msra.mxu1 %v7886_v61  ;;  %v7940_v57 = vcombine.low %v374_v41, %v378_v42  ;;  %v390_v61 = vld [vmem:[#allocation5 + $0x700] sm:$0xff]  ;;  %v7989_v41 = vcombine.high %v422_v33, %v426_v34  ;;  %v7991_v42 = vcombine.high %v423_v63, %v427_v37 }
  0xd0   :  { %2613 = vmatprep.subr.bf16.mxu0 %v7893_v62  ;;  %2777 = vmatprep.subr.bf16.mxu1 %v7895_v2  ;;  %v394_v62 = vld [vmem:[#allocation5 + $0x720] sm:$0xff]  ;;  %v395_v2 = vld [vmem:[#allocation5 + $0x728] sm:$0xff] }
  0xd3   :  { %2614 = vmatpush1.bf16.msra.mxu0 %v7892_v3  ;;  %2778 = vmatpush1.bf16.msra.mxu1 %v7894_v4  ;;  %v7948_v3 = vcombine.low %v382_v51, %v386_v52  ;;  %v7950_v4 = vcombine.low %v383_v54, %v387_v56  ;;  %v438_v54 = vld [vmem:[#allocation5 + $0x880] sm:$0xff] }
  0xd4   :  { %2615 = vmatprep.subr.bf16.mxu0 %v7901_v5  ;;  %2779 = vmatprep.subr.bf16.mxu1 %v7903_v10  ;;  %v7957_v5 = vcombine.high %v390_v61, %v394_v62  ;;  %v7959_v10 = vcombine.high %v391_v0, %v395_v2 }
  0xd7   :  { %2616 = vmatpush1.bf16.msra.mxu0 %v7900_v12  ;;  %2780 = vmatpush1.bf16.msra.mxu1 %v7902_v13  ;;  %v7956_v12 = vcombine.low %v390_v61, %v394_v62  ;;  %v7958_v13 = vcombine.low %v391_v0, %v395_v2  ;;  %v446_v0 = vld [vmem:[#allocation5 + $0x8c0] sm:$0xff]  ;;  %v447_v2 = vld [vmem:[#allocation5 + $0x8c8] sm:$0xff] }
  0xd8   :  { %2617 = vmatprep.subr.bf16.mxu0 %v7909_v14  ;;  %2781 = vmatprep.subr.bf16.mxu1 %v7911_v19  ;;  %v7965_v14 = vcombine.high %v398_v6, %v402_v7  ;;  %v7967_v19 = vcombine.high %v399_v8, %v403_v11 }
  0xdb   :  { %2618 = vmatpush1.bf16.msra.mxu0 %v7908_v20  ;;  %2782 = vmatpush1.bf16.msra.mxu1 %v7910_v21  ;;  %v7964_v20 = vcombine.low %v398_v6, %v402_v7  ;;  %v7966_v21 = vcombine.low %v399_v8, %v403_v11  ;;  %v454_v8 = vld [vmem:[#allocation5 + $0x900] sm:$0xff]  ;;  %v455_v11 = vld [vmem:[#allocation5 + $0x908] sm:$0xff] }
  0xdc   :  { %2619 = vmatprep.subr.bf16.mxu0 %v7917_v22  ;;  %2783 = vmatprep.subr.bf16.mxu1 %v7919_v27  ;;  %v7973_v22 = vcombine.high %v406_v15, %v410_v17  ;;  %v7975_v27 = vcombine.high %v407_v18, %v411_v59 }
  0xdf   :  { %2620 = vmatpush1.bf16.msra.mxu0 %v7916_v29  ;;  %2784 = vmatpush1.bf16.msra.mxu1 %v7918_v30  ;;  %v7972_v29 = vcombine.low %v406_v15, %v410_v17  ;;  %v7974_v30 = vcombine.low %v407_v18, %v411_v59  ;;  %v462_v18 = vld [vmem:[#allocation5 + $0x940] sm:$0xff]  ;;  %v463_v59 = vld [vmem:[#allocation5 + $0x948] sm:$0xff] }
  0xe0   :  { %2621 = vmatprep.subr.bf16.mxu0 %v7925_v32  ;;  %2785 = vmatprep.subr.bf16.mxu1 %v7927_v36  ;;  %v7981_v32 = vcombine.high %v414_v23, %v418_v24  ;;  %v7983_v36 = vcombine.high %v415_v26, %v419_v28 }
  0xe3   :  { %2622 = vmatpush1.bf16.msra.mxu0 %v7924_v38  ;;  %2786 = vmatpush1.bf16.msra.mxu1 %v7926_v39  ;;  %v9357_v38 = vrot.slane %v9342_v31, %v9317_v53  ;;  %v7980_v39 = vcombine.low %v414_v23, %v418_v24  ;;  %v435_v53 = vld [vmem:[#allocation5 + $0x868] sm:$0xff]  ;;  %v7988_v31 = vcombine.low %v422_v33, %v426_v34 }
  0xe4   :  { %2623 = vmatprep.subr.bf16.mxu0 %v7933_v40  ;;  %2787 = vmatprep.subr.bf16.mxu1 %v7935_v45  ;;  %v7982_v40 = vcombine.low %v415_v26, %v419_v28  ;;  %v434_v45 = vld [vmem:[#allocation5 + $0x860] sm:$0xff]  ;;  %v471_v28 = vld [vmem:[#allocation5 + $0x988] sm:$0xff] }
  0xe5   :  { %v151_v46 = vcombine.high %v9357_v38, %v9357_v38  ;;  %v7997_v51 = vcombine.high %v430_v43, %v434_v45  ;;  %v470_v26 = vld [vmem:[#allocation5 + $0x980] sm:$0xff] }
  0xe7   :  { %2624 = vmatpush1.bf16.msra.mxu0 %v7932_v48  ;;  %2788 = vmatpush1.bf16.msra.mxu1 %v7934_v49  ;;  %v9363_v48 = vpack.c.bf16 %v9334_v16, %v9334_v16  ;;  %v431_v49 = vld [vmem:[#allocation5 + $0x848] sm:$0xff]  ;;  %v9365_v56 = vpack.c.bf16 %v151_v46, %v151_v46  ;;  %v7996_v16 = vcombine.low %v430_v43, %v434_v45  ;;  %v486_v45 = vld [vmem:[#allocation5 + $0xa00] sm:$0xff] }
  0xe8   :  { %2625 = vmatprep.subr.bf16.mxu0 %v7941_v50  ;;  %2789 = vmatprep.subr.bf16.mxu1 %v7943_v55  ;;  %v7990_v50 = vcombine.low %v423_v63, %v427_v37  ;;  %v7999_v52 = vcombine.high %v431_v49, %v435_v53  ;;  %v442_v55 = vld [vmem:[#allocation5 + $0x8a0] sm:$0xff]  ;;  %v479_v37 = vld [vmem:[#allocation5 + $0x9c8] sm:$0xff] }
  0xe9   :  { %v8005_v61 = vcombine.high %v438_v54, %v442_v55  ;;  %v478_v63 = vld [vmem:[#allocation5 + $0x9c0] sm:$0xff] }
  0xea   :  { %v490_v46 = vld [vmem:[#allocation5 + $0xa20] sm:$0xff] }
  0xeb   :  { %2626 = vmatpush1.bf16.msra.mxu0 %v7940_v57  ;;  %2790 = vmatpush1.bf16.msra.mxu1 %v7942_v58  ;;  %v439_v57 = vld [vmem:[#allocation5 + $0x888] sm:$0xff] }
  0xec   :  { %2627 = vmatprep.subr.bf16.mxu0 %v7949_v60  ;;  %2791 = vmatprep.subr.bf16.mxu1 %v7951_v1  ;;  %v443_v58 = vld [vmem:[#allocation5 + $0x8a8] sm:$0xff]  ;;  %v7998_v60 = vcombine.low %v431_v49, %v435_v53  ;;  %v450_v1 = vld [vmem:[#allocation5 + $0x8e0] sm:$0xff] }
  0xed   :  { %v8007_v62 = vcombine.high %v439_v57, %v443_v58  ;;  %v8013_v6 = vcombine.high %v446_v0, %v450_v1  ;;  %v487_v49 = vld [vmem:[#allocation5 + $0xa08] sm:$0xff] }
  0xee   :  { %v491_v53 = vld [vmem:[#allocation5 + $0xa28] sm:$0xff] }
  0xef   :  { %2628 = vmatpush1.bf16.msra.mxu0 %v7948_v3  ;;  %2792 = vmatpush1.bf16.msra.mxu1 %v7950_v4  ;;  %v451_v3 = vld [vmem:[#allocation5 + $0x8e8] sm:$0xff]  ;;  %v8004_v4 = vcombine.low %v438_v54, %v442_v55  ;;  %v494_v54 = vld [vmem:[#allocation5 + $0xa40] sm:$0xff] }
  0xf0   :  { %2629 = vmatprep.subr.bf16.mxu0 %v7957_v5  ;;  %2793 = vmatprep.subr.bf16.mxu1 %v7959_v10  ;;  %v8006_v5 = vcombine.low %v439_v57, %v443_v58  ;;  %v8015_v7 = vcombine.high %v447_v2, %v451_v3  ;;  %v458_v10 = vld [vmem:[#allocation5 + $0x920] sm:$0xff]  ;;  %v495_v57 = vld [vmem:[#allocation5 + $0xa48] sm:$0xff] }
  0xf1   :  { %v8021_v15 = vcombine.high %v454_v8, %v458_v10  ;;  %v498_v55 = vld [vmem:[#allocation5 + $0xa60] sm:$0xff]  ;;  %v499_v58 = vld [vmem:[#allocation5 + $0xa68] sm:$0xff] }
  0xf3   :  { %2630 = vmatpush1.bf16.msra.mxu0 %v7956_v12  ;;  %2794 = vmatpush1.bf16.msra.mxu1 %v7958_v13  ;;  %v459_v12 = vld [vmem:[#allocation5 + $0x928] sm:$0xff]  ;;  %v8012_v13 = vcombine.low %v446_v0, %v450_v1  ;;  %v502_v0 = vld [vmem:[#allocation5 + $0xa80] sm:$0xff] }
  0xf4   :  { %2631 = vmatprep.subr.bf16.mxu0 %v7965_v14  ;;  %2795 = vmatprep.subr.bf16.mxu1 %v7967_v19  ;;  %v8014_v14 = vcombine.low %v447_v2, %v451_v3  ;;  %v8023_v17 = vcombine.high %v455_v11, %v459_v12  ;;  %v466_v19 = vld [vmem:[#allocation5 + $0x960] sm:$0xff]  ;;  %v503_v2 = vld [vmem:[#allocation5 + $0xa88] sm:$0xff] }
  0xf5   :  { %v8029_v23 = vcombine.high %v462_v18, %v466_v19  ;;  %v506_v1 = vld [vmem:[#allocation5 + $0xaa0] sm:$0xff]  ;;  %v507_v3 = vld [vmem:[#allocation5 + $0xaa8] sm:$0xff] }
  0xf7   :  { %2632 = vmatpush1.bf16.msra.mxu0 %v7964_v20  ;;  %2796 = vmatpush1.bf16.msra.mxu1 %v7966_v21  ;;  %v467_v20 = vld [vmem:[#allocation5 + $0x968] sm:$0xff]  ;;  %v8020_v21 = vcombine.low %v454_v8, %v458_v10  ;;  %v510_v8 = vld [vmem:[#allocation5 + $0xac0] sm:$0xff] }
  0xf8   :  { %2633 = vmatprep.subr.bf16.mxu0 %v7973_v22  ;;  %2797 = vmatprep.subr.bf16.mxu1 %v7975_v27  ;;  %v8022_v22 = vcombine.low %v455_v11, %v459_v12  ;;  %v8031_v24 = vcombine.high %v463_v59, %v467_v20  ;;  %v474_v27 = vld [vmem:[#allocation5 + $0x9a0] sm:$0xff]  ;;  %v511_v11 = vld [vmem:[#allocation5 + $0xac8] sm:$0xff] }
  0xf9   :  { %v8037_v33 = vcombine.high %v470_v26, %v474_v27  ;;  %v514_v10 = vld [vmem:[#allocation5 + $0xae0] sm:$0xff]  ;;  %v515_v12 = vld [vmem:[#allocation5 + $0xae8] sm:$0xff] }
  0xfb   :  { %2634 = vmatpush1.bf16.msra.mxu0 %v7972_v29  ;;  %2798 = vmatpush1.bf16.msra.mxu1 %v7974_v30  ;;  %v475_v29 = vld [vmem:[#allocation5 + $0x9a8] sm:$0xff]  ;;  %v8028_v30 = vcombine.low %v462_v18, %v466_v19  ;;  %v518_v18 = vld [vmem:[#allocation5 + $0xb00] sm:$0xff] }
  0xfc   :  { %2635 = vmatprep.subr.bf16.mxu0 %v7981_v32  ;;  %2799 = vmatprep.subr.bf16.mxu1 %v7983_v36  ;;  %v8030_v32 = vcombine.low %v463_v59, %v467_v20  ;;  %v8039_v34 = vcombine.high %v471_v28, %v475_v29  ;;  %v482_v36 = vld [vmem:[#allocation5 + $0x9e0] sm:$0xff]  ;;  %v519_v59 = vld [vmem:[#allocation5 + $0xb08] sm:$0xff] }
  0xfd   :  { %v522_v19 = vld [vmem:[#allocation5 + $0xb20] sm:$0xff]  ;;  %v523_v20 = vld [vmem:[#allocation5 + $0xb28] sm:$0xff] }
  0xff   :  { %2636 = vmatpush1.bf16.msra.mxu0 %v7980_v39  ;;  %2800 = vmatpush1.bf16.msra.mxu1 %v7982_v40  ;;  %v483_v39 = vld [vmem:[#allocation5 + $0x9e8] sm:$0xff]  ;;  %v8036_v40 = vcombine.low %v470_v26, %v474_v27  ;;  %v526_v26 = vld [vmem:[#allocation5 + $0xb40] sm:$0xff] }
 0x100   :  { %2646 = vmatprep.subr.bf16.mxu0 %v7989_v41  ;;  %2810 = vmatprep.subr.bf16.mxu1 %v7991_v42  ;;  %v8038_v41 = vcombine.low %v471_v28, %v475_v29  ;;  %v8045_v42 = vcombine.high %v478_v63, %v482_v36  ;;  %v8047_v43 = vcombine.high %v479_v37, %v483_v39  ;;  %v530_v27 = vld [vmem:[#allocation5 + $0xb60] sm:$0xff]  ;;  %v527_v28 = vld [vmem:[#allocation5 + $0xb48] sm:$0xff] }
 0x101   :  { %v531_v29 = vld [vmem:[#allocation5 + $0xb68] sm:$0xff] }
 0x102   :  { %2638 = vmatmul.mubr.bf16.vlgmr.msra.gmra.mrb[0].mxu0 %v9363_v48  ;;  %2802 = vmatmul.mubr.bf16.vlgmr.msra.gmra.mrb[0].mxu1 %v9363_v48 }
 0x103   :  { %2647 = vmatpush1.bf16.msra.mxu0 %v7988_v31  ;;  %2811 = vmatpush1.bf16.msra.mxu1 %v7990_v50  ;;  %v8044_v31 = vcombine.low %v478_v63, %v482_v36  ;;  %v8046_v50 = vcombine.low %v479_v37, %v483_v39  ;;  %v534_v63 = vld [vmem:[#allocation5 + $0xb80] sm:$0xff]  ;;  %v535_v37 = vld [vmem:[#allocation5 + $0xb88] sm:$0xff] }
 0x104   :  { %2648 = vmatprep.subr.bf16.mxu0 %v7997_v51  ;;  %2812 = vmatprep.subr.bf16.mxu1 %v7999_v52  ;;  %v8053_v51 = vcombine.high %v486_v45, %v490_v46  ;;  %v8055_v52 = vcombine.high %v487_v49, %v491_v53  ;;  %v538_v36 = vld [vmem:[#allocation5 + $0xba0] sm:$0xff]  ;;  %v539_v39 = vld [vmem:[#allocation5 + $0xba8] sm:$0xff] }
 0x105   :  { %2678 = vmatprep.mubr.bf16.mxu0 %v9365_v56  ;;  %2842 = vmatprep.mubr.bf16.mxu1 %v9365_v56 }
 0x107   :  { %2649 = vmatpush1.bf16.msra.mxu0 %v7996_v16  ;;  %2813 = vmatpush1.bf16.msra.mxu1 %v7998_v60  ;;  %v8052_v16 = vcombine.low %v486_v45, %v490_v46  ;;  %v8054_v60 = vcombine.low %v487_v49, %v491_v53  ;;  %v542_v45 = vld [vmem:[#allocation5 + $0xbc0] sm:$0xff]  ;;  %v543_v49 = vld [vmem:[#allocation5 + $0xbc8] sm:$0xff] }
 0x108   :  { %2650 = vmatprep.subr.bf16.mxu0 %v8005_v61  ;;  %2814 = vmatprep.subr.bf16.mxu1 %v8007_v62  ;;  %v8061_v61 = vcombine.high %v494_v54, %v498_v55  ;;  %v8063_v62 = vcombine.high %v495_v57, %v499_v58  ;;  %v546_v46 = vld [vmem:[#allocation5 + $0xbe0] sm:$0xff]  ;;  %v547_v53 = vld [vmem:[#allocation5 + $0xbe8] sm:$0xff] }
 0x10b   :  { %2651 = vmatpush1.bf16.msra.mxu0 %v8004_v4  ;;  %2815 = vmatpush1.bf16.msra.mxu1 %v8006_v5  ;;  %v8060_v4 = vcombine.low %v494_v54, %v498_v55  ;;  %v8062_v5 = vcombine.low %v495_v57, %v499_v58  ;;  %v550_v54 = vld [vmem:[#allocation5 + $0xc00] sm:$0xff]  ;;  %v551_v57 = vld [vmem:[#allocation5 + $0xc08] sm:$0xff] }
 0x10c   :  { %2652 = vmatprep.subr.bf16.mxu0 %v8013_v6  ;;  %2816 = vmatprep.subr.bf16.mxu1 %v8015_v7  ;;  %v8069_v6 = vcombine.high %v502_v0, %v506_v1  ;;  %v8071_v7 = vcombine.high %v503_v2, %v507_v3  ;;  %v554_v55 = vld [vmem:[#allocation5 + $0xc20] sm:$0xff]  ;;  %v555_v58 = vld [vmem:[#allocation5 + $0xc28] sm:$0xff] }
 0x10f   :  { %2653 = vmatpush1.bf16.msra.mxu0 %v8012_v13  ;;  %2817 = vmatpush1.bf16.msra.mxu1 %v8014_v14  ;;  %v8068_v13 = vcombine.low %v502_v0, %v506_v1  ;;  %v8070_v14 = vcombine.low %v503_v2, %v507_v3  ;;  %v9373_v0 = vpack.c.bf16 %v9357_v38, %v9357_v38  ;;  %v168_v1 = vld [vmem:[#allocation5 + $0x10] sm:$0xff]  ;;  %v9188_v38 = vmov 0  }
 0x110   :  { %2654 = vmatprep.subr.bf16.mxu0 %v8021_v15  ;;  %2818 = vmatprep.subr.bf16.mxu1 %v8023_v17  ;;  %v8077_v15 = vcombine.high %v510_v8, %v514_v10  ;;  %v8079_v17 = vcombine.high %v511_v11, %v515_v12  ;;  %v172_v2 = vld [vmem:[#allocation5 + $0x30] sm:$0xff]  ;;  %v8116_v3 = vcombine.low %v550_v54, %v554_v55 }
 0x113   :  { %2655 = vmatpush1.bf16.msra.mxu0 %v8020_v21  ;;  %2819 = vmatpush1.bf16.msra.mxu1 %v8022_v22  ;;  %v8076_v21 = vcombine.low %v510_v8, %v514_v10  ;;  %v8078_v22 = vcombine.low %v511_v11, %v515_v12  ;;  %v176_v10 = vld [vmem:[#allocation5 + $0x50] sm:$0xff]  ;;  %v9381_v12 = vpack.c.bf16 %v9353_v47, %v9353_v47 }
 0x114   :  { %2656 = vmatprep.subr.bf16.mxu0 %v8029_v23  ;;  %2820 = vmatprep.subr.bf16.mxu1 %v8031_v24  ;;  %v8085_v23 = vcombine.high %v518_v18, %v522_v19  ;;  %v8087_v24 = vcombine.high %v519_v59, %v523_v20  ;;  %v180_v11 = vld [vmem:[#allocation5 + $0x70] sm:$0xff] }
 0x115   :  { %v7744_v47 = vcombine.low %v176_v10, %v180_v11 }
 0x117   :  { %2657 = vmatpush1.bf16.msra.mxu0 %v8028_v30  ;;  %2821 = vmatpush1.bf16.msra.mxu1 %v8030_v32  ;;  %v8084_v30 = vcombine.low %v518_v18, %v522_v19  ;;  %v8086_v32 = vcombine.low %v519_v59, %v523_v20  ;;  %v7745_v18 = vcombine.high %v176_v10, %v180_v11  ;;  %v184_v59 = vld [vmem:[#allocation5 + $0x90] sm:$0xff] }
 0x118   :  { %2658 = vmatprep.subr.bf16.mxu0 %v8037_v33  ;;  %2822 = vmatprep.subr.bf16.mxu1 %v8039_v34  ;;  %v8093_v33 = vcombine.high %v526_v26, %v530_v27  ;;  %v8095_v34 = vcombine.high %v527_v28, %v531_v29  ;;  %v188_v20 = vld [vmem:[#allocation5 + $0xb0] sm:$0xff] }
 0x119   :  { %v232_v10 = vld [vmem:[#allocation5 + $0x210] sm:$0xff] }
 0x11a   :  { %v236_v11 = vld [vmem:[#allocation5 + $0x230] sm:$0xff] }
 0x11b   :  { %2659 = vmatpush1.bf16.msra.mxu0 %v8036_v40  ;;  %2823 = vmatpush1.bf16.msra.mxu1 %v8038_v41  ;;  %v8092_v40 = vcombine.low %v526_v26, %v530_v27  ;;  %v8094_v41 = vcombine.low %v527_v28, %v531_v29  ;;  %v192_v27 = vld [vmem:[#allocation5 + $0xd0] sm:$0xff]  ;;  %v193_v29 = vld [vmem:[#allocation5 + $0xd8] sm:$0xff] }
 0x11c   :  { %2660 = vmatprep.subr.bf16.mxu0 %v8045_v42  ;;  %2824 = vmatprep.subr.bf16.mxu1 %v8047_v43  ;;  %v8101_v42 = vcombine.high %v534_v63, %v538_v36  ;;  %v8103_v43 = vcombine.high %v535_v37, %v539_v39  ;;  %v196_v28 = vld [vmem:[#allocation5 + $0xf0] sm:$0xff] }
 0x11f   :  { %2661 = vmatpush1.bf16.msra.mxu0 %v8044_v31  ;;  %2825 = vmatpush1.bf16.msra.mxu1 %v8046_v50  ;;  %v8100_v31 = vcombine.low %v534_v63, %v538_v36  ;;  %v8102_v50 = vcombine.low %v535_v37, %v539_v39  ;;  %v200_v36 = vld [vmem:[#allocation5 + $0x110] sm:$0xff]  ;;  %v201_v39 = vld [vmem:[#allocation5 + $0x118] sm:$0xff] }
 0x120   :  { %2662 = vmatprep.subr.bf16.mxu0 %v8053_v51  ;;  %2826 = vmatprep.subr.bf16.mxu1 %v8055_v52  ;;  %v8109_v51 = vcombine.high %v542_v45, %v546_v46  ;;  %v8111_v52 = vcombine.high %v543_v49, %v547_v53  ;;  %v204_v37 = vld [vmem:[#allocation5 + $0x130] sm:$0xff] }
 0x123   :  { %2663 = vmatpush1.bf16.msra.mxu0 %v8052_v16  ;;  %2827 = vmatpush1.bf16.msra.mxu1 %v8054_v60  ;;  %v8108_v16 = vcombine.low %v542_v45, %v546_v46  ;;  %v8110_v60 = vcombine.low %v543_v49, %v547_v53  ;;  %v208_v45 = vld [vmem:[#allocation5 + $0x150] sm:$0xff]  ;;  %v209_v49 = vld [vmem:[#allocation5 + $0x158] sm:$0xff] }
 0x124   :  { %2664 = vmatprep.subr.bf16.mxu0 %v8061_v61  ;;  %2828 = vmatprep.subr.bf16.mxu1 %v8063_v62  ;;  %v8117_v61 = vcombine.high %v550_v54, %v554_v55  ;;  %v8119_v62 = vcombine.high %v551_v57, %v555_v58  ;;  %v212_v46 = vld [vmem:[#allocation5 + $0x170] sm:$0xff]  ;;  %v213_v53 = vld [vmem:[#allocation5 + $0x178] sm:$0xff] }
 0x125   :  { %v216_v54 = vld [vmem:[#allocation5 + $0x190] sm:$0xff] }
 0x126   :  { %v220_v55 = vld [vmem:[#allocation5 + $0x1b0] sm:$0xff] }
 0x127   :  { %2665 = vmatpush1.bf16.msra.mxu0 %v8060_v4  ;;  %2829 = vmatpush1.bf16.msra.mxu1 %v8062_v5  ;;  %v169_v4 = vld [vmem:[#allocation5 + $0x18] sm:$0xff] }
 0x128   :  { %2666 = vmatprep.subr.bf16.mxu0 %v8069_v6  ;;  %2830 = vmatprep.subr.bf16.mxu1 %v8071_v7  ;;  %v173_v5 = vld [vmem:[#allocation5 + $0x38] sm:$0xff]  ;;  %v8118_v6 = vcombine.low %v551_v57, %v555_v58  ;;  %v7737_v7 = vcombine.high %v168_v1, %v172_v2 }
 0x129   :  { %v7739_v8 = vcombine.high %v169_v4, %v173_v5  ;;  %v217_v57 = vld [vmem:[#allocation5 + $0x198] sm:$0xff] }
 0x12a   :  { %v221_v58 = vld [vmem:[#allocation5 + $0x1b8] sm:$0xff] }
 0x12b   :  { %2667 = vmatpush1.bf16.msra.mxu0 %v8068_v13  ;;  %2831 = vmatpush1.bf16.msra.mxu1 %v8070_v14  ;;  %v177_v13 = vld [vmem:[#allocation5 + $0x58] sm:$0xff] }
 0x12c   :  { %2668 = vmatprep.subr.bf16.mxu0 %v8077_v15  ;;  %2832 = vmatprep.subr.bf16.mxu1 %v8079_v17  ;;  %v181_v14 = vld [vmem:[#allocation5 + $0x78] sm:$0xff]  ;;  %v7736_v15 = vcombine.low %v168_v1, %v172_v2  ;;  %v7738_v17 = vcombine.low %v169_v4, %v173_v5  ;;  %v224_v1 = vld [vmem:[#allocation5 + $0x1d0] sm:$0xff]  ;;  %v7784_v5 = vcombine.low %v216_v54, %v220_v55 }
 0x12d   :  { %v7747_v19 = vcombine.high %v177_v13, %v181_v14  ;;  %v228_v2 = vld [vmem:[#allocation5 + $0x1f0] sm:$0xff]  ;;  %v229_v4 = vld [vmem:[#allocation5 + $0x1f8] sm:$0xff] }
 0x12f   :  { %2669 = vmatpush1.bf16.msra.mxu0 %v8076_v21  ;;  %2833 = vmatpush1.bf16.msra.mxu1 %v8078_v22  ;;  %v185_v21 = vld [vmem:[#allocation5 + $0x98] sm:$0xff] }
 0x130   :  { %2670 = vmatprep.subr.bf16.mxu0 %v8085_v23  ;;  %2834 = vmatprep.subr.bf16.mxu1 %v8087_v24  ;;  %v189_v22 = vld [vmem:[#allocation5 + $0xb8] sm:$0xff]  ;;  %v7746_v23 = vcombine.low %v177_v13, %v181_v14  ;;  %v7753_v24 = vcombine.high %v184_v59, %v188_v20 }
 0x131   :  { %v7755_v26 = vcombine.high %v185_v21, %v189_v22  ;;  %v233_v13 = vld [vmem:[#allocation5 + $0x218] sm:$0xff] }
 0x132   :  { %v237_v14 = vld [vmem:[#allocation5 + $0x238] sm:$0xff] }
 0x133   :  { %2671 = vmatpush1.bf16.msra.mxu0 %v8084_v30  ;;  %2835 = vmatpush1.bf16.msra.mxu1 %v8086_v32  ;;  %v197_v30 = vld [vmem:[#allocation5 + $0xf8] sm:$0xff]  ;;  %v7752_v32 = vcombine.low %v184_v59, %v188_v20  ;;  %v240_v59 = vld [vmem:[#allocation5 + $0x250] sm:$0xff] }
 0x134   :  { %2672 = vmatprep.subr.bf16.mxu0 %v8093_v33  ;;  %2836 = vmatprep.subr.bf16.mxu1 %v8095_v34  ;;  %v7754_v33 = vcombine.low %v185_v21, %v189_v22  ;;  %v7761_v34 = vcombine.high %v192_v27, %v196_v28  ;;  %v7763_v63 = vcombine.high %v193_v29, %v197_v30  ;;  %v244_v20 = vld [vmem:[#allocation5 + $0x270] sm:$0xff]  ;;  %v241_v21 = vld [vmem:[#allocation5 + $0x258] sm:$0xff] }
 0x135   :  { %v245_v22 = vld [vmem:[#allocation5 + $0x278] sm:$0xff] }
 0x137   :  { %2673 = vmatpush1.bf16.msra.mxu0 %v8092_v40  ;;  %2837 = vmatpush1.bf16.msra.mxu1 %v8094_v41  ;;  %v205_v40 = vld [vmem:[#allocation5 + $0x138] sm:$0xff]  ;;  %v7760_v41 = vcombine.low %v192_v27, %v196_v28  ;;  %v248_v27 = vld [vmem:[#allocation5 + $0x290] sm:$0xff] }
 0x138   :  { %2674 = vmatprep.subr.bf16.mxu0 %v8101_v42  ;;  %2838 = vmatprep.subr.bf16.mxu1 %v8103_v43  ;;  %v7762_v42 = vcombine.low %v193_v29, %v197_v30  ;;  %v7769_v43 = vcombine.high %v200_v36, %v204_v37  ;;  %v252_v28 = vld [vmem:[#allocation5 + $0x2b0] sm:$0xff]  ;;  %v249_v29 = vld [vmem:[#allocation5 + $0x298] sm:$0xff] }
 0x139   :  { %v253_v30 = vld [vmem:[#allocation5 + $0x2b8] sm:$0xff] }
 0x13b   :  { %2675 = vmatpush1.bf16.msra.mxu0 %v8100_v31  ;;  %2839 = vmatpush1.bf16.msra.mxu1 %v8102_v50  ;;  %v7768_v31 = vcombine.low %v200_v36, %v204_v37  ;;  %v7770_v50 = vcombine.low %v201_v39, %v205_v40  ;;  %v256_v36 = vld [vmem:[#allocation5 + $0x2d0] sm:$0xff] }
 0x13c   :  { %2676 = vmatprep.subr.bf16.mxu0 %v8109_v51  ;;  %2840 = vmatprep.subr.bf16.mxu1 %v8111_v52  ;;  %v7777_v51 = vcombine.high %v208_v45, %v212_v46  ;;  %v7779_v52 = vcombine.high %v209_v49, %v213_v53  ;;  %v260_v37 = vld [vmem:[#allocation5 + $0x2f0] sm:$0xff] }
 0x13f   :  { %2677 = vmatpush1.bf16.msra.mxu0 %v8108_v16  ;;  %2841 = vmatpush1.bf16.msra.mxu1 %v8110_v60  ;;  %v7776_v16 = vcombine.low %v208_v45, %v212_v46  ;;  %v7778_v60 = vcombine.low %v209_v49, %v213_v53  ;;  %v264_v45 = vld [vmem:[#allocation5 + $0x310] sm:$0xff]  ;;  %v265_v49 = vld [vmem:[#allocation5 + $0x318] sm:$0xff] }
 0x140   :  { %2687 = vmatprep.subr.bf16.mxu0 %v8117_v61  ;;  %2851 = vmatprep.subr.bf16.mxu1 %v8119_v62  ;;  %v7785_v61 = vcombine.high %v216_v54, %v220_v55  ;;  %v7787_v62 = vcombine.high %v217_v57, %v221_v58  ;;  %v268_v46 = vld [vmem:[#allocation5 + $0x330] sm:$0xff]  ;;  %v269_v53 = vld [vmem:[#allocation5 + $0x338] sm:$0xff] }
 0x141   :  { %v272_v54 = vld [vmem:[#allocation5 + $0x350] sm:$0xff] }
 0x142   :  { %2679 = vmatmul.mubr.bf16.vlgmr.msra.gmra.mrb[0].mxu0 %v9373_v0  ;;  %2843 = vmatmul.mubr.bf16.vlgmr.msra.gmra.mrb[0].mxu1 %v9373_v0  ;;  %v276_v55 = vld [vmem:[#allocation5 + $0x370] sm:$0xff] }
 0x143   :  { %2688 = vmatpush1.bf16.msra.mxu0 %v8116_v3  ;;  %2852 = vmatpush1.bf16.msra.mxu1 %v8118_v6  ;;  %v225_v3 = vld [vmem:[#allocation5 + $0x1d8] sm:$0xff]  ;;  %v7786_v6 = vcombine.low %v217_v57, %v221_v58 }
 0x144   :  { %2719 = vmatprep.mubr.bf16.mxu0 %v9188_v38  ;;  %2883 = vmatprep.mubr.bf16.mxu1 %v9188_v38  ;;  %v273_v57 = vld [vmem:[#allocation5 + $0x358] sm:$0xff] }
 0x145   :  { %2892 = vmatprep.subr.bf16.mxu0 %v7737_v7  ;;  %3056 = vmatprep.subr.bf16.mxu1 %v7739_v8  ;;  %v7793_v7 = vcombine.high %v224_v1, %v228_v2  ;;  %v7795_v8 = vcombine.high %v225_v3, %v229_v4  ;;  %v277_v58 = vld [vmem:[#allocation5 + $0x378] sm:$0xff] }
 0x14e   :  { %8124 = vmatmul.mubr.msk.bf16.vlgmr.msra.gmra.mrb[0].mxu0 %vm2560_vm0, %v9381_v12  ;;  %8125 = vmatmul.mubr.msk.bf16.vlgmr.msra.gmra.mrb[0].mxu1 %vm2560_vm0, %v9381_v12 }
 0x14f   :  { %2893 = vmatpush1.bf16.msra.mxu0 %v7736_v15  ;;  %3057 = vmatpush1.bf16.msra.mxu1 %v7738_v17  ;;  %v7792_v15 = vcombine.low %v224_v1, %v228_v2  ;;  %v7794_v17 = vcombine.low %v225_v3, %v229_v4  ;;  %v280_v1 = vld [vmem:[#allocation5 + $0x390] sm:$0xff]  ;;  %v281_v3 = vld [vmem:[#allocation5 + $0x398] sm:$0xff] }
 0x150   :  { %2894 = vmatprep.subr.bf16.mxu0 %v7745_v18  ;;  %3058 = vmatprep.subr.bf16.mxu1 %v7747_v19  ;;  %v7801_v18 = vcombine.high %v232_v10, %v236_v11  ;;  %v7803_v19 = vcombine.high %v233_v13, %v237_v14  ;;  %v284_v2 = vld [vmem:[#allocation5 + $0x3b0] sm:$0xff]  ;;  %v285_v4 = vld [vmem:[#allocation5 + $0x3b8] sm:$0xff] }
 0x151   :  { %2924 = vmatprep.mubr.bf16.mxu0 %v9327_v9  ;;  %3088 = vmatprep.mubr.bf16.mxu1 %v9327_v9  ;;  %v7771_v9 = vcombine.high %v201_v39, %v205_v40  ;;  %v257_v39 = vld [vmem:[#allocation5 + $0x2d8] sm:$0xff] }
 0x152   :  { %v261_v40 = vld [vmem:[#allocation5 + $0x2f8] sm:$0xff] }
 0x153   :  { %2895 = vmatpush1.bf16.msra.mxu0 %v7744_v47  ;;  %3059 = vmatpush1.bf16.msra.mxu1 %v7746_v23  ;;  %v7800_v47 = vcombine.low %v232_v10, %v236_v11  ;;  %v7802_v23 = vcombine.low %v233_v13, %v237_v14  ;;  %v288_v10 = vld [vmem:[#allocation5 + $0x3d0] sm:$0xff]  ;;  %v289_v13 = vld [vmem:[#allocation5 + $0x3d8] sm:$0xff] }
 0x154   :  { %2896 = vmatprep.subr.bf16.mxu0 %v7753_v24  ;;  %3060 = vmatprep.subr.bf16.mxu1 %v7755_v26  ;;  %v7809_v24 = vcombine.high %v240_v59, %v244_v20  ;;  %v7811_v26 = vcombine.high %v241_v21, %v245_v22  ;;  %v292_v11 = vld [vmem:[#allocation5 + $0x3f0] sm:$0xff]  ;;  %v293_v14 = vld [vmem:[#allocation5 + $0x3f8] sm:$0xff] }
 0x157   :  { %2897 = vmatpush1.bf16.msra.mxu0 %v7752_v32  ;;  %3061 = vmatpush1.bf16.msra.mxu1 %v7754_v33  ;;  %v7808_v32 = vcombine.low %v240_v59, %v244_v20  ;;  %v7810_v33 = vcombine.low %v241_v21, %v245_v22  ;;  %v296_v59 = vld [vmem:[#allocation5 + $0x410] sm:$0xff]  ;;  %v297_v21 = vld [vmem:[#allocation5 + $0x418] sm:$0xff] }
 0x158   :  { %2898 = vmatprep.subr.bf16.mxu0 %v7761_v34  ;;  %3062 = vmatprep.subr.bf16.mxu1 %v7763_v63  ;;  %v7817_v34 = vcombine.high %v248_v27, %v252_v28  ;;  %v7819_v63 = vcombine.high %v249_v29, %v253_v30  ;;  %v300_v20 = vld [vmem:[#allocation5 + $0x430] sm:$0xff]  ;;  %v301_v22 = vld [vmem:[#allocation5 + $0x438] sm:$0xff] }
 0x15b   :  { %2899 = vmatpush1.bf16.msra.mxu0 %v7760_v41  ;;  %3063 = vmatpush1.bf16.msra.mxu1 %v7762_v42  ;;  %v7816_v41 = vcombine.low %v248_v27, %v252_v28  ;;  %v7818_v42 = vcombine.low %v249_v29, %v253_v30  ;;  %v304_v27 = vld [vmem:[#allocation5 + $0x450] sm:$0xff]  ;;  %v305_v29 = vld [vmem:[#allocation5 + $0x458] sm:$0xff] }
 0x15c   :  { %2900 = vmatprep.subr.bf16.mxu0 %v7769_v43  ;;  %3064 = vmatprep.subr.bf16.mxu1 %v7771_v9  ;;  %v7825_v43 = vcombine.high %v256_v36, %v260_v37  ;;  %v7827_v9 = vcombine.high %v257_v39, %v261_v40  ;;  %v308_v28 = vld [vmem:[#allocation5 + $0x470] sm:$0xff]  ;;  %v309_v30 = vld [vmem:[#allocation5 + $0x478] sm:$0xff] }
 0x15f   :  { %2901 = vmatpush1.bf16.msra.mxu0 %v7768_v31  ;;  %3065 = vmatpush1.bf16.msra.mxu1 %v7770_v50  ;;  %v7824_v31 = vcombine.low %v256_v36, %v260_v37  ;;  %v7826_v50 = vcombine.low %v257_v39, %v261_v40  ;;  %v312_v36 = vld [vmem:[#allocation5 + $0x490] sm:$0xff]  ;;  %v313_v39 = vld [vmem:[#allocation5 + $0x498] sm:$0xff] }
 0x160   :  { %2902 = vmatprep.subr.bf16.mxu0 %v7777_v51  ;;  %3066 = vmatprep.subr.bf16.mxu1 %v7779_v52  ;;  %v7833_v51 = vcombine.high %v264_v45, %v268_v46  ;;  %v7835_v52 = vcombine.high %v265_v49, %v269_v53  ;;  %v316_v37 = vld [vmem:[#allocation5 + $0x4b0] sm:$0xff]  ;;  %v317_v40 = vld [vmem:[#allocation5 + $0x4b8] sm:$0xff] }
 0x163   :  { %2903 = vmatpush1.bf16.msra.mxu0 %v7776_v16  ;;  %3067 = vmatpush1.bf16.msra.mxu1 %v7778_v60  ;;  %v7832_v16 = vcombine.low %v264_v45, %v268_v46  ;;  %v7834_v60 = vcombine.low %v265_v49, %v269_v53  ;;  %v320_v45 = vld [vmem:[#allocation5 + $0x4d0] sm:$0xff]  ;;  %v321_v49 = vld [vmem:[#allocation5 + $0x4d8] sm:$0xff] }
 0x164   :  { %2904 = vmatprep.subr.bf16.mxu0 %v7785_v61  ;;  %3068 = vmatprep.subr.bf16.mxu1 %v7787_v62  ;;  %v7841_v61 = vcombine.high %v272_v54, %v276_v55  ;;  %v7843_v62 = vcombine.high %v273_v57, %v277_v58  ;;  %v324_v46 = vld [vmem:[#allocation5 + $0x4f0] sm:$0xff]  ;;  %v325_v53 = vld [vmem:[#allocation5 + $0x4f8] sm:$0xff] }
 0x167   :  { %2905 = vmatpush1.bf16.msra.mxu0 %v7784_v5  ;;  %3069 = vmatpush1.bf16.msra.mxu1 %v7786_v6  ;;  %v7840_v5 = vcombine.low %v272_v54, %v276_v55  ;;  %v7842_v6 = vcombine.low %v273_v57, %v277_v58  ;;  %v332_v54 = vld [vmem:[#allocation5 + $0x530] sm:$0xff]  ;;  %v329_v55 = vld [vmem:[#allocation5 + $0x518] sm:$0xff]  ;;  %v7888_v58 = vcombine.low %v320_v45, %v324_v46 }
 0x168   :  { %2906 = vmatprep.subr.bf16.mxu0 %v7793_v7  ;;  %3070 = vmatprep.subr.bf16.mxu1 %v7795_v8  ;;  %v7849_v7 = vcombine.high %v280_v1, %v284_v2  ;;  %v7851_v8 = vcombine.high %v281_v3, %v285_v4  ;;  %v333_v57 = vld [vmem:[#allocation5 + $0x538] sm:$0xff] }
 0x16b   :  { %2907 = vmatpush1.bf16.msra.mxu0 %v7792_v15  ;;  %3071 = vmatpush1.bf16.msra.mxu1 %v7794_v17  ;;  %v7848_v15 = vcombine.low %v280_v1, %v284_v2  ;;  %v7850_v17 = vcombine.low %v281_v3, %v285_v4  ;;  %v337_v1 = vld [vmem:[#allocation5 + $0x558] sm:$0xff]  ;;  %v7898_v4 = vcombine.low %v329_v55, %v333_v57 }
 0x16c   :  { %2908 = vmatprep.subr.bf16.mxu0 %v7801_v18  ;;  %3072 = vmatprep.subr.bf16.mxu1 %v7803_v19  ;;  %v7857_v18 = vcombine.high %v288_v10, %v292_v11  ;;  %v7859_v19 = vcombine.high %v289_v13, %v293_v14  ;;  %v341_v2 = vld [vmem:[#allocation5 + $0x578] sm:$0xff] }
 0x16f   :  { %2909 = vmatpush1.bf16.msra.mxu0 %v7800_v47  ;;  %3073 = vmatpush1.bf16.msra.mxu1 %v7802_v23  ;;  %v7856_v47 = vcombine.low %v288_v10, %v292_v11  ;;  %v7858_v23 = vcombine.low %v289_v13, %v293_v14  ;;  %v345_v10 = vld [vmem:[#allocation5 + $0x598] sm:$0xff]  ;;  %v7906_v14 = vcombine.low %v337_v1, %v341_v2 }
 0x170   :  { %2910 = vmatprep.subr.bf16.mxu0 %v7809_v24  ;;  %3074 = vmatprep.subr.bf16.mxu1 %v7811_v26  ;;  %v7865_v24 = vcombine.high %v296_v59, %v300_v20  ;;  %v7867_v26 = vcombine.high %v297_v21, %v301_v22  ;;  %v349_v11 = vld [vmem:[#allocation5 + $0x5b8] sm:$0xff] }
 0x173   :  { %2911 = vmatpush1.bf16.msra.mxu0 %v7808_v32  ;;  %3075 = vmatpush1.bf16.msra.mxu1 %v7810_v33  ;;  %v7864_v32 = vcombine.low %v296_v59, %v300_v20  ;;  %v7866_v33 = vcombine.low %v297_v21, %v301_v22  ;;  %v353_v59 = vld [vmem:[#allocation5 + $0x5d8] sm:$0xff]  ;;  %v7914_v22 = vcombine.low %v345_v10, %v349_v11 }
 0x174   :  { %2912 = vmatprep.subr.bf16.mxu0 %v7817_v34  ;;  %3076 = vmatprep.subr.bf16.mxu1 %v7819_v63  ;;  %v7873_v34 = vcombine.high %v304_v27, %v308_v28  ;;  %v7875_v63 = vcombine.high %v305_v29, %v309_v30  ;;  %v357_v20 = vld [vmem:[#allocation5 + $0x5f8] sm:$0xff] }
 0x177   :  { %2913 = vmatpush1.bf16.msra.mxu0 %v7816_v41  ;;  %3077 = vmatpush1.bf16.msra.mxu1 %v7818_v42  ;;  %v7872_v41 = vcombine.low %v304_v27, %v308_v28  ;;  %v7874_v42 = vcombine.low %v305_v29, %v309_v30  ;;  %v361_v27 = vld [vmem:[#allocation5 + $0x618] sm:$0xff]  ;;  %v7922_v30 = vcombine.low %v353_v59, %v357_v20 }
 0x178   :  { %2914 = vmatprep.subr.bf16.mxu0 %v7825_v43  ;;  %3078 = vmatprep.subr.bf16.mxu1 %v7827_v9  ;;  %v7881_v43 = vcombine.high %v312_v36, %v316_v37  ;;  %v7883_v9 = vcombine.high %v313_v39, %v317_v40  ;;  %v365_v28 = vld [vmem:[#allocation5 + $0x638] sm:$0xff] }
 0x17b   :  { %2915 = vmatpush1.bf16.msra.mxu0 %v7824_v31  ;;  %3079 = vmatpush1.bf16.msra.mxu1 %v7826_v50  ;;  %v7880_v31 = vcombine.low %v312_v36, %v316_v37  ;;  %v7889_v50 = vcombine.high %v320_v45, %v324_v46  ;;  %v369_v36 = vld [vmem:[#allocation5 + $0x658] sm:$0xff] }
 0x17c   :  { %2916 = vmatprep.subr.bf16.mxu0 %v7833_v51  ;;  %3080 = vmatprep.subr.bf16.mxu1 %v7835_v52  ;;  %v7891_v51 = vcombine.high %v321_v49, %v325_v53  ;;  %v328_v52 = vld [vmem:[#allocation5 + $0x510] sm:$0xff]  ;;  %v373_v37 = vld [vmem:[#allocation5 + $0x678] sm:$0xff] }
 0x17d   :  { %v7896_v3 = vcombine.low %v328_v52, %v332_v54  ;;  %v377_v45 = vld [vmem:[#allocation5 + $0x698] sm:$0xff] }
 0x17e   :  { %v381_v46 = vld [vmem:[#allocation5 + $0x6b8] sm:$0xff] }
 0x17f   :  { %2917 = vmatpush1.bf16.msra.mxu0 %v7832_v16  ;;  %3081 = vmatpush1.bf16.msra.mxu1 %v7834_v60  ;;  %v7890_v16 = vcombine.low %v321_v49, %v325_v53  ;;  %v7897_v60 = vcombine.high %v328_v52, %v332_v54  ;;  %v7938_v53 = vcombine.low %v369_v36, %v373_v37  ;;  %v385_v52 = vld [vmem:[#allocation5 + $0x6d8] sm:$0xff] }
 0x180   :  { %2918 = vmatprep.subr.bf16.mxu0 %v7841_v61  ;;  %3082 = vmatprep.subr.bf16.mxu1 %v7843_v62  ;;  %v336_v61 = vld [vmem:[#allocation5 + $0x550] sm:$0xff]  ;;  %v389_v54 = vld [vmem:[#allocation5 + $0x6f8] sm:$0xff] }
 0x181   :  { %v340_v62 = vld [vmem:[#allocation5 + $0x570] sm:$0xff] }
 0x182   :  { %v7904_v13 = vcombine.low %v336_v61, %v340_v62 }
 0x183   :  { %2919 = vmatpush1.bf16.msra.mxu0 %v7840_v5  ;;  %3083 = vmatpush1.bf16.msra.mxu1 %v7842_v6  ;;  %v7905_v5 = vcombine.high %v336_v61, %v340_v62  ;;  %v7907_v6 = vcombine.high %v337_v1, %v341_v2  ;;  %v393_v61 = vld [vmem:[#allocation5 + $0x718] sm:$0xff]  ;;  %v7954_v2 = vcombine.low %v385_v52, %v389_v54 }
 0x184   :  { %2920 = vmatprep.subr.bf16.mxu0 %v7849_v7  ;;  %3084 = vmatprep.subr.bf16.mxu1 %v7851_v8  ;;  %v344_v7 = vld [vmem:[#allocation5 + $0x590] sm:$0xff]  ;;  %v397_v62 = vld [vmem:[#allocation5 + $0x738] sm:$0xff] }
 0x185   :  { %v348_v8 = vld [vmem:[#allocation5 + $0x5b0] sm:$0xff] }
 0x186   :  { %v7912_v21 = vcombine.low %v344_v7, %v348_v8 }
 0x187   :  { %2921 = vmatpush1.bf16.msra.mxu0 %v7848_v15  ;;  %3085 = vmatpush1.bf16.msra.mxu1 %v7850_v17  ;;  %v7913_v15 = vcombine.high %v344_v7, %v348_v8  ;;  %v7915_v17 = vcombine.high %v345_v10, %v349_v11  ;;  %v401_v7 = vld [vmem:[#allocation5 + $0x758] sm:$0xff]  ;;  %v7962_v11 = vcombine.low %v393_v61, %v397_v62 }
 0x188   :  { %2922 = vmatprep.subr.bf16.mxu0 %v7857_v18  ;;  %3086 = vmatprep.subr.bf16.mxu1 %v7859_v19  ;;  %v352_v18 = vld [vmem:[#allocation5 + $0x5d0] sm:$0xff]  ;;  %v405_v8 = vld [vmem:[#allocation5 + $0x778] sm:$0xff] }
 0x189   :  { %v356_v19 = vld [vmem:[#allocation5 + $0x5f0] sm:$0xff] }
 0x18a   :  { %v7920_v29 = vcombine.low %v352_v18, %v356_v19 }
 0x18b   :  { %2923 = vmatpush1.bf16.msra.mxu0 %v7856_v47  ;;  %3087 = vmatpush1.bf16.msra.mxu1 %v7858_v23  ;;  %v7921_v47 = vcombine.high %v352_v18, %v356_v19  ;;  %v7923_v23 = vcombine.high %v353_v59, %v357_v20  ;;  %v409_v18 = vld [vmem:[#allocation5 + $0x798] sm:$0xff]  ;;  %v7970_v20 = vcombine.low %v401_v7, %v405_v8 }
 0x18c   :  { %2933 = vmatprep.subr.bf16.mxu0 %v7865_v24  ;;  %3097 = vmatprep.subr.bf16.mxu1 %v7867_v26  ;;  %v360_v24 = vld [vmem:[#allocation5 + $0x610] sm:$0xff]  ;;  %v413_v19 = vld [vmem:[#allocation5 + $0x7b8] sm:$0xff] }
 0x18d   :  { %v364_v26 = vld [vmem:[#allocation5 + $0x630] sm:$0xff] }
 0x18e   :  { %2925 = vmatmul.mubr.bf16.vlgmr.msra.gmra.mrb[4].mxu0 %v9340_v25  ;;  %3089 = vmatmul.mubr.bf16.vlgmr.msra.gmra.mrb[4].mxu1 %v9340_v25  ;;  %v7882_v25 = vcombine.low %v313_v39, %v317_v40  ;;  %v7928_v39 = vcombine.low %v360_v24, %v364_v26  ;;  %v7930_v40 = vcombine.low %v361_v27, %v365_v28 }
 0x18f   :  { %2934 = vmatpush1.bf16.msra.mxu0 %v7864_v32  ;;  %3098 = vmatpush1.bf16.msra.mxu1 %v7866_v33  ;;  %v7929_v32 = vcombine.high %v360_v24, %v364_v26  ;;  %v7931_v33 = vcombine.high %v361_v27, %v365_v28  ;;  %v417_v24 = vld [vmem:[#allocation5 + $0x7d8] sm:$0xff]  ;;  %v7978_v28 = vcombine.low %v409_v18, %v413_v19 }
 0x190   :  { %2935 = vmatprep.subr.bf16.mxu0 %v7873_v34  ;;  %3099 = vmatprep.subr.bf16.mxu1 %v7875_v63  ;;  %v368_v34 = vld [vmem:[#allocation5 + $0x650] sm:$0xff]  ;;  %v421_v26 = vld [vmem:[#allocation5 + $0x7f8] sm:$0xff] }
 0x191   :  { %2965 = vmatprep.mubr.bf16.mxu0 %v9344_v35  ;;  %3129 = vmatprep.mubr.bf16.mxu1 %v9344_v35  ;;  %v7899_v35 = vcombine.high %v329_v55, %v333_v57  ;;  %v372_v63 = vld [vmem:[#allocation5 + $0x670] sm:$0xff]  ;;  %v7946_v57 = vcombine.low %v377_v45, %v381_v46 }
 0x192   :  { %v7936_v49 = vcombine.low %v368_v34, %v372_v63 }
 0x193   :  { %2936 = vmatpush1.bf16.msra.mxu0 %v7872_v41  ;;  %3100 = vmatpush1.bf16.msra.mxu1 %v7874_v42  ;;  %v7937_v41 = vcombine.high %v368_v34, %v372_v63  ;;  %v7939_v42 = vcombine.high %v369_v36, %v373_v37  ;;  %v425_v34 = vld [vmem:[#allocation5 + $0x818] sm:$0xff]  ;;  %v7986_v37 = vcombine.low %v417_v24, %v421_v26 }
 0x194   :  { %2937 = vmatprep.subr.bf16.mxu0 %v7881_v43  ;;  %3101 = vmatprep.subr.bf16.mxu1 %v7883_v9  ;;  %v376_v43 = vld [vmem:[#allocation5 + $0x690] sm:$0xff]  ;;  %v429_v63 = vld [vmem:[#allocation5 + $0x838] sm:$0xff] }
 0x195   :  { %v380_v9 = vld [vmem:[#allocation5 + $0x6b0] sm:$0xff] }
 0x196   :  { %v7944_v55 = vcombine.low %v376_v43, %v380_v9 }
 0x197   :  { %2938 = vmatpush1.bf16.msra.mxu0 %v7880_v31  ;;  %3102 = vmatpush1.bf16.msra.mxu1 %v7882_v25  ;;  %v7945_v31 = vcombine.high %v376_v43, %v380_v9  ;;  %v7947_v25 = vcombine.high %v377_v45, %v381_v46  ;;  %v433_v43 = vld [vmem:[#allocation5 + $0x858] sm:$0xff]  ;;  %v7994_v46 = vcombine.low %v425_v34, %v429_v63 }
 0x198   :  { %2939 = vmatprep.subr.bf16.mxu0 %v7889_v50  ;;  %3103 = vmatprep.subr.bf16.mxu1 %v7891_v51  ;;  %v384_v50 = vld [vmem:[#allocation5 + $0x6d0] sm:$0xff]  ;;  %v437_v9 = vld [vmem:[#allocation5 + $0x878] sm:$0xff] }
 0x199   :  { %v388_v51 = vld [vmem:[#allocation5 + $0x6f0] sm:$0xff] }
 0x19a   :  { %v7952_v1 = vcombine.low %v384_v50, %v388_v51 }
 0x19b   :  { %2940 = vmatpush1.bf16.msra.mxu0 %v7888_v58  ;;  %3104 = vmatpush1.bf16.msra.mxu1 %v7890_v16  ;;  %v7953_v58 = vcombine.high %v384_v50, %v388_v51  ;;  %v7955_v16 = vcombine.high %v385_v52, %v389_v54  ;;  %v441_v50 = vld [vmem:[#allocation5 + $0x898] sm:$0xff]  ;;  %v8002_v54 = vcombine.low %v433_v43, %v437_v9 }
 0x19c   :  { %2941 = vmatprep.subr.bf16.mxu0 %v7897_v60  ;;  %3105 = vmatprep.subr.bf16.mxu1 %v7899_v35  ;;  %v392_v60 = vld [vmem:[#allocation5 + $0x710] sm:$0xff]  ;;  %v445_v51 = vld [vmem:[#allocation5 + $0x8b8] sm:$0xff] }
 0x19d   :  { %v396_v35 = vld [vmem:[#allocation5 + $0x730] sm:$0xff] }
 0x19e   :  { %v7960_v10 = vcombine.low %v392_v60, %v396_v35 }
 0x19f   :  { %2942 = vmatpush1.bf16.msra.mxu0 %v7896_v3  ;;  %3106 = vmatpush1.bf16.msra.mxu1 %v7898_v4  ;;  %v7961_v3 = vcombine.high %v392_v60, %v396_v35  ;;  %v7963_v4 = vcombine.high %v393_v61, %v397_v62  ;;  %v449_v60 = vld [vmem:[#allocation5 + $0x8d8] sm:$0xff] }
 0x1a0   :  { %2943 = vmatprep.subr.bf16.mxu0 %v7905_v5  ;;  %3107 = vmatprep.subr.bf16.mxu1 %v7907_v6  ;;  %v400_v5 = vld [vmem:[#allocation5 + $0x750] sm:$0xff]  ;;  %v453_v35 = vld [vmem:[#allocation5 + $0x8f8] sm:$0xff] }
 0x1a1   :  { %v404_v6 = vld [vmem:[#allocation5 + $0x770] sm:$0xff] }
 0x1a2   :  { %v7968_v59 = vcombine.low %v400_v5, %v404_v6 }
 0x1a3   :  { %2944 = vmatpush1.bf16.msra.mxu0 %v7904_v13  ;;  %3108 = vmatpush1.bf16.msra.mxu1 %v7906_v14  ;;  %v7969_v13 = vcombine.high %v400_v5, %v404_v6  ;;  %v7971_v14 = vcombine.high %v401_v7, %v405_v8  ;;  %v461_v5 = vld [vmem:[#allocation5 + $0x938] sm:$0xff]  ;;  %v8018_v7 = vcombine.low %v449_v60, %v453_v35 }
 0x1a4   :  { %2945 = vmatprep.subr.bf16.mxu0 %v7913_v15  ;;  %3109 = vmatprep.subr.bf16.mxu1 %v7915_v17  ;;  %v408_v15 = vld [vmem:[#allocation5 + $0x790] sm:$0xff] }
 0x1a5   :  { %v412_v17 = vld [vmem:[#allocation5 + $0x7b0] sm:$0xff] }
 0x1a6   :  { %v7976_v27 = vcombine.low %v408_v15, %v412_v17 }
 0x1a7   :  { %2946 = vmatpush1.bf16.msra.mxu0 %v7912_v21  ;;  %3110 = vmatpush1.bf16.msra.mxu1 %v7914_v22  ;;  %v7977_v21 = vcombine.high %v408_v15, %v412_v17  ;;  %v7979_v22 = vcombine.high %v409_v18, %v413_v19 }
 0x1a8   :  { %2947 = vmatprep.subr.bf16.mxu0 %v7921_v47  ;;  %3111 = vmatprep.subr.bf16.mxu1 %v7923_v23  ;;  %v416_v47 = vld [vmem:[#allocation5 + $0x7d0] sm:$0xff] }
 0x1a9   :  { %v420_v23 = vld [vmem:[#allocation5 + $0x7f0] sm:$0xff] }
 0x1aa   :  { %v7984_v36 = vcombine.low %v416_v47, %v420_v23 }
 0x1ab   :  { %2948 = vmatpush1.bf16.msra.mxu0 %v7920_v29  ;;  %3112 = vmatpush1.bf16.msra.mxu1 %v7922_v30  ;;  %v7985_v29 = vcombine.high %v416_v47, %v420_v23  ;;  %v7987_v30 = vcombine.high %v417_v24, %v421_v26 }
 0x1ac   :  { %2949 = vmatprep.subr.bf16.mxu0 %v7929_v32  ;;  %3113 = vmatprep.subr.bf16.mxu1 %v7931_v33  ;;  %v424_v32 = vld [vmem:[#allocation5 + $0x810] sm:$0xff] }
 0x1ad   :  { %v428_v33 = vld [vmem:[#allocation5 + $0x830] sm:$0xff] }
 0x1ae   :  { %v7992_v45 = vcombine.low %v424_v32, %v428_v33 }
 0x1af   :  { %2950 = vmatpush1.bf16.msra.mxu0 %v7928_v39  ;;  %3114 = vmatpush1.bf16.msra.mxu1 %v7930_v40  ;;  %v7993_v39 = vcombine.high %v424_v32, %v428_v33  ;;  %v7995_v40 = vcombine.high %v425_v34, %v429_v63 }
 0x1b0   :  { %2951 = vmatprep.subr.bf16.mxu0 %v7937_v41  ;;  %3115 = vmatprep.subr.bf16.mxu1 %v7939_v42  ;;  %v432_v41 = vld [vmem:[#allocation5 + $0x850] sm:$0xff] }
 0x1b1   :  { %v436_v42 = vld [vmem:[#allocation5 + $0x870] sm:$0xff] }
 0x1b2   :  { %v8000_v52 = vcombine.low %v432_v41, %v436_v42 }
 0x1b3   :  { %2952 = vmatpush1.bf16.msra.mxu0 %v7936_v49  ;;  %3116 = vmatpush1.bf16.msra.mxu1 %v7938_v53  ;;  %v8001_v49 = vcombine.high %v432_v41, %v436_v42  ;;  %v8003_v53 = vcombine.high %v433_v43, %v437_v9 }
 0x1b4   :  { %2953 = vmatprep.subr.bf16.mxu0 %v7945_v31  ;;  %3117 = vmatprep.subr.bf16.mxu1 %v7947_v25  ;;  %v440_v31 = vld [vmem:[#allocation5 + $0x890] sm:$0xff] }
 0x1b5   :  { %v444_v25 = vld [vmem:[#allocation5 + $0x8b0] sm:$0xff] }
 0x1b6   :  { %v8008_v61 = vcombine.low %v440_v31, %v444_v25 }
 0x1b7   :  { %2954 = vmatpush1.bf16.msra.mxu0 %v7944_v55  ;;  %3118 = vmatpush1.bf16.msra.mxu1 %v7946_v57  ;;  %v8009_v55 = vcombine.high %v440_v31, %v444_v25  ;;  %v8011_v57 = vcombine.high %v441_v50, %v445_v51 }
 0x1b8   :  { %2955 = vmatprep.subr.bf16.mxu0 %v7953_v58  ;;  %3119 = vmatprep.subr.bf16.mxu1 %v7955_v16  ;;  %v448_v58 = vld [vmem:[#allocation5 + $0x8d0] sm:$0xff] }
 0x1b9   :  { %v452_v16 = vld [vmem:[#allocation5 + $0x8f0] sm:$0xff] }
 0x1ba   :  { %v8017_v62 = vcombine.high %v448_v58, %v452_v16  ;;  %v8016_v6 = vcombine.low %v448_v58, %v452_v16 }
 0x1bb   :  { %2956 = vmatpush1.bf16.msra.mxu0 %v7952_v1  ;;  %3120 = vmatpush1.bf16.msra.mxu1 %v7954_v2  ;;  %v8019_v1 = vcombine.high %v449_v60, %v453_v35  ;;  %v456_v2 = vld [vmem:[#allocation5 + $0x910] sm:$0xff] }
 0x1bc   :  { %2957 = vmatprep.subr.bf16.mxu0 %v7961_v3  ;;  %3121 = vmatprep.subr.bf16.mxu1 %v7963_v4  ;;  %v460_v3 = vld [vmem:[#allocation5 + $0x930] sm:$0xff]  ;;  %v457_v4 = vld [vmem:[#allocation5 + $0x918] sm:$0xff] }
 0x1bd   :  { %v8025_v8 = vcombine.high %v456_v2, %v460_v3  ;;  %v8024_v15 = vcombine.low %v456_v2, %v460_v3  ;;  %v8026_v17 = vcombine.low %v457_v4, %v461_v5 }
 0x1bf   :  { %2958 = vmatpush1.bf16.msra.mxu0 %v7960_v10  ;;  %3122 = vmatpush1.bf16.msra.mxu1 %v7962_v11  ;;  %v464_v10 = vld [vmem:[#allocation5 + $0x950] sm:$0xff] }
 0x1c0   :  { %2959 = vmatprep.subr.bf16.mxu0 %v7969_v13  ;;  %3123 = vmatprep.subr.bf16.mxu1 %v7971_v14  ;;  %v468_v11 = vld [vmem:[#allocation5 + $0x970] sm:$0xff]  ;;  %v465_v13 = vld [vmem:[#allocation5 + $0x958] sm:$0xff] }
 0x1c1   :  { %v469_v14 = vld [vmem:[#allocation5 + $0x978] sm:$0xff]  ;;  %v8033_v18 = vcombine.high %v464_v10, %v468_v11  ;;  %v8032_v47 = vcombine.low %v464_v10, %v468_v11 }
 0x1c2   :  { %v8035_v19 = vcombine.high %v465_v13, %v469_v14  ;;  %v8034_v23 = vcombine.low %v465_v13, %v469_v14 }
 0x1c3   :  { %2960 = vmatpush1.bf16.msra.mxu0 %v7968_v59  ;;  %3124 = vmatpush1.bf16.msra.mxu1 %v7970_v20  ;;  %v472_v59 = vld [vmem:[#allocation5 + $0x990] sm:$0xff] }
 0x1c4   :  { %2961 = vmatprep.subr.bf16.mxu0 %v7977_v21  ;;  %3125 = vmatprep.subr.bf16.mxu1 %v7979_v22  ;;  %v476_v20 = vld [vmem:[#allocation5 + $0x9b0] sm:$0xff]  ;;  %v473_v21 = vld [vmem:[#allocation5 + $0x998] sm:$0xff] }
 0x1c5   :  { %v477_v22 = vld [vmem:[#allocation5 + $0x9b8] sm:$0xff]  ;;  %v8041_v24 = vcombine.high %v472_v59, %v476_v20  ;;  %v8040_v32 = vcombine.low %v472_v59, %v476_v20 }
 0x1c6   :  { %v8043_v26 = vcombine.high %v473_v21, %v477_v22  ;;  %v8042_v33 = vcombine.low %v473_v21, %v477_v22 }
 0x1c7   :  { %2962 = vmatpush1.bf16.msra.mxu0 %v7976_v27  ;;  %3126 = vmatpush1.bf16.msra.mxu1 %v7978_v28  ;;  %v480_v27 = vld [vmem:[#allocation5 + $0x9d0] sm:$0xff] }
 0x1c8   :  { %2963 = vmatprep.subr.bf16.mxu0 %v7985_v29  ;;  %3127 = vmatprep.subr.bf16.mxu1 %v7987_v30  ;;  %v484_v28 = vld [vmem:[#allocation5 + $0x9f0] sm:$0xff]  ;;  %v481_v29 = vld [vmem:[#allocation5 + $0x9d8] sm:$0xff] }
 0x1c9   :  { %v485_v30 = vld [vmem:[#allocation5 + $0x9f8] sm:$0xff]  ;;  %v8049_v34 = vcombine.high %v480_v27, %v484_v28  ;;  %v8048_v41 = vcombine.low %v480_v27, %v484_v28 }
 0x1ca   :  { %v8051_v63 = vcombine.high %v481_v29, %v485_v30  ;;  %v8050_v42 = vcombine.low %v481_v29, %v485_v30 }
 0x1cb   :  { %2964 = vmatpush1.bf16.msra.mxu0 %v7984_v36  ;;  %3128 = vmatpush1.bf16.msra.mxu1 %v7986_v37  ;;  %v488_v36 = vld [vmem:[#allocation5 + $0xa10] sm:$0xff] }
 0x1cc   :  { %2974 = vmatprep.subr.bf16.mxu0 %v7993_v39  ;;  %3138 = vmatprep.subr.bf16.mxu1 %v7995_v40  ;;  %v492_v37 = vld [vmem:[#allocation5 + $0xa30] sm:$0xff]  ;;  %v489_v39 = vld [vmem:[#allocation5 + $0xa18] sm:$0xff] }
 0x1cd   :  { %v493_v40 = vld [vmem:[#allocation5 + $0xa38] sm:$0xff]  ;;  %v8057_v43 = vcombine.high %v488_v36, %v492_v37  ;;  %v8056_v31 = vcombine.low %v488_v36, %v492_v37 }
 0x1ce   :  { %2966 = vmatmul.mubr.bf16.vlgmr.msra.gmra.mrb[4].mxu0 %v9363_v48  ;;  %3130 = vmatmul.mubr.bf16.vlgmr.msra.gmra.mrb[4].mxu1 %v9363_v48  ;;  %v8010_v48 = vcombine.low %v441_v50, %v445_v51  ;;  %v8059_v9 = vcombine.high %v489_v39, %v493_v40  ;;  %v8058_v25 = vcombine.low %v489_v39, %v493_v40 }
 0x1cf   :  { %2975 = vmatpush1.bf16.msra.mxu0 %v7992_v45  ;;  %3139 = vmatpush1.bf16.msra.mxu1 %v7994_v46  ;;  %v496_v45 = vld [vmem:[#allocation5 + $0xa50] sm:$0xff] }
 0x1d0   :  { %2976 = vmatprep.subr.bf16.mxu0 %v8001_v49  ;;  %3140 = vmatprep.subr.bf16.mxu1 %v8003_v53  ;;  %v500_v46 = vld [vmem:[#allocation5 + $0xa70] sm:$0xff]  ;;  %v497_v49 = vld [vmem:[#allocation5 + $0xa58] sm:$0xff] }
 0x1d1   :  { %3006 = vmatprep.mubr.bf16.mxu0 %v9365_v56  ;;  %3170 = vmatprep.mubr.bf16.mxu1 %v9365_v56  ;;  %v8027_v56 = vcombine.high %v457_v4, %v461_v5  ;;  %v501_v53 = vld [vmem:[#allocation5 + $0xa78] sm:$0xff]  ;;  %v8065_v50 = vcombine.high %v496_v45, %v500_v46  ;;  %v8064_v58 = vcombine.low %v496_v45, %v500_v46 }
 0x1d2   :  { %v8067_v51 = vcombine.high %v497_v49, %v501_v53  ;;  %v8066_v16 = vcombine.low %v497_v49, %v501_v53 }
 0x1d3   :  { %2977 = vmatpush1.bf16.msra.mxu0 %v8000_v52  ;;  %3141 = vmatpush1.bf16.msra.mxu1 %v8002_v54  ;;  %v504_v52 = vld [vmem:[#allocation5 + $0xa90] sm:$0xff] }
 0x1d4   :  { %2978 = vmatprep.subr.bf16.mxu0 %v8009_v55  ;;  %3142 = vmatprep.subr.bf16.mxu1 %v8011_v57  ;;  %v508_v54 = vld [vmem:[#allocation5 + $0xab0] sm:$0xff]  ;;  %v505_v55 = vld [vmem:[#allocation5 + $0xa98] sm:$0xff] }
 0x1d5   :  { %v509_v57 = vld [vmem:[#allocation5 + $0xab8] sm:$0xff]  ;;  %v8073_v60 = vcombine.high %v504_v52, %v508_v54  ;;  %v8072_v2 = vcombine.low %v504_v52, %v508_v54  ;;  %v3241_v52 = vld [vmem:[#allocation8 + $0x28] sm:$0xff] }
 0x1d6   :  { %v8075_v35 = vcombine.high %v505_v55, %v509_v57  ;;  %v8074_v3 = vcombine.low %v505_v55, %v509_v57 }
 0x1d7   :  { %2979 = vmatpush1.bf16.msra.mxu0 %v8008_v61  ;;  %3143 = vmatpush1.bf16.msra.mxu1 %v8010_v48  ;;  %v512_v61 = vld [vmem:[#allocation5 + $0xad0] sm:$0xff] }
 0x1d8   :  { %2980 = vmatprep.subr.bf16.mxu0 %v8017_v62  ;;  %3144 = vmatprep.subr.bf16.mxu1 %v8019_v1  ;;  %v516_v48 = vld [vmem:[#allocation5 + $0xaf0] sm:$0xff]  ;;  %v513_v62 = vld [vmem:[#allocation5 + $0xad8] sm:$0xff] }
 0x1d9   :  { %v517_v1 = vld [vmem:[#allocation5 + $0xaf8] sm:$0xff]  ;;  %v8081_v4 = vcombine.high %v512_v61, %v516_v48  ;;  %v8080_v10 = vcombine.low %v512_v61, %v516_v48 }
 0x1da   :  { %v8083_v5 = vcombine.high %v513_v62, %v517_v1  ;;  %v8082_v11 = vcombine.low %v513_v62, %v517_v1 }
 0x1db   :  { %2981 = vmatpush1.bf16.msra.mxu0 %v8016_v6  ;;  %3145 = vmatpush1.bf16.msra.mxu1 %v8018_v7  ;;  %v520_v6 = vld [vmem:[#allocation5 + $0xb10] sm:$0xff] }
 0x1dc   :  { %2982 = vmatprep.subr.bf16.mxu0 %v8025_v8  ;;  %3146 = vmatprep.subr.bf16.mxu1 %v8027_v56  ;;  %v524_v7 = vld [vmem:[#allocation5 + $0xb30] sm:$0xff]  ;;  %v521_v8 = vld [vmem:[#allocation5 + $0xb18] sm:$0xff] }
 0x1dd   :  { %v525_v56 = vld [vmem:[#allocation5 + $0xb38] sm:$0xff]  ;;  %v8089_v13 = vcombine.high %v520_v6, %v524_v7  ;;  %v8088_v59 = vcombine.low %v520_v6, %v524_v7 }
 0x1de   :  { %v8091_v14 = vcombine.high %v521_v8, %v525_v56  ;;  %v8090_v20 = vcombine.low %v521_v8, %v525_v56  ;;  %v9406_v8 = vld [vmem:[#allocation7] sm:$0xff] }
 0x1df   :  { %2983 = vmatpush1.bf16.msra.mxu0 %v8024_v15  ;;  %3147 = vmatpush1.bf16.msra.mxu1 %v8026_v17  ;;  %v528_v15 = vld [vmem:[#allocation5 + $0xb50] sm:$0xff] }
 0x1e0   :  { %2984 = vmatprep.subr.bf16.mxu0 %v8033_v18  ;;  %3148 = vmatprep.subr.bf16.mxu1 %v8035_v19  ;;  %v532_v17 = vld [vmem:[#allocation5 + $0xb70] sm:$0xff]  ;;  %v529_v18 = vld [vmem:[#allocation5 + $0xb58] sm:$0xff] }
 0x1e1   :  { %v533_v19 = vld [vmem:[#allocation5 + $0xb78] sm:$0xff]  ;;  %v8097_v21 = vcombine.high %v528_v15, %v532_v17  ;;  %v8096_v27 = vcombine.low %v528_v15, %v532_v17 }
 0x1e2   :  { %v8099_v22 = vcombine.high %v529_v18, %v533_v19  ;;  %v8098_v28 = vcombine.low %v529_v18, %v533_v19 }
 0x1e3   :  { %2985 = vmatpush1.bf16.msra.mxu0 %v8032_v47  ;;  %3149 = vmatpush1.bf16.msra.mxu1 %v8034_v23  ;;  %v536_v47 = vld [vmem:[#allocation5 + $0xb90] sm:$0xff] }
 0x1e4   :  { %2986 = vmatprep.subr.bf16.mxu0 %v8041_v24  ;;  %3150 = vmatprep.subr.bf16.mxu1 %v8043_v26  ;;  %v540_v23 = vld [vmem:[#allocation5 + $0xbb0] sm:$0xff]  ;;  %v537_v24 = vld [vmem:[#allocation5 + $0xb98] sm:$0xff] }
 0x1e5   :  { %v541_v26 = vld [vmem:[#allocation5 + $0xbb8] sm:$0xff]  ;;  %v8105_v29 = vcombine.high %v536_v47, %v540_v23  ;;  %v8104_v36 = vcombine.low %v536_v47, %v540_v23  ;;  %v3269_v23 = vld [vmem:[#allocation8 + $0x108] sm:$0xff] }
 0x1e6   :  { %v8107_v30 = vcombine.high %v537_v24, %v541_v26  ;;  %v8106_v37 = vcombine.low %v537_v24, %v541_v26  ;;  %v3273_v24 = vld [vmem:[#allocation8 + $0x128] sm:$0xff] }
 0x1e7   :  { %2987 = vmatpush1.bf16.msra.mxu0 %v8040_v32  ;;  %3151 = vmatpush1.bf16.msra.mxu1 %v8042_v33  ;;  %v544_v32 = vld [vmem:[#allocation5 + $0xbd0] sm:$0xff] }
 0x1e8   :  { %2988 = vmatprep.subr.bf16.mxu0 %v8049_v34  ;;  %3152 = vmatprep.subr.bf16.mxu1 %v8051_v63  ;;  %v548_v33 = vld [vmem:[#allocation5 + $0xbf0] sm:$0xff]  ;;  %v545_v34 = vld [vmem:[#allocation5 + $0xbd8] sm:$0xff] }
 0x1e9   :  { %v549_v63 = vld [vmem:[#allocation5 + $0xbf8] sm:$0xff]  ;;  %v8113_v39 = vcombine.high %v544_v32, %v548_v33  ;;  %v8112_v45 = vcombine.low %v544_v32, %v548_v33 }
 0x1ea   :  { %v8115_v40 = vcombine.high %v545_v34, %v549_v63  ;;  %v8114_v46 = vcombine.low %v545_v34, %v549_v63 }
 0x1eb   :  { %2989 = vmatpush1.bf16.msra.mxu0 %v8048_v41  ;;  %3153 = vmatpush1.bf16.msra.mxu1 %v8050_v42  ;;  %v552_v41 = vld [vmem:[#allocation5 + $0xc10] sm:$0xff] }
 0x1ec   :  { %2990 = vmatprep.subr.bf16.mxu0 %v8057_v43  ;;  %3154 = vmatprep.subr.bf16.mxu1 %v8059_v9  ;;  %v556_v42 = vld [vmem:[#allocation5 + $0xc30] sm:$0xff]  ;;  %v553_v43 = vld [vmem:[#allocation5 + $0xc18] sm:$0xff] }
 0x1ed   :  { %v557_v9 = vld [vmem:[#allocation5 + $0xc38] sm:$0xff]  ;;  %v8121_v49 = vcombine.high %v552_v41, %v556_v42 }
 0x1ee   :  { %v8123_v53 = vcombine.high %v553_v43, %v557_v9  ;;  %v8122_v54 = vcombine.low %v553_v43, %v557_v9 }
 0x1ef   :  { %2991 = vmatpush1.bf16.msra.mxu0 %v8056_v31  ;;  %3155 = vmatpush1.bf16.msra.mxu1 %v8058_v25  ;;  %v3236_v31 = vld [vmem:[#allocation8] sm:$0xff] }
 0x1f0   :  { %2992 = vmatprep.subr.bf16.mxu0 %v8065_v50  ;;  %3156 = vmatprep.subr.bf16.mxu1 %v8067_v51  ;;  %v3240_v25 = vld [vmem:[#allocation8 + $0x20] sm:$0xff]  ;;  %v8120_v50 = vcombine.low %v552_v41, %v556_v42  ;;  %v3237_v51 = vld [vmem:[#allocation8 + $0x8] sm:$0xff] }
 0x1f1   :  { %v8129_v55 = vcombine.high %v3236_v31, %v3240_v25  ;;  %v8131_v57 = vcombine.high %v3237_v51, %v3241_v52  ;;  %v8128_v61 = vcombine.low %v3236_v31, %v3240_v25  ;;  %v8130_v48 = vcombine.low %v3237_v51, %v3241_v52  ;;  %v3277_v41 = vld [vmem:[#allocation8 + $0x148] sm:$0xff]  ;;  %v3288_v31 = vld [vmem:[#allocation8 + $0x1a0] sm:$0xff] }
 0x1f2   :  { %v3281_v42 = vld [vmem:[#allocation8 + $0x168] sm:$0xff] }
 0x1f3   :  { %2993 = vmatpush1.bf16.msra.mxu0 %v8064_v58  ;;  %3157 = vmatpush1.bf16.msra.mxu1 %v8066_v16  ;;  %v3244_v58 = vld [vmem:[#allocation8 + $0x40] sm:$0xff]  ;;  %v3285_v25 = vld [vmem:[#allocation8 + $0x188] sm:$0xff]  ;;  %v8170_v52 = vcombine.low %v3277_v41, %v3281_v42 }
 0x1f4   :  { %2994 = vmatprep.subr.bf16.mxu0 %v8073_v60  ;;  %3158 = vmatprep.subr.bf16.mxu1 %v8075_v35  ;;  %v3248_v16 = vld [vmem:[#allocation8 + $0x60] sm:$0xff]  ;;  %v3245_v60 = vld [vmem:[#allocation8 + $0x48] sm:$0xff] }
 0x1f5   :  { %v3249_v35 = vld [vmem:[#allocation8 + $0x68] sm:$0xff]  ;;  %v8137_v62 = vcombine.high %v3244_v58, %v3248_v16 }
 0x1f6   :  { %v8139_v1 = vcombine.high %v3245_v60, %v3249_v35  ;;  %v8138_v6 = vcombine.low %v3245_v60, %v3249_v35  ;;  %v3297_v60 = vld [vmem:[#allocation8 + $0x1e8] sm:$0xff] }
 0x1f7   :  { %2995 = vmatpush1.bf16.msra.mxu0 %v8072_v2  ;;  %3159 = vmatpush1.bf16.msra.mxu1 %v8074_v3  ;;  %v3252_v2 = vld [vmem:[#allocation8 + $0x80] sm:$0xff] }
 0x1f8   :  { %2996 = vmatprep.subr.bf16.mxu0 %v8081_v4  ;;  %3160 = vmatprep.subr.bf16.mxu1 %v8083_v5  ;;  %v3256_v3 = vld [vmem:[#allocation8 + $0xa0] sm:$0xff]  ;;  %v3257_v4 = vld [vmem:[#allocation8 + $0xa8] sm:$0xff]  ;;  %v566_v5 = vsub.s32 1, %v9314_v44 }
 0x1f9   :  { %v8145_v7 = vcombine.high %v3252_v2, %v3256_v3  ;;  %v8144_v15 = vcombine.low %v3252_v2, %v3256_v3  ;;  %v3304_v2 = vld [vmem:[#allocation8 + $0x220] sm:$0xff]  ;;  %v3301_v3 = vld [vmem:[#allocation8 + $0x208] sm:$0xff] }
 0x1fb   :  { %2997 = vmatpush1.bf16.msra.mxu0 %v8080_v10  ;;  %3161 = vmatpush1.bf16.msra.mxu1 %v8082_v11  ;;  %v3260_v10 = vld [vmem:[#allocation8 + $0xc0] sm:$0xff] }
 0x1fc   :  { %2998 = vmatprep.subr.bf16.mxu0 %v8089_v13  ;;  %3162 = vmatprep.subr.bf16.mxu1 %v8091_v14  ;;  %v3264_v11 = vld [vmem:[#allocation8 + $0xe0] sm:$0xff]  ;;  %v3261_v13 = vld [vmem:[#allocation8 + $0xc8] sm:$0xff] }
 0x1fd   :  { %v3265_v14 = vld [vmem:[#allocation8 + $0xe8] sm:$0xff]  ;;  %v8153_v18 = vcombine.high %v3260_v10, %v3264_v11 }
 0x1fe   :  { %v8154_v33 = vcombine.low %v3261_v13, %v3265_v14 }
 0x1ff   :  { %2999 = vmatpush1.bf16.msra.mxu0 %v8088_v59  ;;  %3163 = vmatpush1.bf16.msra.mxu1 %v8090_v20  ;;  %v8155_v59 = vcombine.high %v3261_v13, %v3265_v14  ;;  %v3268_v20 = vld [vmem:[#allocation8 + $0x100] sm:$0xff]  ;;  %v3313_v13 = vld [vmem:[#allocation8 + $0x268] sm:$0xff] }
 0x200   :  { %3000 = vmatprep.subr.bf16.mxu0 %v8097_v21  ;;  %3164 = vmatprep.subr.bf16.mxu1 %v8099_v22  ;;  %v3272_v21 = vld [vmem:[#allocation8 + $0x120] sm:$0xff] }
 0x201   :  { %v8161_v34 = vcombine.high %v3268_v20, %v3272_v21  ;;  %v8160_v9 = vcombine.low %v3268_v20, %v3272_v21  ;;  %v3317_v20 = vld [vmem:[#allocation8 + $0x288] sm:$0xff] }
 0x202   :  { %v3321_v21 = vld [vmem:[#allocation8 + $0x2a8] sm:$0xff] }
 0x203   :  { %3001 = vmatpush1.bf16.msra.mxu0 %v8096_v27  ;;  %3165 = vmatpush1.bf16.msra.mxu1 %v8098_v28 }
 0x204   :  { %3002 = vmatprep.subr.bf16.mxu0 %v8105_v29  ;;  %3166 = vmatprep.subr.bf16.mxu1 %v8107_v30  ;;  %v8152_v29 = vcombine.low %v3260_v10, %v3264_v11  ;;  %v3312_v10 = vld [vmem:[#allocation8 + $0x260] sm:$0xff]  ;;  %v3309_v11 = vld [vmem:[#allocation8 + $0x248] sm:$0xff] }
 0x207   :  { %3003 = vmatpush1.bf16.msra.mxu0 %v8104_v36  ;;  %3167 = vmatpush1.bf16.msra.mxu1 %v8106_v37  ;;  %v8163_v37 = vcombine.high %v3269_v23, %v3273_v24 }
 0x208   :  { %3004 = vmatprep.subr.bf16.mxu0 %v8113_v39  ;;  %3168 = vmatprep.subr.bf16.mxu1 %v8115_v40  ;;  %v3276_v39 = vld [vmem:[#allocation8 + $0x140] sm:$0xff] }
 0x209   :  { %v3280_v40 = vld [vmem:[#allocation8 + $0x160] sm:$0xff] }
 0x20a   :  { %v8168_v51 = vcombine.low %v3276_v39, %v3280_v40 }
 0x20b   :  { %3005 = vmatpush1.bf16.msra.mxu0 %v8112_v45  ;;  %3169 = vmatpush1.bf16.msra.mxu1 %v8114_v46  ;;  %v8162_v45 = vcombine.low %v3269_v23, %v3273_v24  ;;  %v8169_v46 = vcombine.high %v3276_v39, %v3280_v40  ;;  %v8202_v23 = vcombine.low %v3309_v11, %v3313_v13  ;;  %v3336_v39 = vld [vmem:[#allocation8 + $0x320] sm:$0xff]  ;;  %v3333_v40 = vld [vmem:[#allocation8 + $0x308] sm:$0xff] }
 0x20c   :  { %3015 = vmatprep.subr.bf16.mxu0 %v8121_v49  ;;  %3179 = vmatprep.subr.bf16.mxu1 %v8123_v53  ;;  %v8171_v49 = vcombine.high %v3277_v41, %v3281_v42  ;;  %v3284_v53 = vld [vmem:[#allocation8 + $0x180] sm:$0xff]  ;;  %v3337_v41 = vld [vmem:[#allocation8 + $0x328] sm:$0xff] }
 0x20d   :  { %v8176_v35 = vcombine.low %v3284_v53, %v3288_v31 }
 0x20e   :  { %3007 = vmatmul.mubr.bf16.vlgmr.msra.gmra.mrb[4].mxu0 %v9373_v0  ;;  %3171 = vmatmul.mubr.bf16.vlgmr.msra.gmra.mrb[4].mxu1 %v9373_v0  ;;  %v3253_v0 = vld [vmem:[#allocation8 + $0x88] sm:$0xff] }
 0x20f   :  { %3016 = vmatpush1.bf16.msra.mxu0 %v8120_v50  ;;  %3180 = vmatpush1.bf16.msra.mxu1 %v8122_v54  ;;  %v8147_v56 = vcombine.high %v3253_v0, %v3257_v4  ;;  %v8146_v17 = vcombine.low %v3253_v0, %v3257_v4  ;;  %v3289_v50 = vld [vmem:[#allocation8 + $0x1a8] sm:$0xff]  ;;  %v8177_v54 = vcombine.high %v3284_v53, %v3288_v31  ;;  %v3344_v53 = vld [vmem:[#allocation8 + $0x360] sm:$0xff] }
 0x210   :  { %3047 = vmatprep.mubr.bf16.mxu0 %v9188_v38  ;;  %3211 = vmatprep.mubr.bf16.mxu1 %v9188_v38  ;;  %v8136_v38 = vcombine.low %v3244_v58, %v3248_v16  ;;  %v3296_v58 = vld [vmem:[#allocation8 + $0x1e0] sm:$0xff]  ;;  %v3293_v16 = vld [vmem:[#allocation8 + $0x1c8] sm:$0xff] }
 0x211   :  { %6350 = vmatprep.subr.bf16.mxu0 %v8129_v55  ;;  %6514 = vmatprep.subr.bf16.mxu1 %v8131_v57  ;;  %v8179_v55 = vcombine.high %v3285_v25, %v3289_v50  ;;  %v3292_v57 = vld [vmem:[#allocation8 + $0x1c0] sm:$0xff]  ;;  %v3305_v0 = vld [vmem:[#allocation8 + $0x228] sm:$0xff] }
 0x212   :  { %v8184_v4 = vcombine.low %v3292_v57, %v3296_v58  ;;  %v3341_v31 = vld [vmem:[#allocation8 + $0x348] sm:$0xff] }
 0x21a   :  { %8126 = vmatmul.mubr.msk.bf16.vlgmr.msra.gmra.mrb[4].mxu0 %vm2560_vm0, %v9381_v12  ;;  %8127 = vmatmul.mubr.msk.bf16.vlgmr.msra.gmra.mrb[4].mxu1 %vm2560_vm0, %v9381_v12  ;;  %v567_v12 = vrot.slane %v9406_v8, %v566_v5 }
 0x21b   :  { %6351 = vmatpush1.bf16.msra.mxu0 %v8128_v61  ;;  %6515 = vmatpush1.bf16.msra.mxu1 %v8130_v48  ;;  %v8178_v61 = vcombine.low %v3285_v25, %v3289_v50  ;;  %v8185_v48 = vcombine.high %v3292_v57, %v3296_v58  ;;  %v3345_v25 = vld [vmem:[#allocation8 + $0x368] sm:$0xff]  ;;  %v3348_v57 = vld [vmem:[#allocation8 + $0x380] sm:$0xff] }
 0x21c   :  { %6352 = vmatprep.subr.bf16.mxu0 %v8137_v62  ;;  %6516 = vmatprep.subr.bf16.mxu1 %v8139_v1  ;;  %v8187_v62 = vcombine.high %v3293_v16, %v3297_v60  ;;  %v3300_v1 = vld [vmem:[#allocation8 + $0x200] sm:$0xff] }
 0x21d   :  { %v8192_v14 = vcombine.low %v3300_v1, %v3304_v2  ;;  %v3352_v58 = vld [vmem:[#allocation8 + $0x3a0] sm:$0xff] }
 0x21f   :  { %6353 = vmatpush1.bf16.msra.mxu0 %v8136_v38  ;;  %6517 = vmatpush1.bf16.msra.mxu1 %v8138_v6  ;;  %v8186_v38 = vcombine.low %v3293_v16, %v3297_v60  ;;  %v8193_v6 = vcombine.high %v3300_v1, %v3304_v2  ;;  %v574_v16 = vsub.s32 3, %v9314_v44  ;;  %v3349_v60 = vld [vmem:[#allocation8 + $0x388] sm:$0xff]  ;;  %v8241_v1 = vcombine.high %v3348_v57, %v3352_v58 }
 0x220   :  { %6354 = vmatprep.subr.bf16.mxu0 %v8145_v7  ;;  %6518 = vmatprep.subr.bf16.mxu1 %v8147_v56  ;;  %v8195_v7 = vcombine.high %v3301_v3, %v3305_v0  ;;  %v3308_v56 = vld [vmem:[#allocation8 + $0x240] sm:$0xff] }
 0x221   :  { %v9411_v19 = vpop.f32.mrb[0].mxu0  ;;  %v9413_v22 = vpop.f32.mrb[0].mxu1 }
 0x222   :  { %v2723_v47 = vpop.f32.mrb[1].mxu0  ;;  %v9415_v27 = vpop.f32.mrb[1].mxu1 }
 0x223   :  { %6355 = vmatpush1.bf16.msra.mxu0 %v8144_v15  ;;  %v8794_v26 = vadd.f32 %v2723_v47, %v567_v12  ;;  %v2725_v28 = vpop.f32.mrb[2].mxu0  ;;  %6519 = vmatpush1.bf16.msra.mxu1 %v8146_v17  ;;  %v2889_v30 = vpop.f32.mrb[2].mxu1  ;;  %v8194_v15 = vcombine.low %v3301_v3, %v3305_v0  ;;  %v8201_v12 = vcombine.high %v3308_v56, %v3312_v10  ;;  %v3356_v3 = vld [vmem:[#allocation8 + $0x3c0] sm:$0xff] }
 0x224   :  { %v2726_v32 = vpop.f32.mrb[3].mxu0  ;;  %6356 = vmatprep.subr.bf16.mxu0 %v8153_v18  ;;  %v2890_v36 = vpop.f32.mrb[3].mxu1  ;;  %6520 = vmatprep.subr.bf16.mxu1 %v8155_v59  ;;  %v8203_v17 = vcombine.high %v3309_v11, %v3313_v13  ;;  %v3316_v18 = vld [vmem:[#allocation8 + $0x280] sm:$0xff]  ;;  %v8200_v47 = vcombine.low %v3308_v56, %v3312_v10  ;;  %v3325_v30 = vld [vmem:[#allocation8 + $0x2c8] sm:$0xff] }
 0x225   :  { %v3221_v63 = vmax.f32 %v8794_v26, 0.0  ;;  %v3320_v59 = vld [vmem:[#allocation8 + $0x2a0] sm:$0xff]  ;;  %v8211_v26 = vcombine.high %v3317_v20, %v3321_v21  ;;  %v3329_v32 = vld [vmem:[#allocation8 + $0x2e8] sm:$0xff] }
 0x226   :  { %v8209_v24 = vcombine.high %v3316_v18, %v3320_v59  ;;  %v3324_v28 = vld [vmem:[#allocation8 + $0x2c0] sm:$0xff]  ;;  %v8219_v36 = vcombine.high %v3325_v30, %v3329_v32 }
 0x227   :  { %v9417_v43 = vpack.c.bf16 %v3221_v63, %v3221_v63  ;;  %6357 = vmatpush1.bf16.msra.mxu0 %v8152_v29  ;;  %6521 = vmatpush1.bf16.msra.mxu1 %v8154_v33  ;;  %v3328_v29 = vld [vmem:[#allocation8 + $0x2e0] sm:$0xff]  ;;  %v8208_v33 = vcombine.low %v3316_v18, %v3320_v59  ;;  %v3369_v18 = vld [vmem:[#allocation8 + $0x428] sm:$0xff] }
 0x228   :  { %6358 = vmatprep.subr.bf16.mxu0 %v8161_v34  ;;  %6522 = vmatprep.subr.bf16.mxu1 %v8163_v37  ;;  %v8210_v34 = vcombine.low %v3317_v20, %v3321_v21  ;;  %v8217_v63 = vcombine.high %v3324_v28, %v3328_v29  ;;  %v3332_v37 = vld [vmem:[#allocation8 + $0x300] sm:$0xff]  ;;  %v8216_v42 = vcombine.low %v3324_v28, %v3328_v29  ;;  %v3373_v29 = vld [vmem:[#allocation8 + $0x448] sm:$0xff] }
 0x229   :  { %6382 = vmatprep.mubr.bf16.mxu0 %v9417_v43  ;;  %6546 = vmatprep.mubr.bf16.mxu1 %v9417_v43  ;;  %v8224_v50 = vcombine.low %v3332_v37, %v3336_v39  ;;  %v3360_v0 = vld [vmem:[#allocation8 + $0x3e0] sm:$0xff] }
 0x22a   :  { %v8249_v11 = vcombine.high %v3356_v3, %v3360_v0  ;;  %v8248_v59 = vcombine.low %v3356_v3, %v3360_v0  ;;  %v3405_v3 = vld [vmem:[#allocation8 + $0x548] sm:$0xff] }
 0x22b   :  { %6359 = vmatpush1.bf16.msra.mxu0 %v8160_v9  ;;  %6523 = vmatpush1.bf16.msra.mxu1 %v8162_v45  ;;  %v8218_v9 = vcombine.low %v3325_v30, %v3329_v32  ;;  %v8225_v45 = vcombine.high %v3332_v37, %v3336_v39  ;;  %v3377_v30 = vld [vmem:[#allocation8 + $0x468] sm:$0xff] }
 0x22c   :  { %6360 = vmatprep.subr.bf16.mxu0 %v8169_v46  ;;  %6524 = vmatprep.subr.bf16.mxu1 %v8171_v49  ;;  %v8227_v46 = vcombine.high %v3333_v40, %v3337_v41  ;;  %v3340_v49 = vld [vmem:[#allocation8 + $0x340] sm:$0xff]  ;;  %v8267_v37 = vcombine.high %v3373_v29, %v3377_v30  ;;  %v3381_v39 = vld [vmem:[#allocation8 + $0x488] sm:$0xff] }
 0x22d   :  { %v3409_v0 = vld [vmem:[#allocation8 + $0x568] sm:$0xff] }
 0x22f   :  { %6361 = vmatpush1.bf16.msra.mxu0 %v8168_v51  ;;  %6525 = vmatpush1.bf16.msra.mxu1 %v8170_v52  ;;  %v562_v51 = vsub.s32 0, %v9314_v44  ;;  %v8226_v52 = vcombine.low %v3333_v40, %v3337_v41  ;;  %v3385_v40 = vld [vmem:[#allocation8 + $0x4a8] sm:$0xff] }
 0x230   :  { %6362 = vmatprep.subr.bf16.mxu0 %v8177_v54  ;;  %6526 = vmatprep.subr.bf16.mxu1 %v8179_v55  ;;  %v8233_v54 = vcombine.high %v3340_v49, %v3344_v53  ;;  %v8235_v55 = vcombine.high %v3341_v31, %v3345_v25 }
 0x233   :  { %6363 = vmatpush1.bf16.msra.mxu0 %v8176_v35  ;;  %6527 = vmatpush1.bf16.msra.mxu1 %v8178_v61  ;;  %v3353_v35 = vld [vmem:[#allocation8 + $0x3a8] sm:$0xff]  ;;  %v8232_v61 = vcombine.low %v3340_v49, %v3344_v53  ;;  %v3392_v49 = vld [vmem:[#allocation8 + $0x4e0] sm:$0xff] }
 0x234   :  { %6364 = vmatprep.subr.bf16.mxu0 %v8185_v48  ;;  %6528 = vmatprep.subr.bf16.mxu1 %v8187_v62  ;;  %v563_v48 = vrot.slane %v9406_v8, %v562_v51  ;;  %v8234_v62 = vcombine.low %v3341_v31, %v3345_v25  ;;  %v8243_v2 = vcombine.high %v3349_v60, %v3353_v35  ;;  %v3389_v53 = vld [vmem:[#allocation8 + $0x4c8] sm:$0xff] }
 0x235   :  { %v8242_v10 = vcombine.low %v3349_v60, %v3353_v35  ;;  %v3393_v31 = vld [vmem:[#allocation8 + $0x4e8] sm:$0xff] }
 0x236   :  { %v8793_v56 = vadd.f32 %v9411_v19, %v563_v48  ;;  %v3401_v60 = vld [vmem:[#allocation8 + $0x528] sm:$0xff] }
 0x237   :  { %6365 = vmatpush1.bf16.msra.mxu0 %v8184_v4  ;;  %6529 = vmatpush1.bf16.msra.mxu1 %v8186_v38  ;;  %v575_v4 = vrot.slane %v9406_v8, %v574_v16  ;;  %v3357_v38 = vld [vmem:[#allocation8 + $0x3c8] sm:$0xff] }
 0x238   :  { %6366 = vmatprep.subr.bf16.mxu0 %v8193_v6  ;;  %6530 = vmatprep.subr.bf16.mxu1 %v8195_v7  ;;  %v3361_v6 = vld [vmem:[#allocation8 + $0x3e8] sm:$0xff]  ;;  %v8240_v7 = vcombine.low %v3348_v57, %v3352_v58  ;;  %v3220_v20 = vmax.f32 %v8793_v56, 0.0  ;;  %v3400_v57 = vld [vmem:[#allocation8 + $0x520] sm:$0xff] }
 0x239   :  { %v8251_v13 = vcombine.high %v3357_v38, %v3361_v6  ;;  %v8250_v21 = vcombine.low %v3357_v38, %v3361_v6  ;;  %v3397_v58 = vld [vmem:[#allocation8 + $0x508] sm:$0xff]  ;;  %v3412_v56 = vld [vmem:[#allocation8 + $0x580] sm:$0xff] }
 0x23a   :  { %v9431_v32 = vpack.c.bf16 %v3220_v20, %v3220_v20  ;;  %v8290_v38 = vcombine.low %v3397_v58, %v3401_v60  ;;  %v3421_v20 = vld [vmem:[#allocation8 + $0x5c8] sm:$0xff] }
 0x23b   :  { %6367 = vmatpush1.bf16.msra.mxu0 %v8192_v14  ;;  %6531 = vmatpush1.bf16.msra.mxu1 %v8194_v15  ;;  %v3364_v14 = vld [vmem:[#allocation8 + $0x400] sm:$0xff] }
 0x23c   :  { %6368 = vmatprep.subr.bf16.mxu0 %v8201_v12  ;;  %6532 = vmatprep.subr.bf16.mxu1 %v8203_v17  ;;  %v3368_v15 = vld [vmem:[#allocation8 + $0x420] sm:$0xff]  ;;  %v8796_v12 = vadd.f32 %v9415_v27, %v575_v4  ;;  %v3365_v17 = vld [vmem:[#allocation8 + $0x408] sm:$0xff] }
 0x23d   :  { %v8259_v19 = vcombine.high %v3365_v17, %v3369_v18  ;;  %v8256_v28 = vcombine.low %v3364_v14, %v3368_v15  ;;  %v8258_v27 = vcombine.low %v3365_v17, %v3369_v18  ;;  %v3420_v18 = vld [vmem:[#allocation8 + $0x5c0] sm:$0xff] }
 0x23f   :  { %6369 = vmatpush1.bf16.msra.mxu0 %v8200_v47  ;;  %6533 = vmatpush1.bf16.msra.mxu1 %v8202_v23  ;;  %v8257_v47 = vcombine.high %v3364_v14, %v3368_v15  ;;  %v3223_v23 = vmax.f32 %v8796_v12, 0.0  ;;  %v8298_v15 = vcombine.low %v3405_v3, %v3409_v0 }
 0x240   :  { %6370 = vmatprep.subr.bf16.mxu0 %v8209_v24  ;;  %6534 = vmatprep.subr.bf16.mxu1 %v8211_v26  ;;  %v3372_v24 = vld [vmem:[#allocation8 + $0x440] sm:$0xff] }
 0x241   :  { %v3376_v26 = vld [vmem:[#allocation8 + $0x460] sm:$0xff] }
 0x242   :  { %v8264_v41 = vcombine.low %v3372_v24, %v3376_v26 }
 0x243   :  { %6371 = vmatpush1.bf16.msra.mxu0 %v8208_v33  ;;  %6535 = vmatpush1.bf16.msra.mxu1 %v8210_v34  ;;  %v8265_v33 = vcombine.high %v3372_v24, %v3376_v26  ;;  %v3380_v34 = vld [vmem:[#allocation8 + $0x480] sm:$0xff] }
 0x244   :  { %6372 = vmatprep.subr.bf16.mxu0 %v8217_v63  ;;  %6536 = vmatprep.subr.bf16.mxu1 %v8219_v36  ;;  %v3384_v63 = vld [vmem:[#allocation8 + $0x4a0] sm:$0xff]  ;;  %v9433_v36 = vpack.c.bf16 %v3223_v23, %v3223_v23 }
 0x245   :  { %v8272_v25 = vcombine.low %v3380_v34, %v3384_v63  ;;  %v3428_v26 = vld [vmem:[#allocation8 + $0x600] sm:$0xff] }
 0x247   :  { %6373 = vmatpush1.bf16.msra.mxu0 %v8216_v42  ;;  %6537 = vmatpush1.bf16.msra.mxu1 %v8218_v9  ;;  %v8266_v42 = vcombine.low %v3373_v29, %v3377_v30  ;;  %v8273_v9 = vcombine.high %v3380_v34, %v3384_v63  ;;  %v3429_v29 = vld [vmem:[#allocation8 + $0x608] sm:$0xff] }
 0x248   :  { %6374 = vmatprep.subr.bf16.mxu0 %v8225_v45  ;;  %6538 = vmatprep.subr.bf16.mxu1 %v8227_v46  ;;  %v8275_v45 = vcombine.high %v3381_v39, %v3385_v40  ;;  %v3388_v46 = vld [vmem:[#allocation8 + $0x4c0] sm:$0xff]  ;;  %v3433_v30 = vld [vmem:[#allocation8 + $0x628] sm:$0xff] }
 0x249   :  { %v8280_v35 = vcombine.low %v3388_v46, %v3392_v49  ;;  %v8323_v63 = vcombine.high %v3429_v29, %v3433_v30 }
 0x24b   :  { %6375 = vmatpush1.bf16.msra.mxu0 %v8224_v50  ;;  %6539 = vmatpush1.bf16.msra.mxu1 %v8226_v52  ;;  %v8274_v50 = vcombine.low %v3381_v39, %v3385_v40  ;;  %v8281_v52 = vcombine.high %v3388_v46, %v3392_v49  ;;  %v3440_v39 = vld [vmem:[#allocation8 + $0x660] sm:$0xff]  ;;  %v3437_v40 = vld [vmem:[#allocation8 + $0x648] sm:$0xff] }
 0x24c   :  { %6376 = vmatprep.subr.bf16.mxu0 %v8233_v54  ;;  %6540 = vmatprep.subr.bf16.mxu1 %v8235_v55  ;;  %v8283_v54 = vcombine.high %v3389_v53, %v3393_v31  ;;  %v3396_v55 = vld [vmem:[#allocation8 + $0x500] sm:$0xff] }
 0x24d   :  { %v8289_v48 = vcombine.high %v3396_v55, %v3400_v57  ;;  %v8288_v4 = vcombine.low %v3396_v55, %v3400_v57  ;;  %v3444_v49 = vld [vmem:[#allocation8 + $0x680] sm:$0xff] }
 0x24e   :  { %v3452_v57 = vld [vmem:[#allocation8 + $0x6c0] sm:$0xff] }
 0x24f   :  { %6377 = vmatpush1.bf16.msra.mxu0 %v8232_v61  ;;  %6541 = vmatpush1.bf16.msra.mxu1 %v8234_v62  ;;  %v8282_v61 = vcombine.low %v3389_v53, %v3393_v31  ;;  %v8291_v62 = vcombine.high %v3397_v58, %v3401_v60  ;;  %v3448_v53 = vld [vmem:[#allocation8 + $0x6a0] sm:$0xff]  ;;  %v3445_v31 = vld [vmem:[#allocation8 + $0x688] sm:$0xff] }
 0x250   :  { %6378 = vmatprep.subr.bf16.mxu0 %v8241_v1  ;;  %6542 = vmatprep.subr.bf16.mxu1 %v8243_v2  ;;  %v3404_v1 = vld [vmem:[#allocation8 + $0x540] sm:$0xff]  ;;  %v3453_v60 = vld [vmem:[#allocation8 + $0x6c8] sm:$0xff] }
 0x251   :  { %v3408_v2 = vld [vmem:[#allocation8 + $0x560] sm:$0xff] }
 0x252   :  { %v8297_v6 = vcombine.high %v3404_v1, %v3408_v2  ;;  %v8296_v14 = vcombine.low %v3404_v1, %v3408_v2  ;;  %v3456_v58 = vld [vmem:[#allocation8 + $0x6e0] sm:$0xff] }
 0x253   :  { %6379 = vmatpush1.bf16.msra.mxu0 %v8240_v7  ;;  %6543 = vmatpush1.bf16.msra.mxu1 %v8242_v10  ;;  %v8299_v7 = vcombine.high %v3405_v3, %v3409_v0  ;;  %v3416_v10 = vld [vmem:[#allocation8 + $0x5a0] sm:$0xff]  ;;  %v3461_v0 = vld [vmem:[#allocation8 + $0x708] sm:$0xff] }
 0x254   :  { %6380 = vmatprep.subr.bf16.mxu0 %v8249_v11  ;;  %6544 = vmatprep.subr.bf16.mxu1 %v8251_v13  ;;  %v3413_v11 = vld [vmem:[#allocation8 + $0x588] sm:$0xff]  ;;  %v8305_v12 = vcombine.high %v3412_v56, %v3416_v10  ;;  %v3460_v2 = vld [vmem:[#allocation8 + $0x700] sm:$0xff] }
 0x255   :  { %v3417_v13 = vld [vmem:[#allocation8 + $0x5a8] sm:$0xff]  ;;  %v3464_v3 = vld [vmem:[#allocation8 + $0x720] sm:$0xff] }
 0x256   :  { %v8307_v17 = vcombine.high %v3413_v11, %v3417_v13 }
 0x257   :  { %6381 = vmatpush1.bf16.msra.mxu0 %v8248_v59  ;;  %6545 = vmatpush1.bf16.msra.mxu1 %v8250_v21  ;;  %v3424_v59 = vld [vmem:[#allocation8 + $0x5e0] sm:$0xff]  ;;  %v3425_v21 = vld [vmem:[#allocation8 + $0x5e8] sm:$0xff] }
 0x258   :  { %6391 = vmatprep.subr.bf16.mxu0 %v8257_v47  ;;  %6555 = vmatprep.subr.bf16.mxu1 %v8259_v19  ;;  %v8304_v47 = vcombine.low %v3412_v56, %v3416_v10  ;;  %v8306_v19 = vcombine.low %v3413_v11, %v3417_v13  ;;  %v8313_v23 = vcombine.high %v3420_v18, %v3424_v59  ;;  %v3468_v10 = vld [vmem:[#allocation8 + $0x740] sm:$0xff]  ;;  %v3469_v13 = vld [vmem:[#allocation8 + $0x748] sm:$0xff] }
 0x259   :  { %v8315_v24 = vcombine.high %v3421_v20, %v3425_v21  ;;  %v3472_v11 = vld [vmem:[#allocation8 + $0x760] sm:$0xff] }
 0x25a   :  { %6383 = vmatmul.mubr.bf16.vlgmr.msra.gmra.mrb[8].mxu0 %v9431_v32  ;;  %6547 = vmatmul.mubr.bf16.vlgmr.msra.gmra.mrb[8].mxu1 %v9431_v32 }
 0x25b   :  { %6392 = vmatpush1.bf16.msra.mxu0 %v8256_v28  ;;  %6423 = vmatprep.mubr.bf16.mxu0 %v9433_v36  ;;  %v3432_v28 = vld [vmem:[#allocation8 + $0x620] sm:$0xff] }
 0x25c   :  { %6556 = vmatpush1.bf16.msra.mxu1 %v8258_v27  ;;  %6587 = vmatprep.mubr.bf16.mxu1 %v9433_v36  ;;  %v8312_v27 = vcombine.low %v3420_v18, %v3424_v59  ;;  %v8321_v34 = vcombine.high %v3428_v26, %v3432_v28  ;;  %v8361_v18 = vcombine.high %v3468_v10, %v3472_v11 }
 0x25d   :  { %6393 = vmatprep.subr.bf16.mxu0 %v8265_v33  ;;  %6557 = vmatprep.subr.bf16.mxu1 %v8267_v37  ;;  %v8314_v33 = vcombine.low %v3421_v20, %v3425_v21  ;;  %v3436_v37 = vld [vmem:[#allocation8 + $0x640] sm:$0xff] }
 0x25e   :  { %v3476_v20 = vld [vmem:[#allocation8 + $0x780] sm:$0xff] }
 0x25f   :  { %6394 = vmatpush1.bf16.msra.mxu0 %v8264_v41  ;;  %v3441_v41 = vld [vmem:[#allocation8 + $0x668] sm:$0xff]  ;;  %v3480_v21 = vld [vmem:[#allocation8 + $0x7a0] sm:$0xff] }
 0x260   :  { %6558 = vmatpush1.bf16.msra.mxu1 %v8266_v42  ;;  %6395 = vmatprep.subr.bf16.mxu0 %v8273_v9  ;;  %v8320_v42 = vcombine.low %v3428_v26, %v3432_v28  ;;  %v8322_v9 = vcombine.low %v3429_v29, %v3433_v30  ;;  %v8331_v46 = vcombine.high %v3437_v40, %v3441_v41  ;;  %v3484_v30 = vld [vmem:[#allocation8 + $0x7c0] sm:$0xff] }
 0x261   :  { %6559 = vmatprep.subr.bf16.mxu1 %v8275_v45  ;;  %v8329_v45 = vcombine.high %v3436_v37, %v3440_v39  ;;  %v8369_v28 = vcombine.high %v3476_v20, %v3480_v21 }
 0x263   :  { %6396 = vmatpush1.bf16.msra.mxu0 %v8272_v25  ;;  %v3449_v25 = vld [vmem:[#allocation8 + $0x6a8] sm:$0xff] }
 0x264   :  { %6560 = vmatpush1.bf16.msra.mxu1 %v8274_v50  ;;  %6397 = vmatprep.subr.bf16.mxu0 %v8281_v52  ;;  %v8328_v50 = vcombine.low %v3436_v37, %v3440_v39  ;;  %v8330_v52 = vcombine.low %v3437_v40, %v3441_v41  ;;  %v8339_v55 = vcombine.high %v3445_v31, %v3449_v25  ;;  %v3492_v41 = vld [vmem:[#allocation8 + $0x800] sm:$0xff] }
 0x265   :  { %6561 = vmatprep.subr.bf16.mxu1 %v8283_v54  ;;  %v8337_v54 = vcombine.high %v3444_v49, %v3448_v53 }
 0x267   :  { %6398 = vmatpush1.bf16.msra.mxu0 %v8280_v35  ;;  %v3457_v35 = vld [vmem:[#allocation8 + $0x6e8] sm:$0xff] }
 0x268   :  { %6562 = vmatpush1.bf16.msra.mxu1 %v8282_v61  ;;  %6399 = vmatprep.subr.bf16.mxu0 %v8289_v48  ;;  %v8336_v61 = vcombine.low %v3444_v49, %v3448_v53  ;;  %v8338_v48 = vcombine.low %v3445_v31, %v3449_v25  ;;  %v8347_v1 = vcombine.high %v3453_v60, %v3457_v35 }
 0x269   :  { %6563 = vmatprep.subr.bf16.mxu1 %v8291_v62  ;;  %v8345_v62 = vcombine.high %v3452_v57, %v3456_v58 }
 0x26b   :  { %6400 = vmatpush1.bf16.msra.mxu0 %v8288_v4  ;;  %v3465_v4 = vld [vmem:[#allocation8 + $0x728] sm:$0xff] }
 0x26c   :  { %6564 = vmatpush1.bf16.msra.mxu1 %v8290_v38  ;;  %6401 = vmatprep.subr.bf16.mxu0 %v8297_v6  ;;  %v8344_v38 = vcombine.low %v3452_v57, %v3456_v58  ;;  %v8346_v6 = vcombine.low %v3453_v60, %v3457_v35  ;;  %v8355_v56 = vcombine.high %v3461_v0, %v3465_v4 }
 0x26d   :  { %6565 = vmatprep.subr.bf16.mxu1 %v8299_v7  ;;  %v8353_v7 = vcombine.high %v3460_v2, %v3464_v3 }
 0x26f   :  { %6402 = vmatpush1.bf16.msra.mxu0 %v8296_v14  ;;  %v3473_v14 = vld [vmem:[#allocation8 + $0x768] sm:$0xff] }
 0x270   :  { %6566 = vmatpush1.bf16.msra.mxu1 %v8298_v15  ;;  %6403 = vmatprep.subr.bf16.mxu0 %v8305_v12  ;;  %v8352_v15 = vcombine.low %v3460_v2, %v3464_v3  ;;  %v570_v12 = vsub.s32 2, %v9314_v44  ;;  %v8363_v59 = vcombine.high %v3469_v13, %v3473_v14  ;;  %v8362_v26 = vcombine.low %v3469_v13, %v3473_v14 }
 0x271   :  { %6567 = vmatprep.subr.bf16.mxu1 %v8307_v17  ;;  %v8354_v17 = vcombine.low %v3461_v0, %v3465_v4 }
 0x273   :  { %6404 = vmatpush1.bf16.msra.mxu0 %v8304_v47  ;;  %v3477_v47 = vld [vmem:[#allocation8 + $0x788] sm:$0xff] }
 0x274   :  { %6568 = vmatpush1.bf16.msra.mxu1 %v8306_v19  ;;  %6405 = vmatprep.subr.bf16.mxu0 %v8313_v23  ;;  %v3481_v19 = vld [vmem:[#allocation8 + $0x7a8] sm:$0xff]  ;;  %v8360_v23 = vcombine.low %v3468_v10, %v3472_v11 }
 0x275   :  { %6569 = vmatprep.subr.bf16.mxu1 %v8315_v24  ;;  %v571_v24 = vrot.slane %v9406_v8, %v570_v12  ;;  %v8371_v29 = vcombine.high %v3477_v47, %v3481_v19  ;;  %v8370_v39 = vcombine.low %v3477_v47, %v3481_v19 }
 0x277   :  { %6406 = vmatpush1.bf16.msra.mxu0 %v8312_v27  ;;  %v3488_v27 = vld [vmem:[#allocation8 + $0x7e0] sm:$0xff]  ;;  %v8795_v37 = vadd.f32 %v9413_v22, %v571_v24 }
 0x278   :  { %6570 = vmatpush1.bf16.msra.mxu1 %v8314_v33  ;;  %6407 = vmatprep.subr.bf16.mxu0 %v8321_v34  ;;  %v3485_v33 = vld [vmem:[#allocation8 + $0x7c8] sm:$0xff]  ;;  %v8377_v40 = vcombine.high %v3484_v30, %v3488_v27  ;;  %v3500_v22 = vld [vmem:[#allocation8 + $0x840] sm:$0xff] }
 0x279   :  { %6571 = vmatprep.subr.bf16.mxu1 %v8323_v63  ;;  %v3489_v34 = vld [vmem:[#allocation8 + $0x7e8] sm:$0xff]  ;;  %v8368_v63 = vcombine.low %v3476_v20, %v3480_v21  ;;  %v3222_v49 = vmax.f32 %v8795_v37, 0.0  ;;  %v3536_v24 = vld [vmem:[#allocation8 + $0x960] sm:$0xff] }
 0x27a   :  { %v8379_v8 = vcombine.high %v3485_v33, %v3489_v34  ;;  %v8378_v53 = vcombine.low %v3485_v33, %v3489_v34  ;;  %v3540_v34 = vld [vmem:[#allocation8 + $0x980] sm:$0xff]  ;;  %v3541_v37 = vld [vmem:[#allocation8 + $0x988] sm:$0xff] }
 0x27b   :  { %6408 = vmatpush1.bf16.msra.mxu0 %v8320_v42  ;;  %v3496_v42 = vld [vmem:[#allocation8 + $0x820] sm:$0xff]  ;;  %v9444_v57 = vpack.c.bf16 %v3222_v49, %v3222_v49  ;;  %v3553_v49 = vld [vmem:[#allocation8 + $0x9e8] sm:$0xff] }
 0x27c   :  { %6572 = vmatpush1.bf16.msra.mxu1 %v8322_v9  ;;  %6409 = vmatprep.subr.bf16.mxu0 %v8329_v45  ;;  %v3493_v9 = vld [vmem:[#allocation8 + $0x808] sm:$0xff]  ;;  %v8385_v31 = vcombine.high %v3492_v41, %v3496_v42 }
 0x27d   :  { %6573 = vmatprep.subr.bf16.mxu1 %v8331_v46  ;;  %v3497_v45 = vld [vmem:[#allocation8 + $0x828] sm:$0xff]  ;;  %v8376_v46 = vcombine.low %v3484_v30, %v3488_v27 }
 0x27e   :  { %v8387_v25 = vcombine.high %v3493_v9, %v3497_v45  ;;  %v8386_v58 = vcombine.low %v3493_v9, %v3497_v45  ;;  %v3548_v9 = vld [vmem:[#allocation8 + $0x9c0] sm:$0xff] }
 0x27f   :  { %6410 = vmatpush1.bf16.msra.mxu0 %v8328_v50  ;;  %v3504_v50 = vld [vmem:[#allocation8 + $0x860] sm:$0xff] }
 0x280   :  { %6574 = vmatpush1.bf16.msra.mxu1 %v8330_v52  ;;  %6411 = vmatprep.subr.bf16.mxu0 %v8337_v54  ;;  %v3501_v52 = vld [vmem:[#allocation8 + $0x848] sm:$0xff]  ;;  %v8393_v60 = vcombine.high %v3500_v22, %v3504_v50  ;;  %v8392_v2 = vcombine.low %v3500_v22, %v3504_v50  ;;  %v3552_v45 = vld [vmem:[#allocation8 + $0x9e0] sm:$0xff] }
 0x281   :  { %6575 = vmatprep.subr.bf16.mxu1 %v8339_v55  ;;  %v3505_v54 = vld [vmem:[#allocation8 + $0x868] sm:$0xff]  ;;  %v8384_v55 = vcombine.low %v3492_v41, %v3496_v42  ;;  %v3556_v50 = vld [vmem:[#allocation8 + $0xa00] sm:$0xff] }
 0x282   :  { %v8395_v35 = vcombine.high %v3501_v52, %v3505_v54  ;;  %v8394_v3 = vcombine.low %v3501_v52, %v3505_v54  ;;  %v3560_v52 = vld [vmem:[#allocation8 + $0xa20] sm:$0xff]  ;;  %v3557_v54 = vld [vmem:[#allocation8 + $0xa08] sm:$0xff] }
 0x283   :  { %6412 = vmatpush1.bf16.msra.mxu0 %v8336_v61  ;;  %v3508_v61 = vld [vmem:[#allocation8 + $0x880] sm:$0xff] }
 0x284   :  { %6576 = vmatpush1.bf16.msra.mxu1 %v8338_v48  ;;  %6413 = vmatprep.subr.bf16.mxu0 %v8345_v62  ;;  %v3512_v48 = vld [vmem:[#allocation8 + $0x8a0] sm:$0xff]  ;;  %v3509_v62 = vld [vmem:[#allocation8 + $0x888] sm:$0xff] }
 0x285   :  { %6577 = vmatprep.subr.bf16.mxu1 %v8347_v1  ;;  %v3513_v1 = vld [vmem:[#allocation8 + $0x8a8] sm:$0xff]  ;;  %v8401_v0 = vcombine.high %v3508_v61, %v3512_v48  ;;  %v8400_v10 = vcombine.low %v3508_v61, %v3512_v48  ;;  %v3564_v48 = vld [vmem:[#allocation8 + $0xa40] sm:$0xff] }
 0x286   :  { %v8403_v4 = vcombine.high %v3509_v62, %v3513_v1  ;;  %v8402_v11 = vcombine.low %v3509_v62, %v3513_v1  ;;  %v3568_v62 = vld [vmem:[#allocation8 + $0xa60] sm:$0xff]  ;;  %v3565_v1 = vld [vmem:[#allocation8 + $0xa48] sm:$0xff] }
 0x287   :  { %6414 = vmatpush1.bf16.msra.mxu0 %v8344_v38  ;;  %v3516_v38 = vld [vmem:[#allocation8 + $0x8c0] sm:$0xff] }
 0x288   :  { %6578 = vmatpush1.bf16.msra.mxu1 %v8346_v6  ;;  %6415 = vmatprep.subr.bf16.mxu0 %v8353_v7  ;;  %v3520_v6 = vld [vmem:[#allocation8 + $0x8e0] sm:$0xff]  ;;  %v3517_v7 = vld [vmem:[#allocation8 + $0x8c8] sm:$0xff] }
 0x289   :  { %6579 = vmatprep.subr.bf16.mxu1 %v8355_v56  ;;  %v3521_v56 = vld [vmem:[#allocation8 + $0x8e8] sm:$0xff]  ;;  %v8409_v13 = vcombine.high %v3516_v38, %v3520_v6  ;;  %v8408_v20 = vcombine.low %v3516_v38, %v3520_v6  ;;  %v3572_v6 = vld [vmem:[#allocation8 + $0xa80] sm:$0xff] }
 0x28a   :  { %v8411_v14 = vcombine.high %v3517_v7, %v3521_v56  ;;  %v8410_v21 = vcombine.low %v3517_v7, %v3521_v56  ;;  %v3576_v7 = vld [vmem:[#allocation8 + $0xaa0] sm:$0xff]  ;;  %v3573_v56 = vld [vmem:[#allocation8 + $0xa88] sm:$0xff] }
 0x28b   :  { %6416 = vmatpush1.bf16.msra.mxu0 %v8352_v15  ;;  %v3524_v15 = vld [vmem:[#allocation8 + $0x900] sm:$0xff] }
 0x28c   :  { %6580 = vmatpush1.bf16.msra.mxu1 %v8354_v17  ;;  %6417 = vmatprep.subr.bf16.mxu0 %v8361_v18  ;;  %v3528_v17 = vld [vmem:[#allocation8 + $0x920] sm:$0xff]  ;;  %v3525_v18 = vld [vmem:[#allocation8 + $0x908] sm:$0xff] }
 0x28d   :  { %6581 = vmatprep.subr.bf16.mxu1 %v8363_v59  ;;  %v3529_v59 = vld [vmem:[#allocation8 + $0x928] sm:$0xff]  ;;  %v8417_v47 = vcombine.high %v3524_v15, %v3528_v17 }
 0x28e   :  { %v8419_v19 = vcombine.high %v3525_v18, %v3529_v59  ;;  %v8418_v30 = vcombine.low %v3525_v18, %v3529_v59  ;;  %v3584_v18 = vld [vmem:[#allocation8 + $0xae0] sm:$0xff]  ;;  %v3581_v59 = vld [vmem:[#allocation8 + $0xac8] sm:$0xff] }
 0x28f   :  { %6418 = vmatpush1.bf16.msra.mxu0 %v8360_v23  ;;  %v3532_v23 = vld [vmem:[#allocation8 + $0x940] sm:$0xff] }
 0x290   :  { %6582 = vmatpush1.bf16.msra.mxu1 %v8362_v26  ;;  %6419 = vmatprep.subr.bf16.mxu0 %v8369_v28  ;;  %v3533_v26 = vld [vmem:[#allocation8 + $0x948] sm:$0xff]  ;;  %v8425_v27 = vcombine.high %v3532_v23, %v3536_v24 }
 0x291   :  { %6583 = vmatprep.subr.bf16.mxu1 %v8371_v29  ;;  %v3537_v28 = vld [vmem:[#allocation8 + $0x968] sm:$0xff]  ;;  %v8416_v29 = vcombine.low %v3524_v15, %v3528_v17  ;;  %v3580_v17 = vld [vmem:[#allocation8 + $0xac0] sm:$0xff] }
 0x292   :  { %v8427_v33 = vcombine.high %v3533_v26, %v3537_v28 }
 0x293   :  { %6420 = vmatpush1.bf16.msra.mxu0 %v8368_v63  ;;  %v3544_v63 = vld [vmem:[#allocation8 + $0x9a0] sm:$0xff] }
 0x294   :  { %6584 = vmatpush1.bf16.msra.mxu1 %v8370_v39  ;;  %6421 = vmatprep.subr.bf16.mxu0 %v8377_v40  ;;  %v3545_v39 = vld [vmem:[#allocation8 + $0x9a8] sm:$0xff]  ;;  %v8424_v40 = vcombine.low %v3532_v23, %v3536_v24  ;;  %v8433_v41 = vcombine.high %v3540_v34, %v3544_v63  ;;  %v3588_v24 = vld [vmem:[#allocation8 + $0xb00] sm:$0xff] }
 0x295   :  { %6585 = vmatprep.subr.bf16.mxu1 %v8379_v8  ;;  %v8426_v8 = vcombine.low %v3533_v26, %v3537_v28  ;;  %v8435_v42 = vcombine.high %v3541_v37, %v3545_v39  ;;  %v3592_v26 = vld [vmem:[#allocation8 + $0xb20] sm:$0xff]  ;;  %v3589_v28 = vld [vmem:[#allocation8 + $0xb08] sm:$0xff] }
 0x297   :  { %6422 = vmatpush1.bf16.msra.mxu0 %v8376_v46  ;;  %v3549_v46 = vld [vmem:[#allocation8 + $0x9c8] sm:$0xff] }
 0x298   :  { %6586 = vmatpush1.bf16.msra.mxu1 %v8378_v53  ;;  %6432 = vmatprep.subr.bf16.mxu0 %v8385_v31  ;;  %v8432_v53 = vcombine.low %v3540_v34, %v3544_v63  ;;  %v8434_v31 = vcombine.low %v3541_v37, %v3545_v39  ;;  %v8443_v22 = vcombine.high %v3549_v46, %v3553_v49  ;;  %v3596_v63 = vld [vmem:[#allocation8 + $0xb40] sm:$0xff]  ;;  %v3597_v39 = vld [vmem:[#allocation8 + $0xb48] sm:$0xff] }
 0x299   :  { %6596 = vmatprep.subr.bf16.mxu1 %v8387_v25  ;;  %v8441_v25 = vcombine.high %v3548_v9, %v3552_v45  ;;  %v3600_v37 = vld [vmem:[#allocation8 + $0xb60] sm:$0xff] }
 0x29a   :  { %6424 = vmatmul.mubr.bf16.vlgmr.msra.gmra.mrb[8].mxu0 %v9444_v57 }
 0x29b   :  { %6588 = vmatmul.mubr.bf16.vlgmr.msra.gmra.mrb[8].mxu1 %v9444_v57  ;;  %6433 = vmatpush1.bf16.msra.mxu0 %v8384_v55  ;;  %v3561_v55 = vld [vmem:[#allocation8 + $0xa28] sm:$0xff] }
 0x29c   :  { %6597 = vmatpush1.bf16.msra.mxu1 %v8386_v58  ;;  %6434 = vmatprep.subr.bf16.mxu0 %v8393_v60  ;;  %v8440_v58 = vcombine.low %v3548_v9, %v3552_v45  ;;  %v8442_v60 = vcombine.low %v3549_v46, %v3553_v49  ;;  %v8451_v61 = vcombine.high %v3557_v54, %v3561_v55  ;;  %v3604_v45 = vld [vmem:[#allocation8 + $0xb80] sm:$0xff]  ;;  %v3605_v49 = vld [vmem:[#allocation8 + $0xb88] sm:$0xff] }
 0x29d   :  { %6598 = vmatprep.subr.bf16.mxu1 %v8395_v35  ;;  %v8449_v35 = vcombine.high %v3556_v50, %v3560_v52  ;;  %v3608_v46 = vld [vmem:[#allocation8 + $0xba0] sm:$0xff] }
 0x29f   :  { %6435 = vmatpush1.bf16.msra.mxu0 %v8392_v2  ;;  %v3569_v2 = vld [vmem:[#allocation8 + $0xa68] sm:$0xff] }
 0x2a0   :  { %6599 = vmatpush1.bf16.msra.mxu1 %v8394_v3  ;;  %6436 = vmatprep.subr.bf16.mxu0 %v8401_v0  ;;  %v8448_v3 = vcombine.low %v3556_v50, %v3560_v52  ;;  %v8450_v0 = vcombine.low %v3557_v54, %v3561_v55  ;;  %v8459_v38 = vcombine.high %v3565_v1, %v3569_v2  ;;  %v3612_v52 = vld [vmem:[#allocation8 + $0xbc0] sm:$0xff]  ;;  %v3613_v55 = vld [vmem:[#allocation8 + $0xbc8] sm:$0xff] }
 0x2a1   :  { %6600 = vmatprep.subr.bf16.mxu1 %v8403_v4  ;;  %v8457_v4 = vcombine.high %v3564_v48, %v3568_v62  ;;  %v3616_v54 = vld [vmem:[#allocation8 + $0xbe0] sm:$0xff] }
 0x2a3   :  { %6437 = vmatpush1.bf16.msra.mxu0 %v8400_v10  ;;  %v3577_v10 = vld [vmem:[#allocation8 + $0xaa8] sm:$0xff] }
 0x2a4   :  { %6601 = vmatpush1.bf16.msra.mxu1 %v8402_v11  ;;  %6438 = vmatprep.subr.bf16.mxu0 %v8409_v13  ;;  %v8456_v11 = vcombine.low %v3564_v48, %v3568_v62  ;;  %v8458_v13 = vcombine.low %v3565_v1, %v3569_v2  ;;  %v8467_v15 = vcombine.high %v3573_v56, %v3577_v10  ;;  %v3620_v62 = vld [vmem:[#allocation8 + $0xc00] sm:$0xff]  ;;  %v3621_v2 = vld [vmem:[#allocation8 + $0xc08] sm:$0xff] }
 0x2a5   :  { %6602 = vmatprep.subr.bf16.mxu1 %v8411_v14  ;;  %v8465_v14 = vcombine.high %v3572_v6, %v3576_v7  ;;  %v3624_v1 = vld [vmem:[#allocation8 + $0xc20] sm:$0xff] }
 0x2a7   :  { %6439 = vmatpush1.bf16.msra.mxu0 %v8408_v20  ;;  %v3585_v20 = vld [vmem:[#allocation8 + $0xae8] sm:$0xff] }
 0x2a8   :  { %6603 = vmatpush1.bf16.msra.mxu1 %v8410_v21  ;;  %6440 = vmatprep.subr.bf16.mxu0 %v8417_v47  ;;  %v8464_v21 = vcombine.low %v3572_v6, %v3576_v7  ;;  %v8466_v47 = vcombine.low %v3573_v56, %v3577_v10  ;;  %v8475_v23 = vcombine.high %v3581_v59, %v3585_v20  ;;  %v578_v7 = vsub.s32 4, %v9314_v44 }
 0x2a9   :  { %6604 = vmatprep.subr.bf16.mxu1 %v8419_v19  ;;  %v8473_v19 = vcombine.high %v3580_v17, %v3584_v18  ;;  %v582_v56 = vsub.s32 5, %v9314_v44  ;;  %v590_v10 = vsub.s32 7, %v9314_v44 }
 0x2ab   :  { %6441 = vmatpush1.bf16.msra.mxu0 %v8416_v29  ;;  %v3593_v29 = vld [vmem:[#allocation8 + $0xb28] sm:$0xff] }
 0x2ac   :  { %6605 = vmatpush1.bf16.msra.mxu1 %v8418_v30  ;;  %6442 = vmatprep.subr.bf16.mxu0 %v8425_v27  ;;  %v8472_v30 = vcombine.low %v3580_v17, %v3584_v18  ;;  %v8474_v27 = vcombine.low %v3581_v59, %v3585_v20  ;;  %v8483_v34 = vcombine.high %v3589_v28, %v3593_v29 }
 0x2ad   :  { %6606 = vmatprep.subr.bf16.mxu1 %v8427_v33  ;;  %v8481_v33 = vcombine.high %v3588_v24, %v3592_v26 }
 0x2af   :  { %6443 = vmatpush1.bf16.msra.mxu0 %v8424_v40  ;;  %v3601_v40 = vld [vmem:[#allocation8 + $0xb68] sm:$0xff] }
 0x2b0   :  { %6607 = vmatpush1.bf16.msra.mxu1 %v8426_v8  ;;  %6444 = vmatprep.subr.bf16.mxu0 %v8433_v41  ;;  %v8480_v8 = vcombine.low %v3588_v24, %v3592_v26  ;;  %v8482_v41 = vcombine.low %v3589_v28, %v3593_v29  ;;  %v8491_v9 = vcombine.high %v3597_v39, %v3601_v40 }
 0x2b1   :  { %6608 = vmatprep.subr.bf16.mxu1 %v8435_v42  ;;  %v8489_v42 = vcombine.high %v3596_v63, %v3600_v37 }
 0x2b3   :  { %6445 = vmatpush1.bf16.msra.mxu0 %v8432_v53  ;;  %v3609_v53 = vld [vmem:[#allocation8 + $0xba8] sm:$0xff] }
 0x2b4   :  { %6609 = vmatpush1.bf16.msra.mxu1 %v8434_v31  ;;  %6446 = vmatprep.subr.bf16.mxu0 %v8441_v25  ;;  %v8488_v31 = vcombine.low %v3596_v63, %v3600_v37  ;;  %v8490_v25 = vcombine.low %v3597_v39, %v3601_v40  ;;  %v8499_v50 = vcombine.high %v3605_v49, %v3609_v53  ;;  %v3629_v63 = vld [vmem:[#allocation8 + $0xc48] sm:$0xff] }
 0x2b5   :  { %6610 = vmatprep.subr.bf16.mxu1 %v8443_v22  ;;  %v8497_v22 = vcombine.high %v3604_v45, %v3608_v46  ;;  %v3633_v37 = vld [vmem:[#allocation8 + $0xc68] sm:$0xff]  ;;  %v8512_v40 = vcombine.low %v3620_v62, %v3624_v1 }
 0x2b7   :  { %6447 = vmatpush1.bf16.msra.mxu0 %v8440_v58  ;;  %v3617_v58 = vld [vmem:[#allocation8 + $0xbe8] sm:$0xff] }
 0x2b8   :  { %6611 = vmatpush1.bf16.msra.mxu1 %v8442_v60  ;;  %6448 = vmatprep.subr.bf16.mxu0 %v8449_v35  ;;  %v8496_v60 = vcombine.low %v3604_v45, %v3608_v46  ;;  %v8498_v35 = vcombine.low %v3605_v49, %v3609_v53  ;;  %v8507_v48 = vcombine.high %v3613_v55, %v3617_v58  ;;  %v3640_v46 = vld [vmem:[#allocation8 + $0xca0] sm:$0xff]  ;;  %v3637_v49 = vld [vmem:[#allocation8 + $0xc88] sm:$0xff] }
 0x2b9   :  { %6612 = vmatprep.subr.bf16.mxu1 %v8451_v61  ;;  %v8505_v61 = vcombine.high %v3612_v52, %v3616_v54  ;;  %v8523_v45 = vcombine.high %v3629_v63, %v3633_v37  ;;  %v3641_v53 = vld [vmem:[#allocation8 + $0xca8] sm:$0xff] }
 0x2bb   :  { %6449 = vmatpush1.bf16.msra.mxu0 %v8448_v3  ;;  %v3625_v3 = vld [vmem:[#allocation8 + $0xc28] sm:$0xff] }
 0x2bc   :  { %6613 = vmatpush1.bf16.msra.mxu1 %v8450_v0  ;;  %6450 = vmatprep.subr.bf16.mxu0 %v8457_v4  ;;  %v8504_v0 = vcombine.low %v3612_v52, %v3616_v54  ;;  %v8506_v4 = vcombine.low %v3613_v55, %v3617_v58  ;;  %v8515_v6 = vcombine.high %v3621_v2, %v3625_v3  ;;  %v3644_v54 = vld [vmem:[#allocation8 + $0xcc0] sm:$0xff]  ;;  %v3645_v58 = vld [vmem:[#allocation8 + $0xcc8] sm:$0xff] }
 0x2bd   :  { %6614 = vmatprep.subr.bf16.mxu1 %v8459_v38  ;;  %v8513_v38 = vcombine.high %v3620_v62, %v3624_v1  ;;  %v8531_v52 = vcombine.high %v3637_v49, %v3641_v53  ;;  %v3648_v55 = vld [vmem:[#allocation8 + $0xce0] sm:$0xff] }
 0x2be   :  { %v3652_v1 = vld [vmem:[#allocation8 + $0xd00] sm:$0xff] }
 0x2bf   :  { %6451 = vmatpush1.bf16.msra.mxu0 %v8456_v11  ;;  %v9451_v11 = vld [vmem:[#allocation7] sm:$0xff] }
 0x2c0   :  { %6615 = vmatpush1.bf16.msra.mxu1 %v8458_v13  ;;  %6452 = vmatprep.subr.bf16.mxu0 %v8465_v14  ;;  %v579_v13 = vrot.slane %v9451_v11, %v578_v7  ;;  %v583_v14 = vrot.slane %v9451_v11, %v582_v56 }
 0x2c1   :  { %6616 = vmatprep.subr.bf16.mxu1 %v8467_v15  ;;  %v591_v15 = vrot.slane %v9451_v11, %v590_v10 }
 0x2c3   :  { %6453 = vmatpush1.bf16.msra.mxu0 %v8464_v21 }
 0x2c4   :  { %6617 = vmatpush1.bf16.msra.mxu1 %v8466_v47  ;;  %6454 = vmatprep.subr.bf16.mxu0 %v8473_v19 }
 0x2c5   :  { %6618 = vmatprep.subr.bf16.mxu1 %v8475_v23 }
 0x2c7   :  { %6455 = vmatpush1.bf16.msra.mxu0 %v8472_v30 }
 0x2c8   :  { %6619 = vmatpush1.bf16.msra.mxu1 %v8474_v27  ;;  %6456 = vmatprep.subr.bf16.mxu0 %v8481_v33  ;;  %v3628_v27 = vld [vmem:[#allocation8 + $0xc40] sm:$0xff] }
 0x2c9   :  { %6620 = vmatprep.subr.bf16.mxu1 %v8483_v34  ;;  %v3632_v34 = vld [vmem:[#allocation8 + $0xc60] sm:$0xff] }
 0x2cb   :  { %6457 = vmatpush1.bf16.msra.mxu0 %v8480_v8  ;;  %v8514_v8 = vcombine.low %v3621_v2, %v3625_v3  ;;  %v3656_v2 = vld [vmem:[#allocation8 + $0xd20] sm:$0xff]  ;;  %v3653_v3 = vld [vmem:[#allocation8 + $0xd08] sm:$0xff] }
 0x2cc   :  { %6621 = vmatpush1.bf16.msra.mxu1 %v8482_v41  ;;  %6458 = vmatprep.subr.bf16.mxu0 %v8489_v42  ;;  %v3636_v42 = vld [vmem:[#allocation8 + $0xc80] sm:$0xff] }
 0x2cd   :  { %6622 = vmatprep.subr.bf16.mxu1 %v8491_v9  ;;  %v8521_v9 = vcombine.high %v3628_v27, %v3632_v34 }
 0x2cf   :  { %6459 = vmatpush1.bf16.msra.mxu0 %v8488_v31 }
 0x2d0   :  { %6623 = vmatpush1.bf16.msra.mxu1 %v8490_v25  ;;  %6460 = vmatprep.subr.bf16.mxu0 %v8497_v22  ;;  %v8520_v25 = vcombine.low %v3628_v27, %v3632_v34  ;;  %v8522_v22 = vcombine.low %v3629_v63, %v3633_v37  ;;  %v3676_v34 = vld [vmem:[#allocation8 + $0xdc0] sm:$0xff]  ;;  %v3677_v37 = vld [vmem:[#allocation8 + $0xdc8] sm:$0xff] }
 0x2d1   :  { %6624 = vmatprep.subr.bf16.mxu1 %v8499_v50  ;;  %v8529_v50 = vcombine.high %v3636_v42, %v3640_v46  ;;  %v3680_v63 = vld [vmem:[#allocation8 + $0xde0] sm:$0xff] }
 0x2d3   :  { %6461 = vmatpush1.bf16.msra.mxu0 %v8496_v60  ;;  %v3649_v60 = vld [vmem:[#allocation8 + $0xce8] sm:$0xff] }
 0x2d4   :  { %6625 = vmatpush1.bf16.msra.mxu1 %v8498_v35  ;;  %6462 = vmatprep.subr.bf16.mxu0 %v8505_v61  ;;  %v8528_v35 = vcombine.low %v3636_v42, %v3640_v46  ;;  %v8530_v61 = vcombine.low %v3637_v49, %v3641_v53  ;;  %v8539_v62 = vcombine.high %v3645_v58, %v3649_v60  ;;  %v3684_v46 = vld [vmem:[#allocation8 + $0xe00] sm:$0xff]  ;;  %v3685_v53 = vld [vmem:[#allocation8 + $0xe08] sm:$0xff] }
 0x2d5   :  { %6626 = vmatprep.subr.bf16.mxu1 %v8507_v48  ;;  %v8537_v48 = vcombine.high %v3644_v54, %v3648_v55  ;;  %v3688_v49 = vld [vmem:[#allocation8 + $0xe20] sm:$0xff] }
 0x2d7   :  { %6463 = vmatpush1.bf16.msra.mxu0 %v8504_v0  ;;  %v3657_v0 = vld [vmem:[#allocation8 + $0xd28] sm:$0xff] }
 0x2d8   :  { %6627 = vmatpush1.bf16.msra.mxu1 %v8506_v4  ;;  %6473 = vmatprep.subr.bf16.mxu0 %v8513_v38  ;;  %v8536_v4 = vcombine.low %v3644_v54, %v3648_v55  ;;  %v8538_v38 = vcombine.low %v3645_v58, %v3649_v60  ;;  %v3692_v55 = vld [vmem:[#allocation8 + $0xe40] sm:$0xff]  ;;  %v3693_v60 = vld [vmem:[#allocation8 + $0xe48] sm:$0xff] }
 0x2d9   :  { %6637 = vmatprep.subr.bf16.mxu1 %v8515_v6  ;;  %v8545_v6 = vcombine.high %v3652_v1, %v3656_v2  ;;  %v3696_v58 = vld [vmem:[#allocation8 + $0xe60] sm:$0xff] }
 0x2ed   :  { %v3049_v17 = vpop.f32.mrb[4].mxu0  ;;  %v9462_v59 = vpop.f32.mrb[4].mxu1 }
 0x2ee   :  { %v8797_v18 = vadd.f32 %v3049_v17, %v579_v13  ;;  %v3051_v20 = vpop.f32.mrb[5].mxu0  ;;  %v3215_v47 = vpop.f32.mrb[5].mxu1  ;;  %v8547_v13 = vcombine.high %v3653_v3, %v3657_v0  ;;  %v3661_v17 = vld [vmem:[#allocation8 + $0xd48] sm:$0xff] }
 0x2ef   :  { %v8798_v21 = vadd.f32 %v3051_v20, %v583_v14  ;;  %v3053_v19 = vpop.f32.mrb[6].mxu0  ;;  %v8800_v24 = vadd.f32 %v3215_v47, %v591_v15  ;;  %v3217_v26 = vpop.f32.mrb[6].mxu1  ;;  %v3660_v14 = vld [vmem:[#allocation8 + $0xd40] sm:$0xff]  ;;  %v8544_v20 = vcombine.low %v3652_v1, %v3656_v2 }
 0x2f0   :  { %v3224_v23 = vmax.f32 %v8797_v18, 0.0  ;;  %v3054_v28 = vpop.f32.mrb[7].mxu0  ;;  %v3218_v30 = vpop.f32.mrb[7].mxu1  ;;  %v3664_v15 = vld [vmem:[#allocation8 + $0xd60] sm:$0xff]  ;;  %v3665_v18 = vld [vmem:[#allocation8 + $0xd68] sm:$0xff] }
 0x2f1   :  { %v3225_v29 = vmax.f32 %v8798_v21, 0.0  ;;  %v3227_v33 = vmax.f32 %v8800_v24, 0.0  ;;  %v8546_v21 = vcombine.low %v3653_v3, %v3657_v0  ;;  %v8553_v47 = vcombine.high %v3660_v14, %v3664_v15  ;;  %v3672_v24 = vld [vmem:[#allocation8 + $0xda0] sm:$0xff]  ;;  %v3669_v26 = vld [vmem:[#allocation8 + $0xd88] sm:$0xff] }
 0x2f2   :  { %v9466_v41 = vpack.c.bf16 %v3224_v23, %v3224_v23  ;;  %v8555_v19 = vcombine.high %v3661_v17, %v3665_v18  ;;  %v3668_v23 = vld [vmem:[#allocation8 + $0xd80] sm:$0xff]  ;;  %v3673_v28 = vld [vmem:[#allocation8 + $0xda8] sm:$0xff]  ;;  %v8554_v30 = vcombine.low %v3661_v17, %v3665_v18 }
 0x2f3   :  { %v9464_v39 = vpack.c.bf16 %v3225_v29, %v3225_v29  ;;  %v9470_v31 = vpack.c.bf16 %v3227_v33, %v3227_v33  ;;  %v8552_v29 = vcombine.low %v3660_v14, %v3664_v15  ;;  %v8561_v27 = vcombine.high %v3668_v23, %v3672_v24  ;;  %v3700_v2 = vld [vmem:[#allocation8 + $0xe80] sm:$0xff]  ;;  %v3701_v0 = vld [vmem:[#allocation8 + $0xe88] sm:$0xff] }
 0x2f4   :  { %v8563_v33 = vcombine.high %v3669_v26, %v3673_v28  ;;  %v8562_v42 = vcombine.low %v3669_v26, %v3673_v28  ;;  %v3704_v3 = vld [vmem:[#allocation8 + $0xea0] sm:$0xff]  ;;  %v3709_v18 = vld [vmem:[#allocation8 + $0xec8] sm:$0xff] }
 0x2f5   :  { %6464 = vmatprep.mubr.bf16.mxu0 %v9464_v39  ;;  %6628 = vmatprep.mubr.bf16.mxu1 %v9464_v39  ;;  %v3708_v15 = vld [vmem:[#allocation8 + $0xec0] sm:$0xff]  ;;  %v3717_v28 = vld [vmem:[#allocation8 + $0xf08] sm:$0xff] }
 0x2f6   :  { %6465 = vmatmul.mubr.bf16.vlgmr.msra.gmra.mrb[8].mxu0 %v9466_v41  ;;  %6629 = vmatmul.mubr.bf16.vlgmr.msra.gmra.mrb[8].mxu1 %v9466_v41  ;;  %v3712_v17 = vld [vmem:[#allocation8 + $0xee0] sm:$0xff] }
 0x2f7   :  { %6474 = vmatpush1.bf16.msra.mxu0 %v8512_v40  ;;  %6638 = vmatpush1.bf16.msra.mxu1 %v8514_v8  ;;  %v3681_v40 = vld [vmem:[#allocation8 + $0xde8] sm:$0xff]  ;;  %v8560_v8 = vcombine.low %v3668_v23, %v3672_v24  ;;  %v3716_v24 = vld [vmem:[#allocation8 + $0xf00] sm:$0xff] }
 0x2f8   :  { %6505 = vmatprep.mubr.bf16.mxu0 %v9470_v31  ;;  %6669 = vmatprep.mubr.bf16.mxu1 %v9470_v31  ;;  %v3720_v26 = vld [vmem:[#allocation8 + $0xf20] sm:$0xff] }
 0x2f9   :  { %6475 = vmatprep.subr.bf16.mxu0 %v8521_v9  ;;  %6639 = vmatprep.subr.bf16.mxu1 %v8523_v45  ;;  %v8569_v9 = vcombine.high %v3676_v34, %v3680_v63  ;;  %v8571_v45 = vcombine.high %v3677_v37, %v3681_v40 }
 0x2fb   :  { %6476 = vmatpush1.bf16.msra.mxu0 %v8520_v25  ;;  %6640 = vmatpush1.bf16.msra.mxu1 %v8522_v22  ;;  %v3689_v25 = vld [vmem:[#allocation8 + $0xe28] sm:$0xff]  ;;  %v8568_v22 = vcombine.low %v3676_v34, %v3680_v63  ;;  %v3724_v63 = vld [vmem:[#allocation8 + $0xf40] sm:$0xff] }
 0x2fc   :  { %6477 = vmatprep.subr.bf16.mxu0 %v8529_v50  ;;  %6641 = vmatprep.subr.bf16.mxu1 %v8531_v52  ;;  %v8570_v50 = vcombine.low %v3677_v37, %v3681_v40  ;;  %v8577_v52 = vcombine.high %v3684_v46, %v3688_v49  ;;  %v8579_v54 = vcombine.high %v3685_v53, %v3689_v25  ;;  %v3728_v37 = vld [vmem:[#allocation8 + $0xf60] sm:$0xff]  ;;  %v3725_v40 = vld [vmem:[#allocation8 + $0xf48] sm:$0xff] }
 0x2ff   :  { %6478 = vmatpush1.bf16.msra.mxu0 %v8528_v35  ;;  %6642 = vmatpush1.bf16.msra.mxu1 %v8530_v61  ;;  %v3697_v35 = vld [vmem:[#allocation8 + $0xe68] sm:$0xff]  ;;  %v8576_v61 = vcombine.low %v3684_v46, %v3688_v49  ;;  %v8617_v46 = vcombine.high %v3724_v63, %v3728_v37 }
 0x300   :  { %6479 = vmatprep.subr.bf16.mxu0 %v8537_v48  ;;  %6643 = vmatprep.subr.bf16.mxu1 %v8539_v62  ;;  %v8578_v48 = vcombine.low %v3685_v53, %v3689_v25  ;;  %v8585_v62 = vcombine.high %v3692_v55, %v3696_v58  ;;  %v8587_v1 = vcombine.high %v3693_v60, %v3697_v35  ;;  %v3732_v53 = vld [vmem:[#allocation8 + $0xf80] sm:$0xff] }
 0x301   :  { %v3736_v25 = vld [vmem:[#allocation8 + $0xfa0] sm:$0xff] }
 0x303   :  { %6480 = vmatpush1.bf16.msra.mxu0 %v8536_v4  ;;  %6644 = vmatpush1.bf16.msra.mxu1 %v8538_v38  ;;  %v3705_v4 = vld [vmem:[#allocation8 + $0xea8] sm:$0xff]  ;;  %v8584_v38 = vcombine.low %v3692_v55, %v3696_v58  ;;  %v8625_v58 = vcombine.high %v3732_v53, %v3736_v25 }
 0x304   :  { %6481 = vmatprep.subr.bf16.mxu0 %v8545_v6  ;;  %6645 = vmatprep.subr.bf16.mxu1 %v8547_v13  ;;  %v8586_v6 = vcombine.low %v3693_v60, %v3697_v35  ;;  %v8593_v13 = vcombine.high %v3700_v2, %v3704_v3  ;;  %v8595_v14 = vcombine.high %v3701_v0, %v3705_v4  ;;  %v3740_v35 = vld [vmem:[#allocation8 + $0xfc0] sm:$0xff] }
 0x307   :  { %6482 = vmatpush1.bf16.msra.mxu0 %v8544_v20  ;;  %6646 = vmatpush1.bf16.msra.mxu1 %v8546_v21  ;;  %v3713_v20 = vld [vmem:[#allocation8 + $0xee8] sm:$0xff]  ;;  %v8592_v21 = vcombine.low %v3700_v2, %v3704_v3 }
 0x308   :  { %6483 = vmatprep.subr.bf16.mxu0 %v8553_v47  ;;  %6647 = vmatprep.subr.bf16.mxu1 %v8555_v19  ;;  %v8594_v47 = vcombine.low %v3701_v0, %v3705_v4  ;;  %v8601_v19 = vcombine.high %v3708_v15, %v3712_v17  ;;  %v8603_v23 = vcombine.high %v3709_v18, %v3713_v20 }
 0x30b   :  { %6484 = vmatpush1.bf16.msra.mxu0 %v8552_v29  ;;  %6648 = vmatpush1.bf16.msra.mxu1 %v8554_v30  ;;  %v3721_v29 = vld [vmem:[#allocation8 + $0xf28] sm:$0xff]  ;;  %v8600_v30 = vcombine.low %v3708_v15, %v3712_v17 }
 0x30c   :  { %6485 = vmatprep.subr.bf16.mxu0 %v8561_v27  ;;  %6649 = vmatprep.subr.bf16.mxu1 %v8563_v33  ;;  %v8602_v27 = vcombine.low %v3709_v18, %v3713_v20  ;;  %v8609_v33 = vcombine.high %v3716_v24, %v3720_v26  ;;  %v8611_v34 = vcombine.high %v3717_v28, %v3721_v29 }
 0x30f   :  { %6486 = vmatpush1.bf16.msra.mxu0 %v8560_v8  ;;  %6650 = vmatpush1.bf16.msra.mxu1 %v8562_v42  ;;  %v3729_v8 = vld [vmem:[#allocation8 + $0xf68] sm:$0xff]  ;;  %v8608_v42 = vcombine.low %v3716_v24, %v3720_v26 }
 0x310   :  { %6487 = vmatprep.subr.bf16.mxu0 %v8569_v9  ;;  %6651 = vmatprep.subr.bf16.mxu1 %v8571_v45  ;;  %v8610_v9 = vcombine.low %v3717_v28, %v3721_v29  ;;  %v586_v45 = vsub.s32 6, %v9314_v44  ;;  %v8619_v49 = vcombine.high %v3725_v40, %v3729_v8 }
 0x312   :  { %v587_v55 = vrot.slane %v9451_v11, %v586_v45  ;;  %v3242_v11 = vld [vmem:[#allocation8 + $0x30] sm:$0xff] }
 0x313   :  { %6488 = vmatpush1.bf16.msra.mxu0 %v8568_v22  ;;  %6652 = vmatpush1.bf16.msra.mxu1 %v8570_v50  ;;  %v3733_v22 = vld [vmem:[#allocation8 + $0xf88] sm:$0xff] }
 0x314   :  { %6489 = vmatprep.subr.bf16.mxu0 %v8577_v52  ;;  %6653 = vmatprep.subr.bf16.mxu1 %v8579_v54  ;;  %v3737_v50 = vld [vmem:[#allocation8 + $0xfa8] sm:$0xff]  ;;  %v8616_v52 = vcombine.low %v3724_v63, %v3728_v37  ;;  %v8618_v54 = vcombine.low %v3725_v40, %v3729_v8  ;;  %v8799_v3 = vadd.f32 %v9462_v59, %v587_v55  ;;  %v3247_v59 = vld [vmem:[#allocation8 + $0x58] sm:$0xff] }
 0x315   :  { %v8627_v60 = vcombine.high %v3733_v22, %v3737_v50  ;;  %v8626_v2 = vcombine.low %v3733_v22, %v3737_v50  ;;  %v3275_v55 = vld [vmem:[#allocation8 + $0x138] sm:$0xff] }
 0x316   :  { %v3226_v17 = vmax.f32 %v8799_v3, 0.0 }
 0x317   :  { %6490 = vmatpush1.bf16.msra.mxu0 %v8576_v61  ;;  %6654 = vmatpush1.bf16.msra.mxu1 %v8578_v48  ;;  %v3744_v61 = vld [vmem:[#allocation8 + $0xfe0] sm:$0xff]  ;;  %v3741_v48 = vld [vmem:[#allocation8 + $0xfc8] sm:$0xff] }
 0x318   :  { %6491 = vmatprep.subr.bf16.mxu0 %v8585_v62  ;;  %6655 = vmatprep.subr.bf16.mxu1 %v8587_v1  ;;  %v3745_v62 = vld [vmem:[#allocation8 + $0xfe8] sm:$0xff]  ;;  %v8624_v1 = vcombine.low %v3732_v53, %v3736_v25  ;;  %v8633_v0 = vcombine.high %v3740_v35, %v3744_v61  ;;  %v9481_v24 = vpack.c.bf16 %v3226_v17, %v3226_v17 }
 0x319   :  { %v8635_v4 = vcombine.high %v3741_v48, %v3745_v62  ;;  %v8634_v15 = vcombine.low %v3741_v48, %v3745_v62  ;;  %v3278_v48 = vld [vmem:[#allocation8 + $0x150] sm:$0xff] }
 0x31a   :  { %v3282_v62 = vld [vmem:[#allocation8 + $0x170] sm:$0xff] }
 0x31b   :  { %6492 = vmatpush1.bf16.msra.mxu0 %v8584_v38  ;;  %6656 = vmatpush1.bf16.msra.mxu1 %v8586_v6  ;;  %v3238_v38 = vld [vmem:[#allocation8 + $0x10] sm:$0xff]  ;;  %v3239_v6 = vld [vmem:[#allocation8 + $0x18] sm:$0xff] }
 0x31c   :  { %6493 = vmatprep.subr.bf16.mxu0 %v8593_v13  ;;  %6657 = vmatprep.subr.bf16.mxu1 %v8595_v14  ;;  %v3243_v13 = vld [vmem:[#allocation8 + $0x38] sm:$0xff]  ;;  %v8632_v14 = vcombine.low %v3740_v35, %v3744_v61  ;;  %v8133_v18 = vcombine.high %v3238_v38, %v3242_v11 }
 0x31d   :  { %v8135_v20 = vcombine.high %v3239_v6, %v3243_v13  ;;  %v8134_v26 = vcombine.low %v3239_v6, %v3243_v13  ;;  %v3290_v6 = vld [vmem:[#allocation8 + $0x1b0] sm:$0xff]  ;;  %v3287_v13 = vld [vmem:[#allocation8 + $0x198] sm:$0xff] }
 0x31f   :  { %6494 = vmatpush1.bf16.msra.mxu0 %v8592_v21  ;;  %6658 = vmatpush1.bf16.msra.mxu1 %v8594_v47  ;;  %v3246_v21 = vld [vmem:[#allocation8 + $0x50] sm:$0xff] }
 0x320   :  { %6495 = vmatprep.subr.bf16.mxu0 %v8601_v19  ;;  %6659 = vmatprep.subr.bf16.mxu1 %v8603_v23  ;;  %v3250_v47 = vld [vmem:[#allocation8 + $0x70] sm:$0xff]  ;;  %v3251_v19 = vld [vmem:[#allocation8 + $0x78] sm:$0xff]  ;;  %v8132_v23 = vcombine.low %v3238_v38, %v3242_v11 }
 0x321   :  { %v8141_v28 = vcombine.high %v3246_v21, %v3250_v47  ;;  %v8143_v29 = vcombine.high %v3247_v59, %v3251_v19  ;;  %v8140_v63 = vcombine.low %v3246_v21, %v3250_v47  ;;  %v8142_v37 = vcombine.low %v3247_v59, %v3251_v19  ;;  %v3286_v11 = vld [vmem:[#allocation8 + $0x190] sm:$0xff]  ;;  %v3295_v59 = vld [vmem:[#allocation8 + $0x1d8] sm:$0xff] }
 0x322   :  { %v3294_v21 = vld [vmem:[#allocation8 + $0x1d0] sm:$0xff]  ;;  %v3299_v19 = vld [vmem:[#allocation8 + $0x1f8] sm:$0xff] }
 0x323   :  { %6496 = vmatpush1.bf16.msra.mxu0 %v8600_v30  ;;  %6660 = vmatpush1.bf16.msra.mxu1 %v8602_v27  ;;  %v3254_v30 = vld [vmem:[#allocation8 + $0x90] sm:$0xff] }
 0x324   :  { %6497 = vmatprep.subr.bf16.mxu0 %v8609_v33  ;;  %6661 = vmatprep.subr.bf16.mxu1 %v8611_v34  ;;  %v3258_v27 = vld [vmem:[#allocation8 + $0xb0] sm:$0xff]  ;;  %v3255_v33 = vld [vmem:[#allocation8 + $0x98] sm:$0xff] }
 0x325   :  { %v3259_v34 = vld [vmem:[#allocation8 + $0xb8] sm:$0xff]  ;;  %v8149_v40 = vcombine.high %v3254_v30, %v3258_v27  ;;  %v8148_v53 = vcombine.low %v3254_v30, %v3258_v27  ;;  %v3298_v47 = vld [vmem:[#allocation8 + $0x1f0] sm:$0xff] }
 0x326   :  { %v8151_v8 = vcombine.high %v3255_v33, %v3259_v34  ;;  %v8150_v25 = vcombine.low %v3255_v33, %v3259_v34  ;;  %v3302_v30 = vld [vmem:[#allocation8 + $0x210] sm:$0xff]  ;;  %v3303_v33 = vld [vmem:[#allocation8 + $0x218] sm:$0xff] }
 0x327   :  { %6498 = vmatpush1.bf16.msra.mxu0 %v8608_v42  ;;  %6662 = vmatpush1.bf16.msra.mxu1 %v8610_v9  ;;  %v3262_v42 = vld [vmem:[#allocation8 + $0xd0] sm:$0xff]  ;;  %v3307_v34 = vld [vmem:[#allocation8 + $0x238] sm:$0xff] }
 0x328   :  { %6499 = vmatprep.subr.bf16.mxu0 %v8617_v46  ;;  %6663 = vmatprep.subr.bf16.mxu1 %v8619_v49  ;;  %v3266_v9 = vld [vmem:[#allocation8 + $0xf0] sm:$0xff]  ;;  %v3263_v46 = vld [vmem:[#allocation8 + $0xd8] sm:$0xff] }
 0x329   :  { %v3267_v49 = vld [vmem:[#allocation8 + $0xf8] sm:$0xff]  ;;  %v8157_v22 = vcombine.high %v3262_v42, %v3266_v9  ;;  %v3306_v27 = vld [vmem:[#allocation8 + $0x230] sm:$0xff] }
 0x32a   :  { %v8159_v50 = vcombine.high %v3263_v46, %v3267_v49 }
 0x32b   :  { %6500 = vmatpush1.bf16.msra.mxu0 %v8616_v52  ;;  %6664 = vmatpush1.bf16.msra.mxu1 %v8618_v54  ;;  %v3270_v52 = vld [vmem:[#allocation8 + $0x110] sm:$0xff] }
 0x32c   :  { %6501 = vmatprep.subr.bf16.mxu0 %v8625_v58  ;;  %6665 = vmatprep.subr.bf16.mxu1 %v8627_v60  ;;  %v3274_v54 = vld [vmem:[#allocation8 + $0x130] sm:$0xff]  ;;  %v8156_v58 = vcombine.low %v3262_v42, %v3266_v9  ;;  %v8158_v60 = vcombine.low %v3263_v46, %v3267_v49  ;;  %v3311_v46 = vld [vmem:[#allocation8 + $0x258] sm:$0xff] }
 0x32d   :  { %v8165_v35 = vcombine.high %v3270_v52, %v3274_v54  ;;  %v8164_v3 = vcombine.low %v3270_v52, %v3274_v54  ;;  %v3310_v42 = vld [vmem:[#allocation8 + $0x250] sm:$0xff]  ;;  %v3315_v49 = vld [vmem:[#allocation8 + $0x278] sm:$0xff] }
 0x32e   :  { %v3314_v9 = vld [vmem:[#allocation8 + $0x270] sm:$0xff] }
 0x32f   :  { %6502 = vmatpush1.bf16.msra.mxu0 %v8624_v1  ;;  %6666 = vmatpush1.bf16.msra.mxu1 %v8626_v2  ;;  %v3279_v1 = vld [vmem:[#allocation8 + $0x158] sm:$0xff]  ;;  %v3318_v52 = vld [vmem:[#allocation8 + $0x290] sm:$0xff] }
 0x330   :  { %6503 = vmatprep.subr.bf16.mxu0 %v8633_v0  ;;  %6667 = vmatprep.subr.bf16.mxu1 %v8635_v4  ;;  %v3283_v2 = vld [vmem:[#allocation8 + $0x178] sm:$0xff]  ;;  %v8173_v4 = vcombine.high %v3278_v48, %v3282_v62  ;;  %v3322_v54 = vld [vmem:[#allocation8 + $0x2b0] sm:$0xff] }
 0x331   :  { %v8175_v38 = vcombine.high %v3279_v1, %v3283_v2  ;;  %v8174_v17 = vcombine.low %v3279_v1, %v3283_v2  ;;  %v3327_v1 = vld [vmem:[#allocation8 + $0x2d8] sm:$0xff] }
 0x332   :  { %v3331_v2 = vld [vmem:[#allocation8 + $0x2f8] sm:$0xff] }
 0x333   :  { %6504 = vmatpush1.bf16.msra.mxu0 %v8632_v14  ;;  %6668 = vmatpush1.bf16.msra.mxu1 %v8634_v15  ;;  %v3291_v14 = vld [vmem:[#allocation8 + $0x1b8] sm:$0xff]  ;;  %v8172_v15 = vcombine.low %v3278_v48, %v3282_v62  ;;  %v3326_v48 = vld [vmem:[#allocation8 + $0x2d0] sm:$0xff] }
 0x334   :  { %6678 = vmatprep.subr.bf16.mxu0 %v8133_v18  ;;  %6842 = vmatprep.subr.bf16.mxu1 %v8135_v20  ;;  %v8181_v18 = vcombine.high %v3286_v11, %v3290_v6  ;;  %v8183_v20 = vcombine.high %v3287_v13, %v3291_v14  ;;  %v3330_v62 = vld [vmem:[#allocation8 + $0x2f0] sm:$0xff] }
 0x336   :  { %6506 = vmatmul.mubr.bf16.vlgmr.msra.gmra.mrb[8].mxu0 %v9481_v24  ;;  %6670 = vmatmul.mubr.bf16.vlgmr.msra.gmra.mrb[8].mxu1 %v9481_v24 }
 0x337   :  { %6679 = vmatpush1.bf16.msra.mxu0 %v8132_v23  ;;  %6710 = vmatprep.mubr.bf16.mxu0 %v9417_v43  ;;  %v8180_v23 = vcombine.low %v3286_v11, %v3290_v6  ;;  %v3334_v11 = vld [vmem:[#allocation8 + $0x310] sm:$0xff] }
 0x338   :  { %6843 = vmatpush1.bf16.msra.mxu1 %v8134_v26  ;;  %6874 = vmatprep.mubr.bf16.mxu1 %v9417_v43  ;;  %v3271_v43 = vld [vmem:[#allocation8 + $0x118] sm:$0xff]  ;;  %v8182_v26 = vcombine.low %v3287_v13, %v3291_v14  ;;  %v3338_v6 = vld [vmem:[#allocation8 + $0x330] sm:$0xff] }
 0x339   :  { %6680 = vmatprep.subr.bf16.mxu0 %v8141_v28  ;;  %6844 = vmatprep.subr.bf16.mxu1 %v8143_v29  ;;  %v8167_v61 = vcombine.high %v3271_v43, %v3275_v55  ;;  %v8166_v0 = vcombine.low %v3271_v43, %v3275_v55  ;;  %v8189_v28 = vcombine.high %v3294_v21, %v3298_v47  ;;  %v3319_v43 = vld [vmem:[#allocation8 + $0x298] sm:$0xff] }
 0x33a   :  { %v8191_v29 = vcombine.high %v3295_v59, %v3299_v19  ;;  %v3323_v55 = vld [vmem:[#allocation8 + $0x2b8] sm:$0xff] }
 0x33b   :  { %6681 = vmatpush1.bf16.msra.mxu0 %v8140_v63  ;;  %v8188_v63 = vcombine.low %v3294_v21, %v3298_v47  ;;  %v3335_v13 = vld [vmem:[#allocation8 + $0x318] sm:$0xff]  ;;  %v3342_v21 = vld [vmem:[#allocation8 + $0x350] sm:$0xff] }
 0x33c   :  { %6845 = vmatpush1.bf16.msra.mxu1 %v8142_v37  ;;  %6682 = vmatprep.subr.bf16.mxu0 %v8149_v40  ;;  %v8190_v37 = vcombine.low %v3295_v59, %v3299_v19  ;;  %v8197_v40 = vcombine.high %v3302_v30, %v3306_v27  ;;  %v3339_v14 = vld [vmem:[#allocation8 + $0x338] sm:$0xff]  ;;  %v3346_v47 = vld [vmem:[#allocation8 + $0x370] sm:$0xff] }
 0x33d   :  { %6846 = vmatprep.subr.bf16.mxu1 %v8151_v8  ;;  %v8199_v8 = vcombine.high %v3303_v33, %v3307_v34  ;;  %v3343_v59 = vld [vmem:[#allocation8 + $0x358] sm:$0xff] }
 0x33e   :  { %v3347_v19 = vld [vmem:[#allocation8 + $0x378] sm:$0xff] }
 0x33f   :  { %6683 = vmatpush1.bf16.msra.mxu0 %v8148_v53  ;;  %v8196_v53 = vcombine.low %v3302_v30, %v3306_v27  ;;  %v3350_v30 = vld [vmem:[#allocation8 + $0x390] sm:$0xff] }
 0x340   :  { %6847 = vmatpush1.bf16.msra.mxu1 %v8150_v25  ;;  %6684 = vmatprep.subr.bf16.mxu0 %v8157_v22  ;;  %v8198_v25 = vcombine.low %v3303_v33, %v3307_v34  ;;  %v8205_v22 = vcombine.high %v3310_v42, %v3314_v9  ;;  %v3354_v27 = vld [vmem:[#allocation8 + $0x3b0] sm:$0xff]  ;;  %v3351_v33 = vld [vmem:[#allocation8 + $0x398] sm:$0xff] }
 0x341   :  { %6848 = vmatprep.subr.bf16.mxu1 %v8159_v50  ;;  %v8207_v50 = vcombine.high %v3311_v46, %v3315_v49  ;;  %v3355_v34 = vld [vmem:[#allocation8 + $0x3b8] sm:$0xff] }
 0x343   :  { %6685 = vmatpush1.bf16.msra.mxu0 %v8156_v58  ;;  %v8204_v58 = vcombine.low %v3310_v42, %v3314_v9  ;;  %v3358_v42 = vld [vmem:[#allocation8 + $0x3d0] sm:$0xff] }
 0x344   :  { %6849 = vmatpush1.bf16.msra.mxu1 %v8158_v60  ;;  %6686 = vmatprep.subr.bf16.mxu0 %v8165_v35  ;;  %v8206_v60 = vcombine.low %v3311_v46, %v3315_v49  ;;  %v8213_v35 = vcombine.high %v3318_v52, %v3322_v54  ;;  %v3362_v9 = vld [vmem:[#allocation8 + $0x3f0] sm:$0xff]  ;;  %v3359_v46 = vld [vmem:[#allocation8 + $0x3d8] sm:$0xff] }
 0x345   :  { %6850 = vmatprep.subr.bf16.mxu1 %v8167_v61  ;;  %v8215_v61 = vcombine.high %v3319_v43, %v3323_v55  ;;  %v3363_v49 = vld [vmem:[#allocation8 + $0x3f8] sm:$0xff] }
 0x347   :  { %6687 = vmatpush1.bf16.msra.mxu0 %v8164_v3  ;;  %v8212_v3 = vcombine.low %v3318_v52, %v3322_v54  ;;  %v3366_v52 = vld [vmem:[#allocation8 + $0x410] sm:$0xff] }
 0x348   :  { %6851 = vmatpush1.bf16.msra.mxu1 %v8166_v0  ;;  %6688 = vmatprep.subr.bf16.mxu0 %v8173_v4  ;;  %v8214_v0 = vcombine.low %v3319_v43, %v3323_v55  ;;  %v8221_v4 = vcombine.high %v3326_v48, %v3330_v62  ;;  %v3370_v54 = vld [vmem:[#allocation8 + $0x430] sm:$0xff]  ;;  %v3367_v43 = vld [vmem:[#allocation8 + $0x418] sm:$0xff] }
 0x349   :  { %6852 = vmatprep.subr.bf16.mxu1 %v8175_v38  ;;  %v8223_v38 = vcombine.high %v3327_v1, %v3331_v2  ;;  %v3371_v55 = vld [vmem:[#allocation8 + $0x438] sm:$0xff] }
 0x34b   :  { %6689 = vmatpush1.bf16.msra.mxu0 %v8172_v15  ;;  %v8220_v15 = vcombine.low %v3326_v48, %v3330_v62  ;;  %v3374_v48 = vld [vmem:[#allocation8 + $0x450] sm:$0xff] }
 0x34c   :  { %6853 = vmatpush1.bf16.msra.mxu1 %v8174_v17  ;;  %6690 = vmatprep.subr.bf16.mxu0 %v8181_v18  ;;  %v8222_v17 = vcombine.low %v3327_v1, %v3331_v2  ;;  %v8229_v18 = vcombine.high %v3334_v11, %v3338_v6  ;;  %v3378_v62 = vld [vmem:[#allocation8 + $0x470] sm:$0xff]  ;;  %v8260_v1 = vcombine.low %v3366_v52, %v3370_v54  ;;  %v3375_v2 = vld [vmem:[#allocation8 + $0x458] sm:$0xff] }
 0x34d   :  { %6854 = vmatprep.subr.bf16.mxu1 %v8183_v20  ;;  %v8231_v20 = vcombine.high %v3335_v13, %v3339_v14 }
 0x34f   :  { %6691 = vmatpush1.bf16.msra.mxu0 %v8180_v23  ;;  %v8228_v23 = vcombine.low %v3334_v11, %v3338_v6  ;;  %v3386_v11 = vld [vmem:[#allocation8 + $0x4b0] sm:$0xff] }
 0x350   :  { %6855 = vmatpush1.bf16.msra.mxu1 %v8182_v26  ;;  %6692 = vmatprep.subr.bf16.mxu0 %v8189_v28  ;;  %v8230_v26 = vcombine.low %v3335_v13, %v3339_v14  ;;  %v8237_v28 = vcombine.high %v3342_v21, %v3346_v47  ;;  %v3383_v13 = vld [vmem:[#allocation8 + $0x498] sm:$0xff] }
 0x351   :  { %6856 = vmatprep.subr.bf16.mxu1 %v8191_v29  ;;  %v8239_v29 = vcombine.high %v3343_v59, %v3347_v19  ;;  %v3387_v14 = vld [vmem:[#allocation8 + $0x4b8] sm:$0xff] }
 0x353   :  { %6693 = vmatpush1.bf16.msra.mxu0 %v8188_v63  ;;  %v8236_v63 = vcombine.low %v3342_v21, %v3346_v47  ;;  %v3390_v21 = vld [vmem:[#allocation8 + $0x4d0] sm:$0xff] }
 0x354   :  { %6857 = vmatpush1.bf16.msra.mxu1 %v8190_v37  ;;  %6694 = vmatprep.subr.bf16.mxu0 %v8197_v40  ;;  %v8238_v37 = vcombine.low %v3343_v59, %v3347_v19  ;;  %v8245_v40 = vcombine.high %v3350_v30, %v3354_v27  ;;  %v3394_v47 = vld [vmem:[#allocation8 + $0x4f0] sm:$0xff]  ;;  %v3391_v59 = vld [vmem:[#allocation8 + $0x4d8] sm:$0xff] }
 0x355   :  { %6858 = vmatprep.subr.bf16.mxu1 %v8199_v8  ;;  %v8247_v8 = vcombine.high %v3351_v33, %v3355_v34  ;;  %v3395_v19 = vld [vmem:[#allocation8 + $0x4f8] sm:$0xff] }
 0x357   :  { %6695 = vmatpush1.bf16.msra.mxu0 %v8196_v53  ;;  %v8244_v53 = vcombine.low %v3350_v30, %v3354_v27  ;;  %v3402_v30 = vld [vmem:[#allocation8 + $0x530] sm:$0xff]  ;;  %v3399_v27 = vld [vmem:[#allocation8 + $0x518] sm:$0xff] }
 0x358   :  { %6859 = vmatpush1.bf16.msra.mxu1 %v8198_v25  ;;  %6696 = vmatprep.subr.bf16.mxu0 %v8205_v22  ;;  %v8246_v25 = vcombine.low %v3351_v33, %v3355_v34  ;;  %v8253_v22 = vcombine.high %v3358_v42, %v3362_v9  ;;  %v3403_v33 = vld [vmem:[#allocation8 + $0x538] sm:$0xff]  ;;  %v8286_v34 = vcombine.low %v3391_v59, %v3395_v19 }
 0x359   :  { %6860 = vmatprep.subr.bf16.mxu1 %v8207_v50  ;;  %v8255_v50 = vcombine.high %v3359_v46, %v3363_v49 }
 0x35b   :  { %6697 = vmatpush1.bf16.msra.mxu0 %v8204_v58  ;;  %v8252_v58 = vcombine.low %v3358_v42, %v3362_v9  ;;  %v3407_v42 = vld [vmem:[#allocation8 + $0x558] sm:$0xff] }
 0x35c   :  { %6861 = vmatpush1.bf16.msra.mxu1 %v8206_v60  ;;  %6698 = vmatprep.subr.bf16.mxu0 %v8213_v35  ;;  %v8254_v60 = vcombine.low %v3359_v46, %v3363_v49  ;;  %v8261_v35 = vcombine.high %v3366_v52, %v3370_v54  ;;  %v3411_v9 = vld [vmem:[#allocation8 + $0x578] sm:$0xff]  ;;  %v8294_v49 = vcombine.low %v3399_v27, %v3403_v33 }
 0x35d   :  { %6862 = vmatprep.subr.bf16.mxu1 %v8215_v61  ;;  %v8263_v61 = vcombine.high %v3367_v43, %v3371_v55  ;;  %v3415_v52 = vld [vmem:[#allocation8 + $0x598] sm:$0xff] }
 0x35e   :  { %v3419_v54 = vld [vmem:[#allocation8 + $0x5b8] sm:$0xff] }
 0x35f   :  { %6699 = vmatpush1.bf16.msra.mxu0 %v8212_v3  ;;  %v3379_v3 = vld [vmem:[#allocation8 + $0x478] sm:$0xff] }
 0x360   :  { %6863 = vmatpush1.bf16.msra.mxu1 %v8214_v0  ;;  %6700 = vmatprep.subr.bf16.mxu0 %v8221_v4  ;;  %v8262_v0 = vcombine.low %v3367_v43, %v3371_v55  ;;  %v8269_v4 = vcombine.high %v3374_v48, %v3378_v62  ;;  %v8271_v6 = vcombine.high %v3375_v2, %v3379_v3 }
 0x361   :  { %6864 = vmatprep.subr.bf16.mxu1 %v8223_v38  ;;  %v3382_v38 = vld [vmem:[#allocation8 + $0x490] sm:$0xff]  ;;  %v8302_v55 = vcombine.low %v3407_v42, %v3411_v9 }
 0x363   :  { %6701 = vmatpush1.bf16.msra.mxu0 %v8220_v15  ;;  %v8268_v15 = vcombine.low %v3374_v48, %v3378_v62  ;;  %v3423_v48 = vld [vmem:[#allocation8 + $0x5d8] sm:$0xff] }
 0x364   :  { %6865 = vmatpush1.bf16.msra.mxu1 %v8222_v17  ;;  %6702 = vmatprep.subr.bf16.mxu0 %v8229_v18  ;;  %v8270_v17 = vcombine.low %v3375_v2, %v3379_v3  ;;  %v8277_v18 = vcombine.high %v3382_v38, %v3386_v11  ;;  %v3427_v62 = vld [vmem:[#allocation8 + $0x5f8] sm:$0xff]  ;;  %v8310_v2 = vcombine.low %v3415_v52, %v3419_v54 }
 0x365   :  { %6866 = vmatprep.subr.bf16.mxu1 %v8231_v20  ;;  %v8279_v20 = vcombine.high %v3383_v13, %v3387_v14 }
 0x367   :  { %6703 = vmatpush1.bf16.msra.mxu0 %v8228_v23  ;;  %v8276_v23 = vcombine.low %v3382_v38, %v3386_v11  ;;  %v3434_v38 = vld [vmem:[#allocation8 + $0x630] sm:$0xff]  ;;  %v3431_v11 = vld [vmem:[#allocation8 + $0x618] sm:$0xff] }
 0x368   :  { %6867 = vmatpush1.bf16.msra.mxu1 %v8230_v26  ;;  %6704 = vmatprep.subr.bf16.mxu0 %v8237_v28  ;;  %v8285_v26 = vcombine.high %v3390_v21, %v3394_v47  ;;  %v8287_v28 = vcombine.high %v3391_v59, %v3395_v19 }
 0x369   :  { %6868 = vmatprep.subr.bf16.mxu1 %v8239_v29  ;;  %v3398_v29 = vld [vmem:[#allocation8 + $0x510] sm:$0xff] }
 0x36a   :  { %v8292_v46 = vcombine.low %v3398_v29, %v3402_v30 }
 0x36b   :  { %6705 = vmatpush1.bf16.msra.mxu0 %v8236_v63  ;;  %v8293_v63 = vcombine.high %v3398_v29, %v3402_v30  ;;  %v3447_v29 = vld [vmem:[#allocation8 + $0x698] sm:$0xff] }
 0x36c   :  { %6869 = vmatpush1.bf16.msra.mxu1 %v8238_v37  ;;  %6706 = vmatprep.subr.bf16.mxu0 %v8245_v40  ;;  %v8295_v37 = vcombine.high %v3399_v27, %v3403_v33  ;;  %v3406_v40 = vld [vmem:[#allocation8 + $0x550] sm:$0xff]  ;;  %v3451_v30 = vld [vmem:[#allocation8 + $0x6b8] sm:$0xff] }
 0x36d   :  { %6870 = vmatprep.subr.bf16.mxu1 %v8247_v8  ;;  %v3410_v8 = vld [vmem:[#allocation8 + $0x570] sm:$0xff] }
 0x36e   :  { %v8300_v43 = vcombine.low %v3406_v40, %v3410_v8 }
 0x36f   :  { %6707 = vmatpush1.bf16.msra.mxu0 %v8244_v53  ;;  %v8301_v53 = vcombine.high %v3406_v40, %v3410_v8  ;;  %v3455_v40 = vld [vmem:[#allocation8 + $0x6d8] sm:$0xff] }
 0x370   :  { %6871 = vmatpush1.bf16.msra.mxu1 %v8246_v25  ;;  %6708 = vmatprep.subr.bf16.mxu0 %v8253_v22  ;;  %v8303_v25 = vcombine.high %v3407_v42, %v3411_v9  ;;  %v3414_v22 = vld [vmem:[#allocation8 + $0x590] sm:$0xff]  ;;  %v3459_v8 = vld [vmem:[#allocation8 + $0x6f8] sm:$0xff]  ;;  %v8342_v9 = vcombine.low %v3447_v29, %v3451_v30 }
 0x371   :  { %6872 = vmatprep.subr.bf16.mxu1 %v8255_v50  ;;  %v3418_v50 = vld [vmem:[#allocation8 + $0x5b0] sm:$0xff] }
 0x373   :  { %6709 = vmatpush1.bf16.msra.mxu0 %v8252_v58  ;;  %v8309_v58 = vcombine.high %v3414_v22, %v3418_v50 }
 0x374   :  { %6873 = vmatpush1.bf16.msra.mxu1 %v8254_v60  ;;  %6719 = vmatprep.subr.bf16.mxu0 %v8261_v35  ;;  %v8311_v60 = vcombine.high %v3415_v52, %v3419_v54  ;;  %v3422_v35 = vld [vmem:[#allocation8 + $0x5d0] sm:$0xff]  ;;  %v8350_v54 = vcombine.low %v3455_v40, %v3459_v8 }
 0x375   :  { %6883 = vmatprep.subr.bf16.mxu1 %v8263_v61  ;;  %v3426_v61 = vld [vmem:[#allocation8 + $0x5f0] sm:$0xff] }
 0x376   :  { %6711 = vmatmul.mubr.bf16.vlgmr.msra.gmra.mrb[12].mxu0 %v9431_v32  ;;  %v8317_v3 = vcombine.high %v3422_v35, %v3426_v61 }
 0x377   :  { %6875 = vmatmul.mubr.bf16.vlgmr.msra.gmra.mrb[12].mxu1 %v9431_v32  ;;  %6720 = vmatpush1.bf16.msra.mxu0 %v8260_v1  ;;  %v8278_v32 = vcombine.low %v3383_v13, %v3387_v14  ;;  %v8308_v1 = vcombine.low %v3414_v22, %v3418_v50  ;;  %v8316_v13 = vcombine.low %v3422_v35, %v3426_v61  ;;  %v3463_v22 = vld [vmem:[#allocation8 + $0x718] sm:$0xff] }
 0x378   :  { %6751 = vmatprep.mubr.bf16.mxu0 %v9433_v36  ;;  %6884 = vmatpush1.bf16.msra.mxu1 %v8262_v0  ;;  %v8319_v0 = vcombine.high %v3423_v48, %v3427_v62  ;;  %v8318_v14 = vcombine.low %v3423_v48, %v3427_v62  ;;  %v3467_v50 = vld [vmem:[#allocation8 + $0x738] sm:$0xff] }
 0x379   :  { %6915 = vmatprep.mubr.bf16.mxu1 %v9433_v36  ;;  %6721 = vmatprep.subr.bf16.mxu0 %v8269_v4  ;;  %v8284_v36 = vcombine.low %v3390_v21, %v3394_v47  ;;  %v3430_v4 = vld [vmem:[#allocation8 + $0x610] sm:$0xff]  ;;  %v3439_v21 = vld [vmem:[#allocation8 + $0x658] sm:$0xff]  ;;  %v8358_v62 = vcombine.low %v3463_v22, %v3467_v50 }
 0x37a   :  { %6885 = vmatprep.subr.bf16.mxu1 %v8271_v6  ;;  %v3435_v6 = vld [vmem:[#allocation8 + $0x638] sm:$0xff]  ;;  %v8324_v59 = vcombine.low %v3430_v4, %v3434_v38 }
 0x37b   :  { %6722 = vmatpush1.bf16.msra.mxu0 %v8268_v15  ;;  %v8325_v15 = vcombine.high %v3430_v4, %v3434_v38  ;;  %v3443_v47 = vld [vmem:[#allocation8 + $0x678] sm:$0xff]  ;;  %v8326_v19 = vcombine.low %v3431_v11, %v3435_v6 }
 0x37c   :  { %6886 = vmatpush1.bf16.msra.mxu1 %v8270_v17  ;;  %6723 = vmatprep.subr.bf16.mxu0 %v8277_v18  ;;  %v8327_v17 = vcombine.high %v3431_v11, %v3435_v6  ;;  %v3438_v18 = vld [vmem:[#allocation8 + $0x650] sm:$0xff]  ;;  %v8334_v33 = vcombine.low %v3439_v21, %v3443_v47  ;;  %v3471_v35 = vld [vmem:[#allocation8 + $0x758] sm:$0xff] }
 0x37d   :  { %6887 = vmatprep.subr.bf16.mxu1 %v8279_v20  ;;  %v3442_v20 = vld [vmem:[#allocation8 + $0x670] sm:$0xff]  ;;  %v3475_v61 = vld [vmem:[#allocation8 + $0x778] sm:$0xff] }
 0x37e   :  { %v8332_v27 = vcombine.low %v3438_v18, %v3442_v20  ;;  %v3479_v4 = vld [vmem:[#allocation8 + $0x798] sm:$0xff]  ;;  %v8366_v6 = vcombine.low %v3471_v35, %v3475_v61 }
 0x37f   :  { %6724 = vmatpush1.bf16.msra.mxu0 %v8276_v23  ;;  %v8333_v23 = vcombine.high %v3438_v18, %v3442_v20  ;;  %v3483_v38 = vld [vmem:[#allocation8 + $0x7b8] sm:$0xff] }
 0x380   :  { %6888 = vmatpush1.bf16.msra.mxu1 %v8278_v32  ;;  %6725 = vmatprep.subr.bf16.mxu0 %v8285_v26  ;;  %v8335_v32 = vcombine.high %v3439_v21, %v3443_v47  ;;  %v3446_v26 = vld [vmem:[#allocation8 + $0x690] sm:$0xff]  ;;  %v3487_v18 = vld [vmem:[#allocation8 + $0x7d8] sm:$0xff]  ;;  %v8374_v47 = vcombine.low %v3479_v4, %v3483_v38 }
 0x381   :  { %6889 = vmatprep.subr.bf16.mxu1 %v8287_v28  ;;  %v3450_v28 = vld [vmem:[#allocation8 + $0x6b0] sm:$0xff]  ;;  %v3491_v20 = vld [vmem:[#allocation8 + $0x7f8] sm:$0xff] }
 0x382   :  { %v8340_v42 = vcombine.low %v3446_v26, %v3450_v28 }
 0x383   :  { %6726 = vmatpush1.bf16.msra.mxu0 %v8284_v36  ;;  %v8341_v36 = vcombine.high %v3446_v26, %v3450_v28  ;;  %v3495_v26 = vld [vmem:[#allocation8 + $0x818] sm:$0xff] }
 0x384   :  { %6890 = vmatpush1.bf16.msra.mxu1 %v8286_v34  ;;  %6727 = vmatprep.subr.bf16.mxu0 %v8293_v63  ;;  %v8343_v34 = vcombine.high %v3447_v29, %v3451_v30  ;;  %v3454_v63 = vld [vmem:[#allocation8 + $0x6d0] sm:$0xff]  ;;  %v3499_v28 = vld [vmem:[#allocation8 + $0x838] sm:$0xff]  ;;  %v8382_v30 = vcombine.low %v3487_v18, %v3491_v20 }
 0x385   :  { %6891 = vmatprep.subr.bf16.mxu1 %v8295_v37  ;;  %v3458_v37 = vld [vmem:[#allocation8 + $0x6f0] sm:$0xff] }
 0x386   :  { %v8348_v52 = vcombine.low %v3454_v63, %v3458_v37 }
 0x387   :  { %6728 = vmatpush1.bf16.msra.mxu0 %v8292_v46  ;;  %v8349_v46 = vcombine.high %v3454_v63, %v3458_v37  ;;  %v3503_v37 = vld [vmem:[#allocation8 + $0x858] sm:$0xff] }
 0x388   :  { %6892 = vmatpush1.bf16.msra.mxu1 %v8294_v49  ;;  %6729 = vmatprep.subr.bf16.mxu0 %v8301_v53  ;;  %v8351_v49 = vcombine.high %v3455_v40, %v3459_v8  ;;  %v3462_v53 = vld [vmem:[#allocation8 + $0x710] sm:$0xff]  ;;  %v3507_v40 = vld [vmem:[#allocation8 + $0x878] sm:$0xff]  ;;  %v8390_v8 = vcombine.low %v3495_v26, %v3499_v28 }
 0x389   :  { %6893 = vmatprep.subr.bf16.mxu1 %v8303_v25  ;;  %v3466_v25 = vld [vmem:[#allocation8 + $0x730] sm:$0xff] }
 0x38a   :  { %v8356_v48 = vcombine.low %v3462_v53, %v3466_v25 }
 0x38b   :  { %6730 = vmatpush1.bf16.msra.mxu0 %v8300_v43  ;;  %v8357_v43 = vcombine.high %v3462_v53, %v3466_v25  ;;  %v3511_v53 = vld [vmem:[#allocation8 + $0x898] sm:$0xff] }
 0x38c   :  { %6894 = vmatpush1.bf16.msra.mxu1 %v8302_v55  ;;  %6731 = vmatprep.subr.bf16.mxu0 %v8309_v58  ;;  %v8359_v55 = vcombine.high %v3463_v22, %v3467_v50  ;;  %v3470_v58 = vld [vmem:[#allocation8 + $0x750] sm:$0xff]  ;;  %v3515_v25 = vld [vmem:[#allocation8 + $0x8b8] sm:$0xff]  ;;  %v8398_v50 = vcombine.low %v3503_v37, %v3507_v40 }
 0x38d   :  { %6895 = vmatprep.subr.bf16.mxu1 %v8311_v60  ;;  %v3474_v60 = vld [vmem:[#allocation8 + $0x770] sm:$0xff] }
 0x38e   :  { %v8364_v11 = vcombine.low %v3470_v58, %v3474_v60 }
 0x38f   :  { %6732 = vmatpush1.bf16.msra.mxu0 %v8308_v1  ;;  %v8365_v1 = vcombine.high %v3470_v58, %v3474_v60  ;;  %v3519_v58 = vld [vmem:[#allocation8 + $0x8d8] sm:$0xff] }
 0x390   :  { %6896 = vmatpush1.bf16.msra.mxu1 %v8310_v2  ;;  %6733 = vmatprep.subr.bf16.mxu0 %v8317_v3  ;;  %v8367_v2 = vcombine.high %v3471_v35, %v3475_v61  ;;  %v3478_v3 = vld [vmem:[#allocation8 + $0x790] sm:$0xff]  ;;  %v3523_v60 = vld [vmem:[#allocation8 + $0x8f8] sm:$0xff] }
 0x391   :  { %6897 = vmatprep.subr.bf16.mxu1 %v8319_v0  ;;  %v3482_v0 = vld [vmem:[#allocation8 + $0x7b0] sm:$0xff] }
 0x392   :  { %v8372_v21 = vcombine.low %v3478_v3, %v3482_v0 }
 0x393   :  { %6734 = vmatpush1.bf16.msra.mxu0 %v8316_v13  ;;  %v8373_v13 = vcombine.high %v3478_v3, %v3482_v0  ;;  %v3531_v3 = vld [vmem:[#allocation8 + $0x938] sm:$0xff]  ;;  %v8414_v0 = vcombine.low %v3519_v58, %v3523_v60 }
 0x394   :  { %6898 = vmatpush1.bf16.msra.mxu1 %v8318_v14  ;;  %6735 = vmatprep.subr.bf16.mxu0 %v8325_v15  ;;  %v8375_v14 = vcombine.high %v3479_v4, %v3483_v38  ;;  %v3486_v15 = vld [vmem:[#allocation8 + $0x7d0] sm:$0xff] }
 0x395   :  { %6899 = vmatprep.subr.bf16.mxu1 %v8327_v17  ;;  %v3490_v17 = vld [vmem:[#allocation8 + $0x7f0] sm:$0xff] }
 0x396   :  { %v8380_v29 = vcombine.low %v3486_v15, %v3490_v17 }
 0x397   :  { %6736 = vmatpush1.bf16.msra.mxu0 %v8324_v59  ;;  %v8381_v59 = vcombine.high %v3486_v15, %v3490_v17 }
 0x398   :  { %6900 = vmatpush1.bf16.msra.mxu1 %v8326_v19  ;;  %6737 = vmatprep.subr.bf16.mxu0 %v8333_v23  ;;  %v8383_v19 = vcombine.high %v3487_v18, %v3491_v20  ;;  %v3494_v23 = vld [vmem:[#allocation8 + $0x810] sm:$0xff] }
 0x399   :  { %6901 = vmatprep.subr.bf16.mxu1 %v8335_v32  ;;  %v3498_v32 = vld [vmem:[#allocation8 + $0x830] sm:$0xff] }
 0x39a   :  { %v8388_v63 = vcombine.low %v3494_v23, %v3498_v32 }
 0x39b   :  { %6738 = vmatpush1.bf16.msra.mxu0 %v8332_v27  ;;  %v8389_v27 = vcombine.high %v3494_v23, %v3498_v32 }
 0x39c   :  { %6902 = vmatpush1.bf16.msra.mxu1 %v8334_v33  ;;  %6739 = vmatprep.subr.bf16.mxu0 %v8341_v36  ;;  %v8391_v33 = vcombine.high %v3495_v26, %v3499_v28  ;;  %v3502_v36 = vld [vmem:[#allocation8 + $0x850] sm:$0xff] }
 0x39d   :  { %6903 = vmatprep.subr.bf16.mxu1 %v8343_v34  ;;  %v3506_v34 = vld [vmem:[#allocation8 + $0x870] sm:$0xff] }
 0x39e   :  { %v8396_v22 = vcombine.low %v3502_v36, %v3506_v34 }
 0x39f   :  { %6740 = vmatpush1.bf16.msra.mxu0 %v8340_v42  ;;  %v8397_v42 = vcombine.high %v3502_v36, %v3506_v34 }
 0x3a0   :  { %6904 = vmatpush1.bf16.msra.mxu1 %v8342_v9  ;;  %6741 = vmatprep.subr.bf16.mxu0 %v8349_v46  ;;  %v3510_v9 = vld [vmem:[#allocation8 + $0x890] sm:$0xff] }
 0x3a1   :  { %6905 = vmatprep.subr.bf16.mxu1 %v8351_v49  ;;  %v3514_v46 = vld [vmem:[#allocation8 + $0x8b0] sm:$0xff]  ;;  %v8399_v49 = vcombine.high %v3503_v37, %v3507_v40 }
 0x3a2   :  { %v8404_v35 = vcombine.low %v3510_v9, %v3514_v46  ;;  %v3558_v40 = vld [vmem:[#allocation8 + $0xa10] sm:$0xff] }
 0x3a3   :  { %6742 = vmatpush1.bf16.msra.mxu0 %v8348_v52  ;;  %v8405_v52 = vcombine.high %v3510_v9, %v3514_v46  ;;  %v3563_v9 = vld [vmem:[#allocation8 + $0xa38] sm:$0xff] }
 0x3a4   :  { %6906 = vmatpush1.bf16.msra.mxu1 %v8350_v54  ;;  %6743 = vmatprep.subr.bf16.mxu0 %v8357_v43  ;;  %v8407_v54 = vcombine.high %v3511_v53, %v3515_v25  ;;  %v3518_v43 = vld [vmem:[#allocation8 + $0x8d0] sm:$0xff] }
 0x3a5   :  { %6907 = vmatprep.subr.bf16.mxu1 %v8359_v55  ;;  %v3522_v55 = vld [vmem:[#allocation8 + $0x8f0] sm:$0xff] }
 0x3a6   :  { %v8413_v61 = vcombine.high %v3518_v43, %v3522_v55 }
 0x3a7   :  { %6744 = vmatpush1.bf16.msra.mxu0 %v8356_v48  ;;  %v8415_v48 = vcombine.high %v3519_v58, %v3523_v60 }
 0x3a8   :  { %6908 = vmatpush1.bf16.msra.mxu1 %v8358_v62  ;;  %6745 = vmatprep.subr.bf16.mxu0 %v8365_v1  ;;  %v3526_v62 = vld [vmem:[#allocation8 + $0x910] sm:$0xff] }
 0x3a9   :  { %6909 = vmatprep.subr.bf16.mxu1 %v8367_v2  ;;  %v3530_v1 = vld [vmem:[#allocation8 + $0x930] sm:$0xff]  ;;  %v3527_v2 = vld [vmem:[#allocation8 + $0x918] sm:$0xff] }
 0x3aa   :  { %v8421_v4 = vcombine.high %v3526_v62, %v3530_v1  ;;  %v8423_v38 = vcombine.high %v3527_v2, %v3531_v3  ;;  %v8420_v15 = vcombine.low %v3526_v62, %v3530_v1  ;;  %v8422_v17 = vcombine.low %v3527_v2, %v3531_v3 }
 0x3ab   :  { %6746 = vmatpush1.bf16.msra.mxu0 %v8364_v11  ;;  %v3534_v11 = vld [vmem:[#allocation8 + $0x950] sm:$0xff] }
 0x3ac   :  { %6910 = vmatpush1.bf16.msra.mxu1 %v8366_v6  ;;  %6747 = vmatprep.subr.bf16.mxu0 %v8373_v13  ;;  %v3538_v6 = vld [vmem:[#allocation8 + $0x970] sm:$0xff]  ;;  %v3535_v13 = vld [vmem:[#allocation8 + $0x958] sm:$0xff] }
 0x3ad   :  { %6911 = vmatprep.subr.bf16.mxu1 %v8375_v14  ;;  %v3539_v14 = vld [vmem:[#allocation8 + $0x978] sm:$0xff]  ;;  %v8429_v18 = vcombine.high %v3534_v11, %v3538_v6  ;;  %v8428_v23 = vcombine.low %v3534_v11, %v3538_v6 }
 0x3ae   :  { %v8431_v20 = vcombine.high %v3535_v13, %v3539_v14  ;;  %v8430_v32 = vcombine.low %v3535_v13, %v3539_v14 }
 0x3af   :  { %6748 = vmatpush1.bf16.msra.mxu0 %v8372_v21  ;;  %v3542_v21 = vld [vmem:[#allocation8 + $0x990] sm:$0xff] }
 0x3b0   :  { %6912 = vmatpush1.bf16.msra.mxu1 %v8374_v47  ;;  %6749 = vmatprep.subr.bf16.mxu0 %v8381_v59  ;;  %v3546_v47 = vld [vmem:[#allocation8 + $0x9b0] sm:$0xff]  ;;  %v3543_v59 = vld [vmem:[#allocation8 + $0x998] sm:$0xff] }
 0x3b1   :  { %6913 = vmatprep.subr.bf16.mxu1 %v8383_v19  ;;  %v3547_v19 = vld [vmem:[#allocation8 + $0x9b8] sm:$0xff]  ;;  %v8437_v26 = vcombine.high %v3542_v21, %v3546_v47  ;;  %v8436_v36 = vcombine.low %v3542_v21, %v3546_v47 }
 0x3b2   :  { %v8439_v28 = vcombine.high %v3543_v59, %v3547_v19  ;;  %v8438_v34 = vcombine.low %v3543_v59, %v3547_v19 }
 0x3b3   :  { %6750 = vmatpush1.bf16.msra.mxu0 %v8380_v29  ;;  %v3550_v29 = vld [vmem:[#allocation8 + $0x9d0] sm:$0xff] }
 0x3b4   :  { %6914 = vmatpush1.bf16.msra.mxu1 %v8382_v30  ;;  %6760 = vmatprep.subr.bf16.mxu0 %v8389_v27  ;;  %v3554_v30 = vld [vmem:[#allocation8 + $0x9f0] sm:$0xff]  ;;  %v3551_v27 = vld [vmem:[#allocation8 + $0x9d8] sm:$0xff] }
 0x3b5   :  { %6924 = vmatprep.subr.bf16.mxu1 %v8391_v33  ;;  %v3555_v33 = vld [vmem:[#allocation8 + $0x9f8] sm:$0xff]  ;;  %v8444_v46 = vcombine.low %v3550_v29, %v3554_v30 }
 0x3b6   :  { %6752 = vmatmul.mubr.bf16.vlgmr.msra.gmra.mrb[12].mxu0 %v9444_v57  ;;  %v8447_v37 = vcombine.high %v3551_v27, %v3555_v33 }
 0x3b7   :  { %6916 = vmatmul.mubr.bf16.vlgmr.msra.gmra.mrb[12].mxu1 %v9444_v57  ;;  %6761 = vmatpush1.bf16.msra.mxu0 %v8388_v63  ;;  %v8406_v57 = vcombine.low %v3511_v53, %v3515_v25  ;;  %v8445_v63 = vcombine.high %v3550_v29, %v3554_v30 }
 0x3b8   :  { %6792 = vmatprep.mubr.bf16.mxu0 %v9464_v39  ;;  %6925 = vmatpush1.bf16.msra.mxu1 %v8390_v8  ;;  %v3562_v8 = vld [vmem:[#allocation8 + $0xa30] sm:$0xff] }
 0x3b9   :  { %6956 = vmatprep.mubr.bf16.mxu1 %v9464_v39  ;;  %6762 = vmatprep.subr.bf16.mxu0 %v8397_v42  ;;  %v8412_v39 = vcombine.low %v3518_v43, %v3522_v55  ;;  %v3559_v42 = vld [vmem:[#allocation8 + $0xa18] sm:$0xff]  ;;  %v8453_v53 = vcombine.high %v3558_v40, %v3562_v8  ;;  %v8452_v43 = vcombine.low %v3558_v40, %v3562_v8 }
 0x3ba   :  { %6926 = vmatprep.subr.bf16.mxu1 %v8399_v49  ;;  %v8446_v49 = vcombine.low %v3551_v27, %v3555_v33  ;;  %v8455_v25 = vcombine.high %v3559_v42, %v3563_v9  ;;  %v8454_v55 = vcombine.low %v3559_v42, %v3563_v9 }
 0x3bb   :  { %6763 = vmatpush1.bf16.msra.mxu0 %v8396_v22  ;;  %v3566_v22 = vld [vmem:[#allocation8 + $0xa50] sm:$0xff] }
 0x3bc   :  { %6927 = vmatpush1.bf16.msra.mxu1 %v8398_v50  ;;  %6764 = vmatprep.subr.bf16.mxu0 %v8405_v52  ;;  %v3570_v50 = vld [vmem:[#allocation8 + $0xa70] sm:$0xff]  ;;  %v3567_v52 = vld [vmem:[#allocation8 + $0xa58] sm:$0xff] }
 0x3bd   :  { %6928 = vmatprep.subr.bf16.mxu1 %v8407_v54  ;;  %v3571_v54 = vld [vmem:[#allocation8 + $0xa78] sm:$0xff]  ;;  %v8461_v58 = vcombine.high %v3566_v22, %v3570_v50  ;;  %v8460_v62 = vcombine.low %v3566_v22, %v3570_v50 }
 0x3be   :  { %v8463_v60 = vcombine.high %v3567_v52, %v3571_v54  ;;  %v8462_v1 = vcombine.low %v3567_v52, %v3571_v54 }
 0x3bf   :  { %6765 = vmatpush1.bf16.msra.mxu0 %v8404_v35  ;;  %v3574_v35 = vld [vmem:[#allocation8 + $0xa90] sm:$0xff] }
 0x3c0   :  { %6929 = vmatpush1.bf16.msra.mxu1 %v8406_v57  ;;  %6766 = vmatprep.subr.bf16.mxu0 %v8413_v61  ;;  %v3578_v57 = vld [vmem:[#allocation8 + $0xab0] sm:$0xff]  ;;  %v3575_v61 = vld [vmem:[#allocation8 + $0xa98] sm:$0xff] }
 0x3c1   :  { %6930 = vmatprep.subr.bf16.mxu1 %v8415_v48  ;;  %v3579_v48 = vld [vmem:[#allocation8 + $0xab8] sm:$0xff]  ;;  %v8469_v2 = vcombine.high %v3574_v35, %v3578_v57  ;;  %v8468_v11 = vcombine.low %v3574_v35, %v3578_v57 }
 0x3c2   :  { %v8471_v3 = vcombine.high %v3575_v61, %v3579_v48  ;;  %v8470_v6 = vcombine.low %v3575_v61, %v3579_v48 }
 0x3c3   :  { %6767 = vmatpush1.bf16.msra.mxu0 %v8412_v39  ;;  %v3582_v39 = vld [vmem:[#allocation8 + $0xad0] sm:$0xff] }
 0x3c4   :  { %6931 = vmatpush1.bf16.msra.mxu1 %v8414_v0  ;;  %6768 = vmatprep.subr.bf16.mxu0 %v8421_v4  ;;  %v3586_v0 = vld [vmem:[#allocation8 + $0xaf0] sm:$0xff]  ;;  %v3583_v4 = vld [vmem:[#allocation8 + $0xad8] sm:$0xff] }
 0x3c5   :  { %6932 = vmatprep.subr.bf16.mxu1 %v8423_v38  ;;  %v3587_v38 = vld [vmem:[#allocation8 + $0xaf8] sm:$0xff]  ;;  %v8477_v13 = vcombine.high %v3582_v39, %v3586_v0  ;;  %v8476_v21 = vcombine.low %v3582_v39, %v3586_v0 }
 0x3c6   :  { %v8479_v14 = vcombine.high %v3583_v4, %v3587_v38  ;;  %v8478_v47 = vcombine.low %v3583_v4, %v3587_v38  ;;  %v3635_v39 = vld [vmem:[#allocation8 + $0xc78] sm:$0xff]  ;;  %v3638_v38 = vld [vmem:[#allocation8 + $0xc90] sm:$0xff] }
 0x3c7   :  { %6769 = vmatpush1.bf16.msra.mxu0 %v8420_v15  ;;  %v3590_v15 = vld [vmem:[#allocation8 + $0xb10] sm:$0xff] }
 0x3c8   :  { %6933 = vmatpush1.bf16.msra.mxu1 %v8422_v17  ;;  %6770 = vmatprep.subr.bf16.mxu0 %v8429_v18  ;;  %v3594_v17 = vld [vmem:[#allocation8 + $0xb30] sm:$0xff]  ;;  %v3591_v18 = vld [vmem:[#allocation8 + $0xb18] sm:$0xff] }
 0x3c9   :  { %6934 = vmatprep.subr.bf16.mxu1 %v8431_v20  ;;  %v3595_v20 = vld [vmem:[#allocation8 + $0xb38] sm:$0xff]  ;;  %v8485_v59 = vcombine.high %v3590_v15, %v3594_v17  ;;  %v8484_v29 = vcombine.low %v3590_v15, %v3594_v17 }
 0x3ca   :  { %v8487_v19 = vcombine.high %v3591_v18, %v3595_v20  ;;  %v8486_v30 = vcombine.low %v3591_v18, %v3595_v20 }
 0x3cb   :  { %6771 = vmatpush1.bf16.msra.mxu0 %v8428_v23  ;;  %v3598_v23 = vld [vmem:[#allocation8 + $0xb50] sm:$0xff] }
 0x3cc   :  { %6935 = vmatpush1.bf16.msra.mxu1 %v8430_v32  ;;  %6772 = vmatprep.subr.bf16.mxu0 %v8437_v26  ;;  %v3602_v32 = vld [vmem:[#allocation8 + $0xb70] sm:$0xff]  ;;  %v3599_v26 = vld [vmem:[#allocation8 + $0xb58] sm:$0xff] }
 0x3cd   :  { %6936 = vmatprep.subr.bf16.mxu1 %v8439_v28  ;;  %v3603_v28 = vld [vmem:[#allocation8 + $0xb78] sm:$0xff]  ;;  %v8493_v27 = vcombine.high %v3598_v23, %v3602_v32  ;;  %v8492_v40 = vcombine.low %v3598_v23, %v3602_v32 }
 0x3ce   :  { %v8495_v33 = vcombine.high %v3599_v26, %v3603_v28  ;;  %v8494_v8 = vcombine.low %v3599_v26, %v3603_v28  ;;  %v3654_v28 = vld [vmem:[#allocation8 + $0xd10] sm:$0xff] }
 0x3cf   :  { %6773 = vmatpush1.bf16.msra.mxu0 %v8436_v36  ;;  %v3606_v36 = vld [vmem:[#allocation8 + $0xb90] sm:$0xff] }
 0x3d0   :  { %6937 = vmatpush1.bf16.msra.mxu1 %v8438_v34  ;;  %6774 = vmatprep.subr.bf16.mxu0 %v8445_v63  ;;  %v3610_v34 = vld [vmem:[#allocation8 + $0xbb0] sm:$0xff]  ;;  %v3607_v63 = vld [vmem:[#allocation8 + $0xb98] sm:$0xff] }
 0x3d1   :  { %6938 = vmatprep.subr.bf16.mxu1 %v8447_v37  ;;  %v3611_v37 = vld [vmem:[#allocation8 + $0xbb8] sm:$0xff]  ;;  %v8501_v42 = vcombine.high %v3606_v36, %v3610_v34  ;;  %v8500_v22 = vcombine.low %v3606_v36, %v3610_v34 }
 0x3d2   :  { %v8503_v9 = vcombine.high %v3607_v63, %v3611_v37  ;;  %v8502_v50 = vcombine.low %v3607_v63, %v3611_v37  ;;  %v3662_v63 = vld [vmem:[#allocation8 + $0xd50] sm:$0xff] }
 0x3d3   :  { %6775 = vmatpush1.bf16.msra.mxu0 %v8444_v46  ;;  %v3614_v46 = vld [vmem:[#allocation8 + $0xbd0] sm:$0xff] }
 0x3d4   :  { %6939 = vmatpush1.bf16.msra.mxu1 %v8446_v49  ;;  %6776 = vmatprep.subr.bf16.mxu0 %v8453_v53  ;;  %v3618_v49 = vld [vmem:[#allocation8 + $0xbf0] sm:$0xff]  ;;  %v3615_v53 = vld [vmem:[#allocation8 + $0xbd8] sm:$0xff] }
 0x3d5   :  { %6940 = vmatprep.subr.bf16.mxu1 %v8455_v25  ;;  %v3619_v25 = vld [vmem:[#allocation8 + $0xbf8] sm:$0xff]  ;;  %v8509_v52 = vcombine.high %v3614_v46, %v3618_v49  ;;  %v8508_v35 = vcombine.low %v3614_v46, %v3618_v49  ;;  %v3666_v37 = vld [vmem:[#allocation8 + $0xd70] sm:$0xff] }
 0x3d6   :  { %v8511_v54 = vcombine.high %v3615_v53, %v3619_v25  ;;  %v8510_v57 = vcombine.low %v3615_v53, %v3619_v25  ;;  %v8557_v46 = vcombine.high %v3662_v63, %v3666_v37  ;;  %v3670_v53 = vld [vmem:[#allocation8 + $0xd90] sm:$0xff] }
 0x3d7   :  { %6777 = vmatpush1.bf16.msra.mxu0 %v8452_v43  ;;  %v3622_v43 = vld [vmem:[#allocation8 + $0xc10] sm:$0xff] }
 0x3d8   :  { %6941 = vmatpush1.bf16.msra.mxu1 %v8454_v55  ;;  %6778 = vmatprep.subr.bf16.mxu0 %v8461_v58  ;;  %v3626_v55 = vld [vmem:[#allocation8 + $0xc30] sm:$0xff]  ;;  %v3623_v58 = vld [vmem:[#allocation8 + $0xc18] sm:$0xff] }
 0x3d9   :  { %6942 = vmatprep.subr.bf16.mxu1 %v8463_v60  ;;  %v3627_v60 = vld [vmem:[#allocation8 + $0xc38] sm:$0xff]  ;;  %v8517_v61 = vcombine.high %v3622_v43, %v3626_v55  ;;  %v3674_v25 = vld [vmem:[#allocation8 + $0xdb0] sm:$0xff] }
 0x3da   :  { %v8519_v48 = vcombine.high %v3623_v58, %v3627_v60  ;;  %v8518_v0 = vcombine.low %v3623_v58, %v3627_v60 }
 0x3db   :  { %6779 = vmatpush1.bf16.msra.mxu0 %v8460_v62  ;;  %v3630_v62 = vld [vmem:[#allocation8 + $0xc50] sm:$0xff] }
 0x3dc   :  { %6943 = vmatpush1.bf16.msra.mxu1 %v8462_v1  ;;  %6780 = vmatprep.subr.bf16.mxu0 %v8469_v2  ;;  %v3634_v1 = vld [vmem:[#allocation8 + $0xc70] sm:$0xff]  ;;  %v8516_v2 = vcombine.low %v3622_v43, %v3626_v55  ;;  %v8565_v43 = vcombine.high %v3670_v53, %v3674_v25 }
 0x3dd   :  { %6944 = vmatprep.subr.bf16.mxu1 %v8471_v3  ;;  %v3631_v3 = vld [vmem:[#allocation8 + $0xc58] sm:$0xff]  ;;  %v8525_v4 = vcombine.high %v3630_v62, %v3634_v1  ;;  %v8524_v15 = vcombine.low %v3630_v62, %v3634_v1 }
 0x3de   :  { %v8526_v17 = vcombine.low %v3631_v3, %v3635_v39  ;;  %v3679_v62 = vld [vmem:[#allocation8 + $0xdd8] sm:$0xff] }
 0x3df   :  { %6781 = vmatpush1.bf16.msra.mxu0 %v8468_v11  ;;  %v3642_v11 = vld [vmem:[#allocation8 + $0xcb0] sm:$0xff]  ;;  %v3683_v1 = vld [vmem:[#allocation8 + $0xdf8] sm:$0xff] }
 0x3e0   :  { %6945 = vmatpush1.bf16.msra.mxu1 %v8470_v6  ;;  %6782 = vmatprep.subr.bf16.mxu0 %v8477_v13  ;;  %v8527_v6 = vcombine.high %v3631_v3, %v3635_v39  ;;  %v3639_v13 = vld [vmem:[#allocation8 + $0xc98] sm:$0xff]  ;;  %v8533_v18 = vcombine.high %v3638_v38, %v3642_v11  ;;  %v8532_v23 = vcombine.low %v3638_v38, %v3642_v11 }
 0x3e1   :  { %6946 = vmatprep.subr.bf16.mxu1 %v8479_v14  ;;  %v3643_v14 = vld [vmem:[#allocation8 + $0xcb8] sm:$0xff]  ;;  %v8564_v39 = vcombine.low %v3670_v53, %v3674_v25 }
 0x3e2   :  { %v8535_v20 = vcombine.high %v3639_v13, %v3643_v14 }
 0x3e3   :  { %6783 = vmatpush1.bf16.msra.mxu0 %v8476_v21  ;;  %v3646_v21 = vld [vmem:[#allocation8 + $0xcd0] sm:$0xff] }
 0x3e4   :  { %6947 = vmatpush1.bf16.msra.mxu1 %v8478_v47  ;;  %6784 = vmatprep.subr.bf16.mxu0 %v8485_v59  ;;  %v3650_v47 = vld [vmem:[#allocation8 + $0xcf0] sm:$0xff]  ;;  %v3647_v59 = vld [vmem:[#allocation8 + $0xcd8] sm:$0xff] }
 0x3e5   :  { %6948 = vmatprep.subr.bf16.mxu1 %v8487_v19  ;;  %v3651_v19 = vld [vmem:[#allocation8 + $0xcf8] sm:$0xff]  ;;  %v8541_v32 = vcombine.high %v3646_v21, %v3650_v47 }
 0x3e6   :  { %v8543_v26 = vcombine.high %v3647_v59, %v3651_v19 }
 0x3e7   :  { %6785 = vmatpush1.bf16.msra.mxu0 %v8484_v29  ;;  %v3658_v29 = vld [vmem:[#allocation8 + $0xd30] sm:$0xff] }
 0x3e8   :  { %6949 = vmatpush1.bf16.msra.mxu1 %v8486_v30  ;;  %6786 = vmatprep.subr.bf16.mxu0 %v8493_v27  ;;  %v3655_v30 = vld [vmem:[#allocation8 + $0xd18] sm:$0xff]  ;;  %v8549_v36 = vcombine.high %v3654_v28, %v3658_v29 }
 0x3e9   :  { %6950 = vmatprep.subr.bf16.mxu1 %v8495_v33  ;;  %v3659_v27 = vld [vmem:[#allocation8 + $0xd38] sm:$0xff]  ;;  %v8542_v33 = vcombine.low %v3647_v59, %v3651_v19  ;;  %v3694_v59 = vld [vmem:[#allocation8 + $0xe50] sm:$0xff] }
 0x3ea   :  { %v8551_v34 = vcombine.high %v3655_v30, %v3659_v27  ;;  %v3698_v19 = vld [vmem:[#allocation8 + $0xe70] sm:$0xff] }
 0x3eb   :  { %6787 = vmatpush1.bf16.msra.mxu0 %v8492_v40  ;;  %v3663_v40 = vld [vmem:[#allocation8 + $0xd58] sm:$0xff] }
 0x3ec   :  { %6951 = vmatpush1.bf16.msra.mxu1 %v8494_v8  ;;  %6788 = vmatprep.subr.bf16.mxu0 %v8501_v42  ;;  %v3667_v8 = vld [vmem:[#allocation8 + $0xd78] sm:$0xff]  ;;  %v8548_v42 = vcombine.low %v3654_v28, %v3658_v29  ;;  %v8589_v28 = vcombine.high %v3694_v59, %v3698_v19 }
 0x3ed   :  { %6952 = vmatprep.subr.bf16.mxu1 %v8503_v9  ;;  %v8550_v9 = vcombine.low %v3655_v30, %v3659_v27  ;;  %v8559_v49 = vcombine.high %v3663_v40, %v3667_v8  ;;  %v3702_v30 = vld [vmem:[#allocation8 + $0xe90] sm:$0xff] }
 0x3ee   :  { %v3706_v27 = vld [vmem:[#allocation8 + $0xeb0] sm:$0xff] }
 0x3ef   :  { %6789 = vmatpush1.bf16.msra.mxu0 %v8500_v22  ;;  %v3671_v22 = vld [vmem:[#allocation8 + $0xd98] sm:$0xff] }
 0x3f0   :  { %6953 = vmatpush1.bf16.msra.mxu1 %v8502_v50  ;;  %6790 = vmatprep.subr.bf16.mxu0 %v8509_v52  ;;  %v3675_v50 = vld [vmem:[#allocation8 + $0xdb8] sm:$0xff]  ;;  %v8556_v52 = vcombine.low %v3662_v63, %v3666_v37  ;;  %v8597_v63 = vcombine.high %v3702_v30, %v3706_v27 }
 0x3f1   :  { %6954 = vmatprep.subr.bf16.mxu1 %v8511_v54  ;;  %v8558_v54 = vcombine.low %v3663_v40, %v3667_v8  ;;  %v8567_v60 = vcombine.high %v3671_v22, %v3675_v50  ;;  %v8566_v38 = vcombine.low %v3671_v22, %v3675_v50  ;;  %v3710_v40 = vld [vmem:[#allocation8 + $0xed0] sm:$0xff] }
 0x3f2   :  { %v3714_v8 = vld [vmem:[#allocation8 + $0xef0] sm:$0xff] }
 0x3f3   :  { %6791 = vmatpush1.bf16.msra.mxu0 %v8508_v35  ;;  %v3678_v35 = vld [vmem:[#allocation8 + $0xdd0] sm:$0xff]  ;;  %v8605_v53 = vcombine.high %v3710_v40, %v3714_v8 }
 0x3f4   :  { %6955 = vmatpush1.bf16.msra.mxu1 %v8510_v57  ;;  %6801 = vmatprep.subr.bf16.mxu0 %v8517_v61  ;;  %v3682_v57 = vld [vmem:[#allocation8 + $0xdf0] sm:$0xff] }
 0x3f5   :  { %6965 = vmatprep.subr.bf16.mxu1 %v8519_v48  ;;  %v8573_v11 = vcombine.high %v3678_v35, %v3682_v57  ;;  %v3718_v22 = vld [vmem:[#allocation8 + $0xf10] sm:$0xff] }
 0x3f6   :  { %6793 = vmatmul.mubr.bf16.vlgmr.msra.gmra.mrb[12].mxu0 %v9466_v41  ;;  %v3722_v50 = vld [vmem:[#allocation8 + $0xf30] sm:$0xff] }
 0x3f7   :  { %6957 = vmatmul.mubr.bf16.vlgmr.msra.gmra.mrb[12].mxu1 %v9466_v41  ;;  %6802 = vmatpush1.bf16.msra.mxu0 %v8516_v2  ;;  %v8534_v41 = vcombine.low %v3639_v13, %v3643_v14  ;;  %v3686_v13 = vld [vmem:[#allocation8 + $0xe10] sm:$0xff] }
 0x3f8   :  { %6833 = vmatprep.mubr.bf16.mxu0 %v9470_v31  ;;  %6966 = vmatpush1.bf16.msra.mxu1 %v8518_v0  ;;  %v3690_v14 = vld [vmem:[#allocation8 + $0xe30] sm:$0xff] }
 0x3f9   :  { %6997 = vmatprep.mubr.bf16.mxu1 %v9470_v31  ;;  %6803 = vmatprep.subr.bf16.mxu0 %v8525_v4  ;;  %v8540_v31 = vcombine.low %v3646_v21, %v3650_v47  ;;  %v8581_v21 = vcombine.high %v3686_v13, %v3690_v14 }
 0x3fa   :  { %6967 = vmatprep.subr.bf16.mxu1 %v8527_v6  ;;  %v8575_v6 = vcombine.high %v3679_v62, %v3683_v1 }
 0x3fb   :  { %6804 = vmatpush1.bf16.msra.mxu0 %v8524_v15  ;;  %v3687_v15 = vld [vmem:[#allocation8 + $0xe18] sm:$0xff] }
 0x3fc   :  { %6968 = vmatpush1.bf16.msra.mxu1 %v8526_v17  ;;  %6805 = vmatprep.subr.bf16.mxu0 %v8533_v18  ;;  %v3691_v17 = vld [vmem:[#allocation8 + $0xe38] sm:$0xff]  ;;  %v8572_v18 = vcombine.low %v3678_v35, %v3682_v57  ;;  %v8613_v35 = vcombine.high %v3718_v22, %v3722_v50 }
 0x3fd   :  { %6969 = vmatprep.subr.bf16.mxu1 %v8535_v20  ;;  %v8574_v20 = vcombine.low %v3679_v62, %v3683_v1  ;;  %v8583_v47 = vcombine.high %v3687_v15, %v3691_v17  ;;  %v3726_v62 = vld [vmem:[#allocation8 + $0xf50] sm:$0xff] }
 0x3fe   :  { %v3730_v1 = vld [vmem:[#allocation8 + $0xf70] sm:$0xff] }
 0x3ff   :  { %6806 = vmatpush1.bf16.msra.mxu0 %v8532_v23  ;;  %v3695_v23 = vld [vmem:[#allocation8 + $0xe58] sm:$0xff] }
 0x400   :  { %6970 = vmatpush1.bf16.msra.mxu1 %v8534_v41  ;;  %6807 = vmatprep.subr.bf16.mxu0 %v8541_v32  ;;  %v3699_v41 = vld [vmem:[#allocation8 + $0xe78] sm:$0xff]  ;;  %v8580_v32 = vcombine.low %v3686_v13, %v3690_v14 }
 0x401   :  { %6971 = vmatprep.subr.bf16.mxu1 %v8543_v26  ;;  %v8582_v26 = vcombine.low %v3687_v15, %v3691_v17  ;;  %v8591_v29 = vcombine.high %v3695_v23, %v3699_v41  ;;  %v3735_v13 = vld [vmem:[#allocation8 + $0xf98] sm:$0xff]  ;;  %v9507_v15 = vld [vmem:[#allocation10] sm:$0xff]  ;;  %v8620_v17 = vcombine.low %v3726_v62, %v3730_v1 }
 0x402   :  { %v3739_v14 = vld [vmem:[#allocation8 + $0xfb8] sm:$0xff] }
 0x403   :  { %6808 = vmatpush1.bf16.msra.mxu0 %v8540_v31  ;;  %v3703_v31 = vld [vmem:[#allocation8 + $0xe98] sm:$0xff] }
 0x404   :  { %6972 = vmatpush1.bf16.msra.mxu1 %v8542_v33  ;;  %6809 = vmatprep.subr.bf16.mxu0 %v8549_v36  ;;  %v3707_v33 = vld [vmem:[#allocation8 + $0xeb8] sm:$0xff]  ;;  %v8588_v36 = vcombine.low %v3694_v59, %v3698_v19  ;;  %v3746_v59 = vld [vmem:[#allocation8 + $0xff0] sm:$0xff]  ;;  %v3757_v19 = vrot.slane %v9507_v15, %v566_v5 }
 0x405   :  { %6973 = vmatprep.subr.bf16.mxu1 %v8551_v34  ;;  %v8590_v34 = vcombine.low %v3695_v23, %v3699_v41  ;;  %v8599_v37 = vcombine.high %v3703_v31, %v3707_v33  ;;  %v3743_v23 = vld [vmem:[#allocation8 + $0xfd8] sm:$0xff] }
 0x406   :  { %v3747_v41 = vld [vmem:[#allocation8 + $0xff8] sm:$0xff] }
 0x407   :  { %6810 = vmatpush1.bf16.msra.mxu0 %v8548_v42  ;;  %v3711_v42 = vld [vmem:[#allocation8 + $0xed8] sm:$0xff] }
 0x408   :  { %6974 = vmatpush1.bf16.msra.mxu1 %v8550_v9  ;;  %6811 = vmatprep.subr.bf16.mxu0 %v8557_v46  ;;  %v3715_v9 = vld [vmem:[#allocation8 + $0xef8] sm:$0xff]  ;;  %v8596_v46 = vcombine.low %v3702_v30, %v3706_v27  ;;  %v8639_v30 = vcombine.high %v3743_v23, %v3747_v41 }
 0x409   :  { %v9499_v55 = vpop.f32.mrb[8].mxu0  ;;  %v9501_v58 = vpop.f32.mrb[8].mxu1  ;;  %6975 = vmatprep.subr.bf16.mxu1 %v8559_v49  ;;  %v8598_v49 = vcombine.low %v3703_v31, %v3707_v33  ;;  %v8607_v25 = vcombine.high %v3711_v42, %v3715_v9  ;;  %v8638_v33 = vcombine.low %v3743_v23, %v3747_v41  ;;  %v8956_v23 = vld [vmem:[#allocation11 + $0x180] sm:$0xff]   ;;  %v8957_v41 = vld [vmem:[#allocation11 + $0x148] sm:$0xff]  }
 0x40a   :  { %v9503_v61 = vpop.f32.mrb[9].mxu0  ;;  %v9505_v48 = vpop.f32.mrb[9].mxu1 }
 0x40b   :  { %v6511_v2 = vpop.f32.mrb[10].mxu0  ;;  %v6675_v3 = vpop.f32.mrb[10].mxu1  ;;  %6812 = vmatpush1.bf16.msra.mxu0 %v8556_v52  ;;  %v3719_v52 = vld [vmem:[#allocation8 + $0xf18] sm:$0xff]  ;;  %v8802_v27 = vadd.f32 %v9503_v61, %v3757_v19 }
 0x40c   :  { %6976 = vmatpush1.bf16.msra.mxu1 %v8558_v54  ;;  %v6512_v0 = vpop.f32.mrb[11].mxu0  ;;  %v6676_v4 = vpop.f32.mrb[11].mxu1  ;;  %6813 = vmatprep.subr.bf16.mxu0 %v8565_v43  ;;  %v3723_v54 = vld [vmem:[#allocation8 + $0xf38] sm:$0xff]  ;;  %v8604_v43 = vcombine.low %v3710_v40, %v3714_v8  ;;  %v8924_v40 = vld [vmem:[#allocation11 + $0x80] sm:$0xff]   ;;  %v8925_v8 = vld [vmem:[#allocation11 + $0x48] sm:$0xff]  }
 0x40d   :  { %6977 = vmatprep.subr.bf16.mxu1 %v8567_v60  ;;  %v8606_v60 = vcombine.low %v3711_v42, %v3715_v9  ;;  %v8615_v57 = vcombine.high %v3719_v52, %v3723_v54  ;;  %v3727_v2 = vld [vmem:[#allocation8 + $0xf58] sm:$0xff]  ;;  %v8614_v0 = vcombine.low %v3719_v52, %v3723_v54  ;;  %v8621_v4 = vcombine.high %v3726_v62, %v3730_v1  ;;  %v8927_v9 = vld [vmem:[#allocation11 + $0x8] sm:$0xff]   ;;  %v8934_v52 = vld [vmem:[#allocation11 + $0xd8] sm:$0xff]  }
 0x40e   :  { %v3731_v3 = vld [vmem:[#allocation8 + $0xf78] sm:$0xff]  ;;  %v8936_v54 = vld [vmem:[#allocation11 + $0x98] sm:$0xff]   ;;  %v8941_v62 = vld [vmem:[#allocation11 + $0x68] sm:$0xff]  }
 0x40f   :  { %6814 = vmatpush1.bf16.msra.mxu0 %v8564_v39  ;;  %v8612_v39 = vcombine.low %v3718_v22, %v3722_v50  ;;  %v8932_v22 = vld [vmem:[#allocation11 + $0x90] sm:$0xff]   ;;  %v8933_v50 = vld [vmem:[#allocation11 + $0x58] sm:$0xff]   ;;  %v8942_v1 = vld [vmem:[#allocation11 + $0xe8] sm:$0xff]  }
 0x410   :  { %6978 = vmatpush1.bf16.msra.mxu1 %v8566_v38  ;;  %6815 = vmatprep.subr.bf16.mxu0 %v8573_v11  ;;  %v8623_v38 = vcombine.high %v3727_v2, %v3731_v3  ;;  %v3734_v11 = vld [vmem:[#allocation8 + $0xf90] sm:$0xff] }
 0x411   :  { %6979 = vmatprep.subr.bf16.mxu1 %v8575_v6  ;;  %v3738_v6 = vld [vmem:[#allocation8 + $0xfb0] sm:$0xff] }
 0x413   :  { %6816 = vmatpush1.bf16.msra.mxu0 %v8572_v18  ;;  %v8622_v18 = vcombine.low %v3727_v2, %v3731_v3  ;;  %v8943_v2 = vld [vmem:[#allocation11 + $0x28] sm:$0xff]   ;;  %v3753_v3 = vrot.slane %v9507_v15, %v562_v51 }
 0x414   :  { %6980 = vmatpush1.bf16.msra.mxu1 %v8574_v20  ;;  %6817 = vmatprep.subr.bf16.mxu0 %v8581_v21  ;;  %v8629_v20 = vcombine.high %v3734_v11, %v3738_v6  ;;  %v8631_v21 = vcombine.high %v3735_v13, %v3739_v14 }
 0x415   :  { %6981 = vmatprep.subr.bf16.mxu1 %v8583_v47  ;;  %v3742_v47 = vld [vmem:[#allocation8 + $0xfd0] sm:$0xff] }
 0x416   :  { %v8636_v5 = vcombine.low %v3742_v47, %v3746_v59 }
 0x417   :  { %6818 = vmatpush1.bf16.msra.mxu0 %v8580_v32  ;;  %v3765_v32 = vrot.slane %v9507_v15, %v574_v16  ;;  %v8922_v16 = vld [vmem:[#allocation11 + $0xc0] sm:$0xff]  }
 0x418   :  { %6982 = vmatpush1.bf16.msra.mxu1 %v8582_v26  ;;  %6819 = vmatprep.subr.bf16.mxu0 %v8589_v28  ;;  %v8628_v26 = vcombine.low %v3734_v11, %v3738_v6  ;;  %v8630_v28 = vcombine.low %v3735_v13, %v3739_v14  ;;  %v8947_v11 = vld [vmem:[#allocation11 + $0x30] sm:$0xff]   ;;  %v8801_v6 = vadd.f32 %v9499_v55, %v3753_v3  ;;  %v8949_v14 = vld [vmem:[#allocation11 + $0x78] sm:$0xff]   ;;  %v8955_v55 = vld [vmem:[#allocation11 + $0x100] sm:$0xff]  }
 0x419   :  { %6983 = vmatprep.subr.bf16.mxu1 %v8591_v29  ;;  %v8637_v29 = vcombine.high %v3742_v47, %v3746_v59  ;;  %v8804_v31 = vadd.f32 %v9505_v48, %v3765_v32  ;;  %v8926_v48 = vld [vmem:[#allocation11 + $0xc8] sm:$0xff]   ;;  %v8948_v13 = vld [vmem:[#allocation11 + $0xb0] sm:$0xff]   ;;  %v8954_v59 = vld [vmem:[#allocation11 + $0x1c0] sm:$0xff]  }
 0x41a   :  { %v8958_v32 = vld [vmem:[#allocation11 + $0x1c8] sm:$0xff]  }
 0x41b   :  { %6820 = vmatpush1.bf16.msra.mxu0 %v8588_v36  ;;  %v8921_v36 = vld [vmem:[#allocation11 + $0x40] sm:$0xff]  }
 0x41c   :  { %6984 = vmatpush1.bf16.msra.mxu1 %v8590_v34  ;;  %6821 = vmatprep.subr.bf16.mxu0 %v8597_v63  ;;  %v7007_v34 = vmax.f32 %v8802_v27, 0.0  ;;  %v7009_v63 = vmax.f32 %v8804_v31, 0.0  ;;  %v8963_v27 = vld [vmem:[#allocation11 + $0x110] sm:$0xff]  }
 0x41d   :  { %6985 = vmatprep.subr.bf16.mxu1 %v8599_v37  ;;  %v8923_v37 = vld [vmem:[#allocation11] sm:$0xff]   ;;  %v8964_v31 = vld [vmem:[#allocation11 + $0x190] sm:$0xff]  }
 0x41e   :  { %v7015_v61 = vpack.c.bf16 %v7007_v34, %v7007_v34  ;;  %v7017_v42 = vpack.c.bf16 %v7009_v63, %v7009_v63  ;;  %v8969_v34 = vld [vmem:[#allocation11 + $0x160] sm:$0xff]  }
 0x41f   :  { %6822 = vmatpush1.bf16.msra.mxu0 %v8596_v46  ;;  %v8928_v46 = vld [vmem:[#allocation11 + $0x88] sm:$0xff]   ;;  %v8970_v63 = vld [vmem:[#allocation11 + $0x1e0] sm:$0xff]  }
 0x420   :  { %6986 = vmatpush1.bf16.msra.mxu1 %v8598_v49  ;;  %6823 = vmatprep.subr.bf16.mxu0 %v8605_v53  ;;  %v8929_v49 = vld [vmem:[#allocation11 + $0x50] sm:$0xff]  }
 0x421   :  { %6987 = vmatprep.subr.bf16.mxu1 %v8607_v25  ;;  %v8930_v53 = vld [vmem:[#allocation11 + $0xd0] sm:$0xff]  }
 0x422   :  { %v8931_v25 = vld [vmem:[#allocation11 + $0x10] sm:$0xff]  }
 0x423   :  { %6824 = vmatpush1.bf16.msra.mxu0 %v8604_v43  ;;  %v8937_v43 = vld [vmem:[#allocation11 + $0x60] sm:$0xff]  }
 0x424   :  { %6988 = vmatpush1.bf16.msra.mxu1 %v8606_v60  ;;  %6825 = vmatprep.subr.bf16.mxu0 %v8613_v35  ;;  %v8938_v60 = vld [vmem:[#allocation11 + $0xe0] sm:$0xff]  }
 0x425   :  { %6989 = vmatprep.subr.bf16.mxu1 %v8615_v57  ;;  %v8939_v35 = vld [vmem:[#allocation11 + $0x20] sm:$0xff]  }
 0x426   :  { %v8940_v57 = vld [vmem:[#allocation11 + $0xa0] sm:$0xff]  }
 0x427   :  { %6826 = vmatpush1.bf16.msra.mxu0 %v8612_v39  ;;  %v8944_v39 = vld [vmem:[#allocation11 + $0xa8] sm:$0xff]  }
 0x428   :  { %6990 = vmatpush1.bf16.msra.mxu1 %v8614_v0  ;;  %6827 = vmatprep.subr.bf16.mxu0 %v8621_v4  ;;  %v8945_v0 = vld [vmem:[#allocation11 + $0x70] sm:$0xff]   ;;  %v3761_v4 = vrot.slane %v9507_v15, %v570_v12  ;;  %v8952_v12 = vld [vmem:[#allocation11 + $0xb8] sm:$0xff]  }
 0x429   :  { %6991 = vmatprep.subr.bf16.mxu1 %v8623_v38  ;;  %v8946_v38 = vld [vmem:[#allocation11 + $0xf0] sm:$0xff]  }
 0x42a   :  { %v8803_v51 = vadd.f32 %v9501_v58, %v3761_v4 }
 0x42b   :  { %6828 = vmatpush1.bf16.msra.mxu0 %v8620_v17  ;;  %v8950_v17 = vld [vmem:[#allocation11 + $0xf8] sm:$0xff]  }
 0x42c   :  { %6992 = vmatpush1.bf16.msra.mxu1 %v8622_v18  ;;  %6829 = vmatprep.subr.bf16.mxu0 %v8629_v20  ;;  %v8951_v18 = vld [vmem:[#allocation11 + $0x38] sm:$0xff]   ;;  %v7006_v20 = vmax.f32 %v8801_v6, 0.0  ;;  %v7008_v47 = vmax.f32 %v8803_v51, 0.0 }
 0x42d   :  { %6993 = vmatprep.subr.bf16.mxu1 %v8631_v21  ;;  %v8953_v21 = vld [vmem:[#allocation11 + $0x140] sm:$0xff]  }
 0x42e   :  { %v7014_v19 = vpack.c.bf16 %v7006_v20, %v7006_v20  ;;  %v7016_v58 = vpack.c.bf16 %v7008_v47, %v7008_v47 }
 0x42f   :  { %6830 = vmatpush1.bf16.msra.mxu0 %v8628_v26  ;;  %v8959_v26 = vld [vmem:[#allocation11 + $0x108] sm:$0xff]  }
 0x430   :  { %6994 = vmatpush1.bf16.msra.mxu1 %v8630_v28  ;;  %6831 = vmatprep.subr.bf16.mxu0 %v8637_v29  ;;  %v8960_v28 = vld [vmem:[#allocation11 + $0x188] sm:$0xff]   ;;  %v8961_v29 = vld [vmem:[#allocation11 + $0x150] sm:$0xff]  }
 0x431   :  { %6995 = vmatprep.subr.bf16.mxu1 %v8639_v30  ;;  %v8962_v30 = vld [vmem:[#allocation11 + $0x1d0] sm:$0xff]  }
 0x433   :  { %6832 = vmatpush1.bf16.msra.mxu0 %v8636_v5  ;;  %v8965_v5 = vld [vmem:[#allocation11 + $0x158] sm:$0xff]  }
 0x434   :  { %6996 = vmatpush1.bf16.msra.mxu1 %v8638_v33  ;;  %8705 = vmatprep.subr.bf16.mxu0 %v8921_v36  ;;  %v8966_v33 = vld [vmem:[#allocation11 + $0x1d8] sm:$0xff]  }
 0x435   :  { %8727 = vmatprep.subr.bf16.mxu1 %v8922_v16  ;;  %v8967_v36 = vld [vmem:[#allocation11 + $0x118] sm:$0xff]  }
 0x436   :  { %6834 = vmatmul.mubr.bf16.vlgmr.msra.gmra.mrb[12].mxu0 %v9481_v24  ;;  %v8968_v16 = vld [vmem:[#allocation11 + $0x198] sm:$0xff]  }
 0x437   :  { %6998 = vmatmul.mubr.bf16.vlgmr.msra.gmra.mrb[12].mxu1 %v9481_v24  ;;  %8706 = vmatpush3.bf16.msra.mxu0 %v8923_v37  ;;  %v8935_v24 = vld [vmem:[#allocation11 + $0x18] sm:$0xff]   ;;  %v8971_v37 = vld [vmem:[#allocation11 + $0x120] sm:$0xff]  }
 0x438   :  { %7573 = vmatprep.mubr.bf16.mxu0 %v7015_v61  ;;  %8728 = vmatpush3.bf16.msra.mxu1 %v8924_v40  ;;  %v8972_v40 = vld [vmem:[#allocation11 + $0x1a0] sm:$0xff]   ;;  %v8974_v61 = vld [vmem:[#allocation11 + $0x1e8] sm:$0xff]  }
 0x439   :  { %7613 = vmatprep.mubr.bf16.mxu1 %v7017_v42  ;;  %8707 = vmatprep.subr.bf16.mxu0 %v8925_v8  ;;  %v8973_v8 = vld [vmem:[#allocation11 + $0x168] sm:$0xff]  }
 0x43a   :  { %8729 = vmatprep.subr.bf16.mxu1 %v8926_v48  ;;  %v8975_v48 = vld [vmem:[#allocation11 + $0x128] sm:$0xff]  }
 0x43b   :  { %8708 = vmatpush3.bf16.msra.mxu0 %v8927_v9  ;;  %v8976_v42 = vld [vmem:[#allocation11 + $0x1a8] sm:$0xff]   ;;  %v8977_v9 = vld [vmem:[#allocation11 + $0x170] sm:$0xff]  }
 0x43c   :  { %8730 = vmatpush3.bf16.msra.mxu1 %v8928_v46  ;;  %8709 = vmatprep.subr.bf16.mxu0 %v8929_v49  ;;  %v8978_v46 = vld [vmem:[#allocation11 + $0x1f0] sm:$0xff]  }
 0x43d   :  { %8731 = vmatprep.subr.bf16.mxu1 %v8930_v53  ;;  %v8979_v49 = vld [vmem:[#allocation11 + $0x130] sm:$0xff]  }
 0x43e   :  { %v8980_v53 = vld [vmem:[#allocation11 + $0x1b0] sm:$0xff]  }
 0x43f   :  { %8710 = vmatpush3.bf16.msra.mxu0 %v8931_v25  ;;  %v8981_v25 = vld [vmem:[#allocation11 + $0x178] sm:$0xff]  }
 0x440   :  { %8732 = vmatpush3.bf16.msra.mxu1 %v8932_v22  ;;  %8711 = vmatprep.subr.bf16.mxu0 %v8933_v50  ;;  %v8982_v22 = vld [vmem:[#allocation11 + $0x1f8] sm:$0xff]  }
 0x441   :  { %8733 = vmatprep.subr.bf16.mxu1 %v8934_v52  ;;  %v8983_v50 = vld [vmem:[#allocation11 + $0x138] sm:$0xff]  }
 0x442   :  { %v8984_v52 = vld [vmem:[#allocation11 + $0x1b8] sm:$0xff]  }
 0x443   :  { %8712 = vmatpush3.bf16.msra.mxu0 %v8935_v24  ;;  %v3769_v24 = vrot.slane %v9507_v15, %v578_v7 }
 0x444   :  { %8734 = vmatpush3.bf16.msra.mxu1 %v8936_v54  ;;  %8713 = vmatprep.subr.bf16.mxu0 %v8937_v43  ;;  %v3777_v54 = vrot.slane %v9507_v15, %v586_v45  ;;  %v3773_v43 = vrot.slane %v9507_v15, %v582_v56 }
 0x445   :  { %8735 = vmatprep.subr.bf16.mxu1 %v8938_v60  ;;  %v3781_v60 = vrot.slane %v9507_v15, %v590_v10 }
 0x447   :  { %8714 = vmatpush3.bf16.msra.mxu0 %v8939_v35 }
 0x448   :  { %8736 = vmatpush3.bf16.msra.mxu1 %v8940_v57  ;;  %8715 = vmatprep.subr.bf16.mxu0 %v8941_v62 }
 0x449   :  { %8737 = vmatprep.subr.bf16.mxu1 %v8942_v1 }
 0x44b   :  { %8716 = vmatpush3.bf16.msra.mxu0 %v8943_v2 }
 0x44c   :  { %8738 = vmatpush3.bf16.msra.mxu1 %v8944_v39  ;;  %8717 = vmatprep.subr.bf16.mxu0 %v8945_v0 }
 0x44d   :  { %8739 = vmatprep.subr.bf16.mxu1 %v8946_v38 }
 0x44f   :  { %8718 = vmatpush3.bf16.msra.mxu0 %v8947_v11 }
 0x450   :  { %8740 = vmatpush3.bf16.msra.mxu1 %v8948_v13  ;;  %8719 = vmatprep.subr.bf16.mxu0 %v8949_v14 }
 0x451   :  { %8741 = vmatprep.subr.bf16.mxu1 %v8950_v17 }
 0x453   :  { %8720 = vmatpush3.bf16.msra.mxu0 %v8951_v18  ;;  %v8640_v18 = vld [vmem:[#allocation13] ss:$0 sm:$0xff] }
 0x454   :  { %8742 = vmatpush3.bf16.msra.mxu1 %v8952_v12  ;;  %8749 = vmatprep.subr.bf16.mxu0 %v8953_v21 }
 0x455   :  { %8771 = vmatprep.subr.bf16.mxu1 %v8954_v59 }
 0x456   :  { %7574 = vmatmul.mubr.bf16.vlgmr.msra.gmra.mrb[16].mxu0 %v7014_v19 }
 0x457   :  { %7614 = vmatmul.mubr.bf16.vlgmr.msra.gmra.mrb[16].mxu1 %v7016_v58  ;;  %8750 = vmatpush3.bf16.msra.mxu0 %v8955_v55 }
 0x458   :  { %8772 = vmatpush3.bf16.msra.mxu1 %v8956_v23  ;;  %8751 = vmatprep.subr.bf16.mxu0 %v8957_v41 }
 0x459   :  { %8773 = vmatprep.subr.bf16.mxu1 %v8958_v32 }
 0x45b   :  { %8752 = vmatpush3.bf16.msra.mxu0 %v8959_v26 }
 0x45c   :  { %8774 = vmatpush3.bf16.msra.mxu1 %v8960_v28  ;;  %8753 = vmatprep.subr.bf16.mxu0 %v8961_v29 }
 0x45d   :  { %8775 = vmatprep.subr.bf16.mxu1 %v8962_v30 }
 0x45f   :  { %8754 = vmatpush3.bf16.msra.mxu0 %v8963_v27 }
 0x460   :  { %8776 = vmatpush3.bf16.msra.mxu1 %v8964_v31  ;;  %8755 = vmatprep.subr.bf16.mxu0 %v8965_v5 }
 0x461   :  { %8777 = vmatprep.subr.bf16.mxu1 %v8966_v33 }
 0x463   :  { %8756 = vmatpush3.bf16.msra.mxu0 %v8967_v36 }
 0x464   :  { %8778 = vmatpush3.bf16.msra.mxu1 %v8968_v16  ;;  %8757 = vmatprep.subr.bf16.mxu0 %v8969_v34 }
 0x465   :  { %8779 = vmatprep.subr.bf16.mxu1 %v8970_v63 }
 0x467   :  { %8758 = vmatpush3.bf16.msra.mxu0 %v8971_v37 }
 0x468   :  { %8780 = vmatpush3.bf16.msra.mxu1 %v8972_v40  ;;  %8759 = vmatprep.subr.bf16.mxu0 %v8973_v8 }
 0x469   :  { %8781 = vmatprep.subr.bf16.mxu1 %v8974_v61 }
 0x46b   :  { %8760 = vmatpush3.bf16.msra.mxu0 %v8975_v48 }
 0x46c   :  { %8782 = vmatpush3.bf16.msra.mxu1 %v8976_v42  ;;  %8761 = vmatprep.subr.bf16.mxu0 %v8977_v9 }
 0x46d   :  { %8783 = vmatprep.subr.bf16.mxu1 %v8978_v46 }
 0x46f   :  { %8762 = vmatpush3.bf16.msra.mxu0 %v8979_v49 }
 0x470   :  { %8784 = vmatpush3.bf16.msra.mxu1 %v8980_v53  ;;  %8763 = vmatprep.subr.bf16.mxu0 %v8981_v25 }
 0x471   :  { %8785 = vmatprep.subr.bf16.mxu1 %v8982_v22 }
 0x473   :  { %8764 = vmatpush3.bf16.msra.mxu0 %v8983_v50 }
 0x474   :  { %8786 = vmatpush3.bf16.msra.mxu1 %v8984_v52 }
 0x509   :  { %v6835_v35 = vpop.f32.mrb[12].mxu0 }
 0x50a   :  { %v8805_v57 = vadd.f32 %v6835_v35, %v3769_v24  ;;  %v6999_v62 = vpop.f32.mrb[12].mxu1  ;;  %v6837_v1 = vpop.f32.mrb[13].mxu0 }
 0x50b   :  { %v8807_v2 = vadd.f32 %v6999_v62, %v3777_v54  ;;  %v8806_v3 = vadd.f32 %v6837_v1, %v3773_v43  ;;  %v7001_v39 = vpop.f32.mrb[13].mxu1  ;;  %v6839_v7 = vpop.f32.mrb[14].mxu0 }
 0x50c   :  { %v7010_v0 = vmax.f32 %v8805_v57, 0.0  ;;  %v8808_v4 = vadd.f32 %v7001_v39, %v3781_v60  ;;  %v7003_v38 = vpop.f32.mrb[14].mxu1  ;;  %v6840_v45 = vpop.f32.mrb[15].mxu0 }
 0x50d   :  { %v7012_v11 = vmax.f32 %v8807_v2, 0.0  ;;  %v7011_v6 = vmax.f32 %v8806_v3, 0.0  ;;  %v7004_v13 = vpop.f32.mrb[15].mxu1 }
 0x50e   :  { %v7013_v56 = vmax.f32 %v8808_v4, 0.0  ;;  %v7018_v44 = vpack.c.bf16 %v7010_v0, %v7010_v0 }
 0x50f   :  { %v7019_v14 = vpack.c.bf16 %v7011_v6, %v7011_v6  ;;  %v7020_v10 = vpack.c.bf16 %v7012_v11, %v7012_v11 }
 0x510   :  { %v7021_v51 = vpack.c.bf16 %v7013_v56, %v7013_v56 }
 0x511   :  { %7653 = vmatprep.mubr.bf16.mxu0 %v7019_v14 }
 0x512   :  { %7693 = vmatprep.mubr.bf16.mxu1 %v7021_v51  ;;  %7654 = vmatmul.mubr.bf16.vlgmr.msra.gmra.mrb[20].mxu0 %v7018_v44 }
 0x513   :  { %7694 = vmatmul.mubr.bf16.vlgmr.msra.gmra.mrb[20].mxu1 %v7020_v10 }
 0x529   :  { %v8721_v15 = vpop.f32.mrb[16].mxu0 }
 0x52a   :  { %v8743_v17 = vpop.f32.mrb[16].mxu1  ;;  %v8722_v20 = vpop.f32.mrb[17].mxu0 }
 0x52b   :  { %v8723_v12 = vadd.f32 %v8722_v20, %v8721_v15  ;;  %v8744_v21 = vpop.f32.mrb[17].mxu1  ;;  %v8724_v47 = vpop.f32.mrb[18].mxu0 }
 0x52c   :  { %v8745_v59 = vadd.f32 %v8744_v21, %v8743_v17  ;;  %v8746_v55 = vpop.f32.mrb[18].mxu1  ;;  %v8725_v19 = vpop.f32.mrb[19].mxu0 }
 0x52d   :  { %v7576_v23 = vadd.f32 %v8723_v12, %v8640_v18  ;;  %v8747_v41 = vpop.f32.mrb[19].mxu1 }
 0x52f   :  { %v7616_v58 = vadd.f32 %v8745_v59, %v7576_v23 }
 0x5e5   :  { %v8765_v32 = vpop.f32.mrb[20].mxu0 }
 0x5e6   :  { %v8787_v26 = vpop.f32.mrb[20].mxu1  ;;  %v8766_v28 = vpop.f32.mrb[21].mxu0 }
 0x5e7   :  { %v8767_v29 = vadd.f32 %v8766_v28, %v8765_v32  ;;  %v8788_v30 = vpop.f32.mrb[21].mxu1  ;;  %v8768_v27 = vpop.f32.mrb[22].mxu0 }
 0x5e8   :  { %v8789_v31 = vadd.f32 %v8788_v30, %v8787_v26  ;;  %v8790_v5 = vpop.f32.mrb[22].mxu1  ;;  %v8769_v33 = vpop.f32.mrb[23].mxu0 }
 0x5e9   :  { %v7656_v36 = vadd.f32 %v8767_v29, %v7616_v58  ;;  %v8791_v16 = vpop.f32.mrb[23].mxu1 }
 0x5eb   :  { %v7696_v34 = vadd.f32 %v8789_v31, %v7656_v36 }
 0x5ed   :  { %v7702_v63 = vsel %vm7701_vm1, %v7696_v34, -inf }
 0x5ee   :  { %7703 = vmax.xlane.f32.xlu0 %v7702_v63 }
 0x67b   :  { %v7704_v37 = vpop.xlane.xlu0 %7703 }
 0x67c   :  { %v7705_v40 = vsub.f32 %v7696_v34, %v7704_v37 }
 0x67e   :  { %v7706_v8 = vmul.f32 1.442695, %v7705_v40 }
 0x680   :  { %8985 = vpow2.f32 %v7706_v8 }
 0x68a   :  { %v8986_v61 = vpop.eup %8985 }
 0x68b   :  { %v7708_v48 = vsel %vm7701_vm1, %v8986_v61, 0.0 }
 0x68c   :  { %7709 = vadd.xlane.f32.xlu0 %v7708_v48 }
 0x719   :  { %v7710_v42 = vpop.xlane.xlu0 %7709 }
 0x71a   :  { %8987 = vrcp.f32 %v7710_v42 }
 0x724   :  { %v8988_v9 = vpop.eup %8987 }
 0x725   :  { %v7712_v46 = vmul.f32 %v8988_v9, %v8986_v61 }
 0x727   :  { %7713 = vst [vmem:[#allocation14] sm:$0x3] %v7712_v46 }
 0x728   :  { %9155 = shalt.err (!%p9152_p4)
}
 0x729   :  { %s9156_s11 = scalar_lea.hbm %s9558_s7, 32 }
 0x72a   :  { %p9157_p5 = scmp.ne.s32.totalorder %s9558_s7, %s9156_s11  ;;  %p9160_p6 = scmp.lt.u32.totalorder %s9156_s11, %s9558_s7 }
 0x72c   :  { %p9162_p7 = pnand %p9160_p6, %p9157_p5 }
 0x72e   :  { %9165 = shalt.err (!%p9162_p7)
}
 0x72f   :  { %7723 = dma.vmem_to_hbm [thread:$0]  %s7721_s13, 32, %s9558_s7, [#allocation4]  }
 0x730   :  { %9174 = dma.done.wait [#allocation4], 32  }
 0x731   :  { %9175 = vsyncadd [#allocation4], 4294967264 }
 0x732   :  { %7727 = vsyncpa [#allocation3], 1 }
 0x733   :  { %7728 = vsyncpa [#allocation6], 1 }
 0x734   :  { %7729 = vsyncpa [#allocation9], 1 }
 0x735   :  { %7730 = vsyncpa [#allocation12], 1 }
 0x736   :  { %7731 = vsyncpa [#allocation4], 1 }

</bundles_post_ra>
